<compile_context>
chip_gen: v5e
topology: v5e:2x2
jax: 0.10.0
libtpu: 0.0.40
codegen_flags: <defaults>
</compile_context>

<pallas_src>
import functools

import jax
import jax.numpy as jnp
from jax.experimental import pallas as pl
from jax.experimental.pallas import tpu as pltpu

_LANE = 128
_VMEM_LIMIT = 48 * 1024 * 1024  # fits v7x's 64 MiB physical VMEM with headroom


def _round_up(x, m):
    return (x + m - 1) // m * m


def _conv_stats_kernel(xpad_ref, w_ref, y_ref, stat_ref, *, TH, W):
    """Pass 1: 3x3 conv as one im2col matmul + per-tile BN partial sums.

    xpad_ref: (1, H+2, W+2, Cin)  compute dtype (bf16), zero-padded input,
              resident across the row-tile grid axis (index_map ignores r).
    w_ref   : (9*Cin, Cp)         compute dtype, im2col-reshaped weight.
    y_ref   : (1, TH, W, Cp)      f32 conv output tile.
    stat_ref: (1, 1, 2, Cp)       f32 [sum; sum of squares] for this tile.
    """
    r = pl.program_id(1)
    Cin = xpad_ref.shape[-1]
    Cp = w_ref.shape[-1]
    row0 = pl.multiple_of(r * TH, TH)

    # im2col patch: 9 shifted taps loaded straight from the ref (no full-tile
    # materialization), concatenated along the channel axis.
    taps = []
    for dy in range(3):
        for dx in range(3):
            taps.append(xpad_ref[:, pl.ds(row0 + dy, TH), pl.ds(dx, W), :])
    patch = jnp.concatenate(taps, axis=-1).reshape(TH * W, 9 * Cin)

    # Single MXU matmul (bf16 operands, f32 accumulation).
    acc = jnp.dot(patch, w_ref[...], preferred_element_type=jnp.float32)

    y_ref[...] = acc.reshape(1, TH, W, Cp)

    s = jnp.sum(acc, axis=0, keepdims=True)           # (1, Cp)
    ss = jnp.sum(acc * acc, axis=0, keepdims=True)    # (1, Cp)
    stat_ref[...] = jnp.concatenate([s, ss], axis=0).reshape(1, 1, 2, Cp)


def _bn_relu_kernel(y_ref, scale_ref, shift_ref, o_ref):
    """Pass 2: folded BatchNorm affine (y*scale + shift) then ReLU."""
    z = y_ref[...] * scale_ref[...] + shift_ref[...]
    o_ref[...] = jnp.maximum(z, 0.0)


def conv_bn_relu(x_nhwc, w_hwio, gamma, beta, *, eps=1e-5,
                 compute_dtype=jnp.bfloat16):
    """3x3 conv (stride 1, pad 1, no bias) + BatchNorm2d(train) + ReLU.

    Returns NHWC with the channel axis zero-padded to a multiple of 128
    (pad channels are exactly zero); callers slice off the padding.
    """
    N, H, W, Cin = x_nhwc.shape
    kCin, Cout = w_hwio.shape[2], w_hwio.shape[3]
    Cp = _round_up(Cout, _LANE)

    TH = 8 if H % 8 == 0 else H          # rows per tile -> M = TH*W matmul rows
    R = H // TH

    # Pad weight input channels up to the (possibly lane-padded) activation,
    # pad output channels to the lane-dense width, reshape HWIO -> (9*Cin, Cp).
    w = jnp.pad(w_hwio, ((0, 0), (0, 0), (0, Cin - kCin), (0, Cp - Cout)))
    w = w.reshape(9 * Cin, Cp).astype(compute_dtype)

    gp = jnp.pad(gamma.astype(jnp.float32), (0, Cp - Cout))
    bp = jnp.pad(beta.astype(jnp.float32), (0, Cp - Cout))

    # Spatial zero-pad (SAME for a 3x3 / stride-1 conv).
    xpad = jnp.pad(x_nhwc, ((0, 0), (1, 1), (1, 1), (0, 0))).astype(compute_dtype)

    y, stats = pl.pallas_call(
        functools.partial(_conv_stats_kernel, TH=TH, W=W),
        out_shape=(
            jax.ShapeDtypeStruct((N, H, W, Cp), jnp.float32),
            jax.ShapeDtypeStruct((N, R, 2, Cp), jnp.float32),
        ),
        grid=(N, R),
        in_specs=[
            pl.BlockSpec((1, H + 2, W + 2, Cin), lambda n, r: (n, 0, 0, 0)),
            pl.BlockSpec((9 * Cin, Cp), lambda n, r: (0, 0)),
        ],
        out_specs=(
            pl.BlockSpec((1, TH, W, Cp), lambda n, r: (n, r, 0, 0)),
            pl.BlockSpec((1, 1, 2, Cp), lambda n, r: (n, r, 0, 0)),
        ),
        compiler_params=pltpu.CompilerParams(
            dimension_semantics=("parallel", "parallel"),
            vmem_limit_bytes=_VMEM_LIMIT),
    )(xpad, w)

    # Global training-mode BN statistics (biased variance) from the per-tile
    # partials; fold gamma/beta into a per-channel scale/shift (f32).
    cnt = float(N * H * W)
    mean = jnp.sum(stats[:, :, 0, :], axis=(0, 1)) / cnt
    var = jnp.maximum(jnp.sum(stats[:, :, 1, :], axis=(0, 1)) / cnt - mean * mean, 0.0)
    scale = gp * jax.lax.rsqrt(var + eps)
    shift = bp - mean * scale

    out = pl.pallas_call(
        _bn_relu_kernel,
        out_shape=jax.ShapeDtypeStruct((N, H, W, Cp), jnp.float32),
        grid=(N, R),
        in_specs=[
            pl.BlockSpec((1, TH, W, Cp), lambda n, r: (n, r, 0, 0)),
            pl.BlockSpec((1, Cp), lambda n, r: (0, 0)),
            pl.BlockSpec((1, Cp), lambda n, r: (0, 0)),
        ],
        out_specs=pl.BlockSpec((1, TH, W, Cp), lambda n, r: (n, r, 0, 0)),
        compiler_params=pltpu.CompilerParams(
            dimension_semantics=("parallel", "parallel"),
            vmem_limit_bytes=_VMEM_LIMIT),
    )(y, scale.reshape(1, Cp), shift.reshape(1, Cp))
    return out


def double_conv(x_nchw, params, *, eps=1e-5):
    """Pallas DoubleConv forward. Input NCHW (PyTorch convention), output NCHW."""
    out_channel = params["w2"].shape[-1]
    x = jnp.transpose(x_nchw, (0, 2, 3, 1))              # NCHW -> NHWC
    x = conv_bn_relu(x, params["w1"], params["g1"], params["b1"], eps=eps)
    x = conv_bn_relu(x, params["w2"], params["g2"], params["b2"], eps=eps)
    x = x[..., :out_channel]                              # drop lane-padding channels
    return jnp.transpose(x, (0, 3, 1, 2))                 # NHWC -> NCHW


# -------------------------- pure-JAX reference -------------------------------
def _ref_block(x_nhwc, w_hwio, gamma, beta, eps=1e-5):
    y = jax.lax.conv_general_dilated(
        x_nhwc, w_hwio, window_strides=(1, 1), padding="SAME",
        dimension_numbers=("NHWC", "HWIO", "NHWC"))
    mean = jnp.mean(y, axis=(0, 1, 2))
    var = jnp.mean((y - mean) ** 2, axis=(0, 1, 2))
    y = (y - mean) * jax.lax.rsqrt(var + eps) * gamma + beta
    return jnp.maximum(y, 0.0)


def double_conv_ref(x_nchw, params, *, eps=1e-5):
    x = jnp.transpose(x_nchw, (0, 2, 3, 1))
    x = _ref_block(x, params["w1"], params["g1"], params["b1"], eps)
    x = _ref_block(x, params["w2"], params["g2"], params["b2"], eps)
    return jnp.transpose(x, (0, 3, 1, 2))


if __name__ == "__main__":
    key = jax.random.PRNGKey(0)
    k_x, k_w1, k_w2, k_g1, k_b1, k_g2, k_b2 = jax.random.split(key, 7)

    N, Cin, H, W = 2, 4, 16, 16
    Cmid, Cout = 8, 8  # mid_channel defaults to out_channel

    x = jax.random.normal(k_x, (N, Cin, H, W), dtype=jnp.float32)

    # Deterministic synthetic parameters (HWIO conv weights, BN gamma/beta).
    params = {
        "w1": 0.1 * jax.random.normal(k_w1, (3, 3, Cin, Cmid), dtype=jnp.float32),
        "w2": 0.1 * jax.random.normal(k_w2, (3, 3, Cmid, Cout), dtype=jnp.float32),
        "g1": 1.0 + 0.1 * jax.random.normal(k_g1, (Cmid,), dtype=jnp.float32),
        "b1": 0.1 * jax.random.normal(k_b1, (Cmid,), dtype=jnp.float32),
        "g2": 1.0 + 0.1 * jax.random.normal(k_g2, (Cout,), dtype=jnp.float32),
        "b2": 0.1 * jax.random.normal(k_b2, (Cout,), dtype=jnp.float32),
    }

    out = jax.block_until_ready(jax.jit(double_conv)(x, params))
    ref = jax.block_until_ready(double_conv_ref(x, params))

    assert out.shape == (N, Cout, H, W), out.shape
    # bf16 MXU operands (f32 accumulation / f32 BN stats) vs a pure-f32
    # reference -> allow ~1e-2 relative error.
    max_err = float(jnp.max(jnp.abs(out - ref)))
    assert jnp.allclose(out, ref, rtol=2e-2, atol=2e-2), max_err

    print("KERNEL_OK")
</pallas_src>

<mosaic_0001>
module attributes {stable_mosaic.version = 11 : i64} {
  func.func @_conv_stats_kernel(%arg0: i32, %arg1: i32, %arg2: memref<1x18x18x4xbf16, #tpu.memory_space<vmem>>, %arg3: memref<36x128xbf16, #tpu.memory_space<vmem>>, %arg4: memref<1x8x16x128xf32, #tpu.memory_space<vmem>>, %arg5: memref<1x1x2x128xf32, #tpu.memory_space<vmem>>) attributes {dimension_semantics = [#tpu.dimension_semantics<parallel>, #tpu.dimension_semantics<parallel>], iteration_bounds = array<i64: 2, 2>, scalar_prefetch = 0 : i64, scratch_operands = 0 : i64, tpu.core_type = #tpu.core_type<tc>, window_params = [{transform_indices = @transform_0, window_bounds = array<i64: 1, 18, 18, 4>}, {pipeline_mode = #tpu.pipeline_mode<synchronous>, transform_indices = @transform_1, window_bounds = array<i64: 36, 128>}, {transform_indices = @transform_2, window_bounds = array<i64: 1, 8, 16, 128>}, {transform_indices = @transform_3, window_bounds = array<i64: 1, 1, 2, 128>}]} {
    %c8_i32 = arith.constant 8 : i32
    %0 = arith.muli %arg1, %c8_i32 : i32
    %1 = tpu.assume_multiple %0, 8 : i32
    %c0_i32 = arith.constant 0 : i32
    %2 = arith.addi %1, %c0_i32 : i32
    %c0 = arith.constant 0 : index
    %3 = arith.index_cast %2 : i32 to index
    %c0_0 = arith.constant 0 : index
    %c0_1 = arith.constant 0 : index
    %4 = vector.load %arg2[%c0, %3, %c0_0, %c0_1] : memref<1x18x18x4xbf16, #tpu.memory_space<vmem>>, vector<1x8x16x4xbf16>
    %c0_i32_2 = arith.constant 0 : i32
    %5 = arith.addi %1, %c0_i32_2 : i32
    %c0_3 = arith.constant 0 : index
    %6 = arith.index_cast %5 : i32 to index
    %c1 = arith.constant 1 : index
    %c0_4 = arith.constant 0 : index
    %7 = vector.load %arg2[%c0_3, %6, %c1, %c0_4] : memref<1x18x18x4xbf16, #tpu.memory_space<vmem>>, vector<1x8x16x4xbf16>
    %c0_i32_5 = arith.constant 0 : i32
    %8 = arith.addi %1, %c0_i32_5 : i32
    %c0_6 = arith.constant 0 : index
    %9 = arith.index_cast %8 : i32 to index
    %c2 = arith.constant 2 : index
    %c0_7 = arith.constant 0 : index
    %10 = vector.load %arg2[%c0_6, %9, %c2, %c0_7] : memref<1x18x18x4xbf16, #tpu.memory_space<vmem>>, vector<1x8x16x4xbf16>
    %c1_i32 = arith.constant 1 : i32
    %11 = arith.addi %1, %c1_i32 : i32
    %c0_8 = arith.constant 0 : index
    %12 = arith.index_cast %11 : i32 to index
    %c0_9 = arith.constant 0 : index
    %c0_10 = arith.constant 0 : index
    %13 = vector.load %arg2[%c0_8, %12, %c0_9, %c0_10] : memref<1x18x18x4xbf16, #tpu.memory_space<vmem>>, vector<1x8x16x4xbf16>
    %c1_i32_11 = arith.constant 1 : i32
    %14 = arith.addi %1, %c1_i32_11 : i32
    %c0_12 = arith.constant 0 : index
    %15 = arith.index_cast %14 : i32 to index
    %c1_13 = arith.constant 1 : index
    %c0_14 = arith.constant 0 : index
    %16 = vector.load %arg2[%c0_12, %15, %c1_13, %c0_14] : memref<1x18x18x4xbf16, #tpu.memory_space<vmem>>, vector<1x8x16x4xbf16>
    %c1_i32_15 = arith.constant 1 : i32
    %17 = arith.addi %1, %c1_i32_15 : i32
    %c0_16 = arith.constant 0 : index
    %18 = arith.index_cast %17 : i32 to index
    %c2_17 = arith.constant 2 : index
    %c0_18 = arith.constant 0 : index
    %19 = vector.load %arg2[%c0_16, %18, %c2_17, %c0_18] : memref<1x18x18x4xbf16, #tpu.memory_space<vmem>>, vector<1x8x16x4xbf16>
    %c2_i32 = arith.constant 2 : i32
    %20 = arith.addi %1, %c2_i32 : i32
    %c0_19 = arith.constant 0 : index
    %21 = arith.index_cast %20 : i32 to index
    %c0_20 = arith.constant 0 : index
    %c0_21 = arith.constant 0 : index
    %22 = vector.load %arg2[%c0_19, %21, %c0_20, %c0_21] : memref<1x18x18x4xbf16, #tpu.memory_space<vmem>>, vector<1x8x16x4xbf16>
    %c2_i32_22 = arith.constant 2 : i32
    %23 = arith.addi %1, %c2_i32_22 : i32
    %c0_23 = arith.constant 0 : index
    %24 = arith.index_cast %23 : i32 to index
    %c1_24 = arith.constant 1 : index
    %c0_25 = arith.constant 0 : index
    %25 = vector.load %arg2[%c0_23, %24, %c1_24, %c0_25] : memref<1x18x18x4xbf16, #tpu.memory_space<vmem>>, vector<1x8x16x4xbf16>
    %c2_i32_26 = arith.constant 2 : i32
    %26 = arith.addi %1, %c2_i32_26 : i32
    %c0_27 = arith.constant 0 : index
    %27 = arith.index_cast %26 : i32 to index
    %c2_28 = arith.constant 2 : index
    %c0_29 = arith.constant 0 : index
    %28 = vector.load %arg2[%c0_27, %27, %c2_28, %c0_29] : memref<1x18x18x4xbf16, #tpu.memory_space<vmem>>, vector<1x8x16x4xbf16>
    %29 = tpu.concatenate %4, %7, %10, %13, %16, %19, %22, %25, %28 in 3 : vector<1x8x16x4xbf16>, vector<1x8x16x4xbf16>, vector<1x8x16x4xbf16>, vector<1x8x16x4xbf16>, vector<1x8x16x4xbf16>, vector<1x8x16x4xbf16>, vector<1x8x16x4xbf16>, vector<1x8x16x4xbf16>, vector<1x8x16x4xbf16> -> vector<1x8x16x36xbf16>
    %30 = vector.shape_cast %29 : vector<1x8x16x36xbf16> to vector<128x36xbf16>
    %c0_30 = arith.constant 0 : index
    %c0_31 = arith.constant 0 : index
    %31 = vector.load %arg3[%c0_30, %c0_31] : memref<36x128xbf16, #tpu.memory_space<vmem>>, vector<36x128xbf16>
    %cst = arith.constant dense<0.000000e+00> : vector<128x128xf32>
    %32 = tpu.matmul %30, %31, %cst {dimension_numbers = #tpu.dot_dimension_numbers<[1], [0], [0], [1], [0, 0, 1, 1], [], []>} : vector<128x36xbf16>, vector<36x128xbf16>, vector<128x128xf32> -> vector<128x128xf32>
    %33 = vector.shape_cast %32 : vector<128x128xf32> to vector<1x8x16x128xf32>
    %c0_32 = arith.constant 0 : index
    %c0_33 = arith.constant 0 : index
    %c0_34 = arith.constant 0 : index
    %c0_35 = arith.constant 0 : index
    %34 = vector.load %arg4[%c0_32, %c0_33, %c0_34, %c0_35] : memref<1x8x16x128xf32, #tpu.memory_space<vmem>>, vector<1x8x16x128xf32>
    tpu.vector_store %arg4[%c0_32, %c0_33, %c0_34, %c0_35], %33 {strides = array<i32>} : memref<1x8x16x128xf32, #tpu.memory_space<vmem>>, vector<1x8x16x128xf32>,
    %cst_36 = arith.constant dense<0.000000e+00> : vector<128xf32>
    %35 = vector.multi_reduction <add>, %32, %cst_36 [0] : vector<128x128xf32> to vector<128xf32>
    %36 = vector.shape_cast %35 : vector<128xf32> to vector<1x128xf32>
    %37 = arith.mulf %32, %32 : vector<128x128xf32>
    %cst_37 = arith.constant dense<0.000000e+00> : vector<128xf32>
    %38 = vector.multi_reduction <add>, %37, %cst_37 [0] : vector<128x128xf32> to vector<128xf32>
    %39 = vector.shape_cast %38 : vector<128xf32> to vector<1x128xf32>
    %40 = tpu.concatenate %36, %39 in 0 : vector<1x128xf32>, vector<1x128xf32> -> vector<2x128xf32>
    %41 = vector.shape_cast %40 : vector<2x128xf32> to vector<1x1x2x128xf32>
    %c0_38 = arith.constant 0 : index
    %c0_39 = arith.constant 0 : index
    %c0_40 = arith.constant 0 : index
    %c0_41 = arith.constant 0 : index
    %42 = vector.load %arg5[%c0_38, %c0_39, %c0_40, %c0_41] : memref<1x1x2x128xf32, #tpu.memory_space<vmem>>, vector<1x1x2x128xf32>
    tpu.vector_store %arg5[%c0_38, %c0_39, %c0_40, %c0_41], %41 {strides = array<i32>} : memref<1x1x2x128xf32, #tpu.memory_space<vmem>>, vector<1x1x2x128xf32>,
    return
  }
  func.func @transform_0(%arg0: i32, %arg1: i32) -> (i32, i32, i32, i32) {
    %c0_i32 = arith.constant 0 : i32
    %c0_i32_0 = arith.constant 0 : i32
    %c0_i32_1 = arith.constant 0 : i32
    %c0_i32_2 = arith.constant 0 : i32
    return %arg0, %c0_i32, %c0_i32_0, %c0_i32_1 : i32, i32, i32, i32
  }
  func.func @transform_1(%arg0: i32, %arg1: i32) -> (i32, i32) {
    %c0_i32 = arith.constant 0 : i32
    %c0_i32_0 = arith.constant 0 : i32
    %c0_i32_1 = arith.constant 0 : i32
    return %c0_i32, %c0_i32_0 : i32, i32
  }
  func.func @transform_2(%arg0: i32, %arg1: i32) -> (i32, i32, i32, i32) {
    %c0_i32 = arith.constant 0 : i32
    %c0_i32_0 = arith.constant 0 : i32
    %c0_i32_1 = arith.constant 0 : i32
    return %arg0, %arg1, %c0_i32, %c0_i32_0 : i32, i32, i32, i32
  }
  func.func @transform_3(%arg0: i32, %arg1: i32) -> (i32, i32, i32, i32) {
    %c0_i32 = arith.constant 0 : i32
    %c0_i32_0 = arith.constant 0 : i32
    %c0_i32_1 = arith.constant 0 : i32
    return %arg0, %arg1, %c0_i32, %c0_i32_0 : i32, i32, i32, i32
  }
}

module attributes {stable_mosaic.version = 11 : i64} {
  func.func @_bn_relu_kernel(%arg0: i32, %arg1: i32, %arg2: memref<1x8x16x128xf32, #tpu.memory_space<vmem>>, %arg3: memref<1x128xf32, #tpu.memory_space<vmem>>, %arg4: memref<1x128xf32, #tpu.memory_space<vmem>>, %arg5: memref<1x8x16x128xf32, #tpu.memory_space<vmem>>) attributes {dimension_semantics = [#tpu.dimension_semantics<parallel>, #tpu.dimension_semantics<parallel>], iteration_bounds = array<i64: 2, 2>, scalar_prefetch = 0 : i64, scratch_operands = 0 : i64, tpu.core_type = #tpu.core_type<tc>, window_params = [{transform_indices = @transform_0, window_bounds = array<i64: 1, 8, 16, 128>}, {pipeline_mode = #tpu.pipeline_mode<synchronous>, transform_indices = @transform_1, window_bounds = array<i64: 1, 128>}, {pipeline_mode = #tpu.pipeline_mode<synchronous>, transform_indices = @transform_2, window_bounds = array<i64: 1, 128>}, {transform_indices = @transform_3, window_bounds = array<i64: 1, 8, 16, 128>}]} {
    %c0 = arith.constant 0 : index
    %c0_0 = arith.constant 0 : index
    %c0_1 = arith.constant 0 : index
    %c0_2 = arith.constant 0 : index
    %0 = vector.load %arg2[%c0, %c0_0, %c0_1, %c0_2] : memref<1x8x16x128xf32, #tpu.memory_space<vmem>>, vector<1x8x16x128xf32>
    %c0_3 = arith.constant 0 : index
    %c0_4 = arith.constant 0 : index
    %1 = vector.load %arg3[%c0_3, %c0_4] : memref<1x128xf32, #tpu.memory_space<vmem>>, vector<1x128xf32>
    %2 = vector.shape_cast %1 : vector<1x128xf32> to vector<1x1x1x128xf32>
    %3 = vector.broadcast %2 : vector<1x1x1x128xf32> to vector<1x8x16x128xf32>
    %4 = arith.mulf %0, %3 : vector<1x8x16x128xf32>
    %c0_5 = arith.constant 0 : index
    %c0_6 = arith.constant 0 : index
    %5 = vector.load %arg4[%c0_5, %c0_6] : memref<1x128xf32, #tpu.memory_space<vmem>>, vector<1x128xf32>
    %6 = vector.shape_cast %5 : vector<1x128xf32> to vector<1x1x1x128xf32>
    %7 = vector.broadcast %6 : vector<1x1x1x128xf32> to vector<1x8x16x128xf32>
    %8 = arith.addf %4, %7 : vector<1x8x16x128xf32>
    %cst = arith.constant 0.000000e+00 : f32
    %9 = vector.broadcast %cst : f32 to vector<1x8x16x128xf32>
    %10 = arith.maximumf %8, %9 : vector<1x8x16x128xf32>
    %c0_7 = arith.constant 0 : index
    %c0_8 = arith.constant 0 : index
    %c0_9 = arith.constant 0 : index
    %c0_10 = arith.constant 0 : index
    %11 = vector.load %arg5[%c0_7, %c0_8, %c0_9, %c0_10] : memref<1x8x16x128xf32, #tpu.memory_space<vmem>>, vector<1x8x16x128xf32>
    tpu.vector_store %arg5[%c0_7, %c0_8, %c0_9, %c0_10], %10 {strides = array<i32>} : memref<1x8x16x128xf32, #tpu.memory_space<vmem>>, vector<1x8x16x128xf32>,
    return
  }
  func.func @transform_0(%arg0: i32, %arg1: i32) -> (i32, i32, i32, i32) {
    %c0_i32 = arith.constant 0 : i32
    %c0_i32_0 = arith.constant 0 : i32
    %c0_i32_1 = arith.constant 0 : i32
    return %arg0, %arg1, %c0_i32, %c0_i32_0 : i32, i32, i32, i32
  }
  func.func @transform_1(%arg0: i32, %arg1: i32) -> (i32, i32) {
    %c0_i32 = arith.constant 0 : i32
    %c0_i32_0 = arith.constant 0 : i32
    %c0_i32_1 = arith.constant 0 : i32
    return %c0_i32, %c0_i32_0 : i32, i32
  }
  func.func @transform_2(%arg0: i32, %arg1: i32) -> (i32, i32) {
    %c0_i32 = arith.constant 0 : i32
    %c0_i32_0 = arith.constant 0 : i32
    %c0_i32_1 = arith.constant 0 : i32
    return %c0_i32, %c0_i32_0 : i32, i32
  }
  func.func @transform_3(%arg0: i32, %arg1: i32) -> (i32, i32, i32, i32) {
    %c0_i32 = arith.constant 0 : i32
    %c0_i32_0 = arith.constant 0 : i32
    %c0_i32_1 = arith.constant 0 : i32
    return %arg0, %arg1, %c0_i32, %c0_i32_0 : i32, i32, i32, i32
  }
}

module attributes {stable_mosaic.version = 11 : i64} {
  func.func @_conv_stats_kernel(%arg0: i32, %arg1: i32, %arg2: memref<1x18x18x128xbf16, #tpu.memory_space<vmem>>, %arg3: memref<1152x128xbf16, #tpu.memory_space<vmem>>, %arg4: memref<1x8x16x128xf32, #tpu.memory_space<vmem>>, %arg5: memref<1x1x2x128xf32, #tpu.memory_space<vmem>>) attributes {dimension_semantics = [#tpu.dimension_semantics<parallel>, #tpu.dimension_semantics<parallel>], iteration_bounds = array<i64: 2, 2>, scalar_prefetch = 0 : i64, scratch_operands = 0 : i64, tpu.core_type = #tpu.core_type<tc>, window_params = [{transform_indices = @transform_0, window_bounds = array<i64: 1, 18, 18, 128>}, {pipeline_mode = #tpu.pipeline_mode<synchronous>, transform_indices = @transform_1, window_bounds = array<i64: 1152, 128>}, {transform_indices = @transform_2, window_bounds = array<i64: 1, 8, 16, 128>}, {transform_indices = @transform_3, window_bounds = array<i64: 1, 1, 2, 128>}]} {
    %c8_i32 = arith.constant 8 : i32
    %0 = arith.muli %arg1, %c8_i32 : i32
    %1 = tpu.assume_multiple %0, 8 : i32
    %c0_i32 = arith.constant 0 : i32
    %2 = arith.addi %1, %c0_i32 : i32
    %c0 = arith.constant 0 : index
    %3 = arith.index_cast %2 : i32 to index
    %c0_0 = arith.constant 0 : index
    %c0_1 = arith.constant 0 : index
    %4 = vector.load %arg2[%c0, %3, %c0_0, %c0_1] : memref<1x18x18x128xbf16, #tpu.memory_space<vmem>>, vector<1x8x16x128xbf16>
    %c0_i32_2 = arith.constant 0 : i32
    %5 = arith.addi %1, %c0_i32_2 : i32
    %c0_3 = arith.constant 0 : index
    %6 = arith.index_cast %5 : i32 to index
    %c1 = arith.constant 1 : index
    %c0_4 = arith.constant 0 : index
    %7 = vector.load %arg2[%c0_3, %6, %c1, %c0_4] : memref<1x18x18x128xbf16, #tpu.memory_space<vmem>>, vector<1x8x16x128xbf16>
    %c0_i32_5 = arith.constant 0 : i32
    %8 = arith.addi %1, %c0_i32_5 : i32
    %c0_6 = arith.constant 0 : index
    %9 = arith.index_cast %8 : i32 to index
    %c2 = arith.constant 2 : index
    %c0_7 = arith.constant 0 : index
    %10 = vector.load %arg2[%c0_6, %9, %c2, %c0_7] : memref<1x18x18x128xbf16, #tpu.memory_space<vmem>>, vector<1x8x16x128xbf16>
    %c1_i32 = arith.constant 1 : i32
    %11 = arith.addi %1, %c1_i32 : i32
    %c0_8 = arith.constant 0 : index
    %12 = arith.index_cast %11 : i32 to index
    %c0_9 = arith.constant 0 : index
    %c0_10 = arith.constant 0 : index
    %13 = vector.load %arg2[%c0_8, %12, %c0_9, %c0_10] : memref<1x18x18x128xbf16, #tpu.memory_space<vmem>>, vector<1x8x16x128xbf16>
    %c1_i32_11 = arith.constant 1 : i32
    %14 = arith.addi %1, %c1_i32_11 : i32
    %c0_12 = arith.constant 0 : index
    %15 = arith.index_cast %14 : i32 to index
    %c1_13 = arith.constant 1 : index
    %c0_14 = arith.constant 0 : index
    %16 = vector.load %arg2[%c0_12, %15, %c1_13, %c0_14] : memref<1x18x18x128xbf16, #tpu.memory_space<vmem>>, vector<1x8x16x128xbf16>
    %c1_i32_15 = arith.constant 1 : i32
    %17 = arith.addi %1, %c1_i32_15 : i32
    %c0_16 = arith.constant 0 : index
    %18 = arith.index_cast %17 : i32 to index
    %c2_17 = arith.constant 2 : index
    %c0_18 = arith.constant 0 : index
    %19 = vector.load %arg2[%c0_16, %18, %c2_17, %c0_18] : memref<1x18x18x128xbf16, #tpu.memory_space<vmem>>, vector<1x8x16x128xbf16>
    %c2_i32 = arith.constant 2 : i32
    %20 = arith.addi %1, %c2_i32 : i32
    %c0_19 = arith.constant 0 : index
    %21 = arith.index_cast %20 : i32 to index
    %c0_20 = arith.constant 0 : index
    %c0_21 = arith.constant 0 : index
    %22 = vector.load %arg2[%c0_19, %21, %c0_20, %c0_21] : memref<1x18x18x128xbf16, #tpu.memory_space<vmem>>, vector<1x8x16x128xbf16>
    %c2_i32_22 = arith.constant 2 : i32
    %23 = arith.addi %1, %c2_i32_22 : i32
    %c0_23 = arith.constant 0 : index
    %24 = arith.index_cast %23 : i32 to index
    %c1_24 = arith.constant 1 : index
    %c0_25 = arith.constant 0 : index
    %25 = vector.load %arg2[%c0_23, %24, %c1_24, %c0_25] : memref<1x18x18x128xbf16, #tpu.memory_space<vmem>>, vector<1x8x16x128xbf16>
    %c2_i32_26 = arith.constant 2 : i32
    %26 = arith.addi %1, %c2_i32_26 : i32
    %c0_27 = arith.constant 0 : index
    %27 = arith.index_cast %26 : i32 to index
    %c2_28 = arith.constant 2 : index
    %c0_29 = arith.constant 0 : index
    %28 = vector.load %arg2[%c0_27, %27, %c2_28, %c0_29] : memref<1x18x18x128xbf16, #tpu.memory_space<vmem>>, vector<1x8x16x128xbf16>
    %29 = tpu.concatenate %4, %7, %10, %13, %16, %19, %22, %25, %28 in 3 : vector<1x8x16x128xbf16>, vector<1x8x16x128xbf16>, vector<1x8x16x128xbf16>, vector<1x8x16x128xbf16>, vector<1x8x16x128xbf16>, vector<1x8x16x128xbf16>, vector<1x8x16x128xbf16>, vector<1x8x16x128xbf16>, vector<1x8x16x128xbf16> -> vector<1x8x16x1152xbf16>
    %30 = vector.shape_cast %29 : vector<1x8x16x1152xbf16> to vector<128x1152xbf16>
    %c0_30 = arith.constant 0 : index
    %c0_31 = arith.constant 0 : index
    %31 = vector.load %arg3[%c0_30, %c0_31] : memref<1152x128xbf16, #tpu.memory_space<vmem>>, vector<1152x128xbf16>
    %cst = arith.constant dense<0.000000e+00> : vector<128x128xf32>
    %32 = tpu.matmul %30, %31, %cst {dimension_numbers = #tpu.dot_dimension_numbers<[1], [0], [0], [1], [0, 0, 1, 1], [], []>} : vector<128x1152xbf16>, vector<1152x128xbf16>, vector<128x128xf32> -> vector<128x128xf32>
    %33 = vector.shape_cast %32 : vector<128x128xf32> to vector<1x8x16x128xf32>
    %c0_32 = arith.constant 0 : index
    %c0_33 = arith.constant 0 : index
    %c0_34 = arith.constant 0 : index
    %c0_35 = arith.constant 0 : index
    %34 = vector.load %arg4[%c0_32, %c0_33, %c0_34, %c0_35] : memref<1x8x16x128xf32, #tpu.memory_space<vmem>>, vector<1x8x16x128xf32>
    tpu.vector_store %arg4[%c0_32, %c0_33, %c0_34, %c0_35], %33 {strides = array<i32>} : memref<1x8x16x128xf32, #tpu.memory_space<vmem>>, vector<1x8x16x128xf32>,
    %cst_36 = arith.constant dense<0.000000e+00> : vector<128xf32>
    %35 = vector.multi_reduction <add>, %32, %cst_36 [0] : vector<128x128xf32> to vector<128xf32>
    %36 = vector.shape_cast %35 : vector<128xf32> to vector<1x128xf32>
    %37 = arith.mulf %32, %32 : vector<128x128xf32>
    %cst_37 = arith.constant dense<0.000000e+00> : vector<128xf32>
    %38 = vector.multi_reduction <add>, %37, %cst_37 [0] : vector<128x128xf32> to vector<128xf32>
    %39 = vector.shape_cast %38 : vector<128xf32> to vector<1x128xf32>
    %40 = tpu.concatenate %36, %39 in 0 : vector<1x128xf32>, vector<1x128xf32> -> vector<2x128xf32>
    %41 = vector.shape_cast %40 : vector<2x128xf32> to vector<1x1x2x128xf32>
    %c0_38 = arith.constant 0 : index
    %c0_39 = arith.constant 0 : index
    %c0_40 = arith.constant 0 : index
    %c0_41 = arith.constant 0 : index
    %42 = vector.load %arg5[%c0_38, %c0_39, %c0_40, %c0_41] : memref<1x1x2x128xf32, #tpu.memory_space<vmem>>, vector<1x1x2x128xf32>
    tpu.vector_store %arg5[%c0_38, %c0_39, %c0_40, %c0_41], %41 {strides = array<i32>} : memref<1x1x2x128xf32, #tpu.memory_space<vmem>>, vector<1x1x2x128xf32>,
    return
  }
  func.func @transform_0(%arg0: i32, %arg1: i32) -> (i32, i32, i32, i32) {
    %c0_i32 = arith.constant 0 : i32
    %c0_i32_0 = arith.constant 0 : i32
    %c0_i32_1 = arith.constant 0 : i32
    %c0_i32_2 = arith.constant 0 : i32
    return %arg0, %c0_i32, %c0_i32_0, %c0_i32_1 : i32, i32, i32, i32
  }
  func.func @transform_1(%arg0: i32, %arg1: i32) -> (i32, i32) {
    %c0_i32 = arith.constant 0 : i32
    %c0_i32_0 = arith.constant 0 : i32
    %c0_i32_1 = arith.constant 0 : i32
    return %c0_i32, %c0_i32_0 : i32, i32
  }
  func.func @transform_2(%arg0: i32, %arg1: i32) -> (i32, i32, i32, i32) {
    %c0_i32 = arith.constant 0 : i32
    %c0_i32_0 = arith.constant 0 : i32
    %c0_i32_1 = arith.constant 0 : i32
    return %arg0, %arg1, %c0_i32, %c0_i32_0 : i32, i32, i32, i32
  }
  func.func @transform_3(%arg0: i32, %arg1: i32) -> (i32, i32, i32, i32) {
    %c0_i32 = arith.constant 0 : i32
    %c0_i32_0 = arith.constant 0 : i32
    %c0_i32_1 = arith.constant 0 : i32
    return %arg0, %arg1, %c0_i32, %c0_i32_0 : i32, i32, i32, i32
  }
}

</mosaic_0001>

<bundles_post_ra>
// kernel: double_conv.5
= control target key start
LH: loop header
LB: loop body
LE: loop exit
PB: predicated region body
PF: predicated region fallthrough
CT: control target
= control target key end

     0   :  { %s519_s12 = smov 0   ;;  %s521_s13 = smov 0   ;;  %s630_s0 = inlined_call_operand.vmem [shape: f32[2,16,16,128], index: 0, kind: input, shape index: {}]   ;;  %s631_s1 = inlined_call_operand.vmem [shape: f32[1,128], index: 1, kind: input, shape index: {}]   ;;  %s632_s2 = inlined_call_operand.vmem [shape: f32[1,128], index: 2, kind: input, shape index: {}]   ;;  %s633_s3 = inlined_call_operand.vmem [shape: f32[2,16,16,128], index: 3, kind: output, shape index: {}]  }
   0x1   :  { %s523_s14 = smov 0   ;;  %s525_s15 = smov 0  }
   0x2   :  { %s527_s16 = smov 0  }
   0x3 LB: > { %s22_s17 = sadd.s32 1, %s489_s14  ;;  %s25_s18 = sadd.s32 1, %s493_s15  ;;  %s497_s16 = sphi %s527_s16, %s13_s16   ;;  %s493_s15 = sphi %s525_s15, %s637_s15   ;;  %s489_s14 = sphi %s523_s14, %s636_s14   ;;  %s485_s13 = sphi %s521_s13, %s635_s13   ;;  %s481_s12 = sphi %s519_s12, %s634_s12  }
   0x4   : > { %p23_p0 = scmp.ge.s32.totalorder %s22_s17, 2  ;;  %p406_p1 = scmp.ge.s32.totalorder %s497_s16, 1 }
   0x5   : > { %p159_p2 = scmp.lt.s32.totalorder %s497_s16, 5 }
   0x6   : > { %s639_s17 = smov (%p23_p0, %s22_s17), 0  ;;  %s641_s18 = smov (!%p23_p0, %s25_s18), %s493_s15 }
   0x7   : > { %p160_p3 = pnand %p406_p1, %p159_p2  ;;  %p27_p4 = scmp.ge.s32.totalorder %s641_s18, 2 }
   0x8   : > { %s407_s19 = sshll.u32 (!%p160_p3), %s481_s12, 3  ;;  %p194_p5 = scmp.lt.s32.totalorder (!%p160_p3), %s485_s13, 1 }
   0x9   : > { %s643_s18 = smov (%p27_p4, %s641_s18), 0  ;;  %163 = sbr.rel (%p160_p3) target bundleno = 42 (0x2a), region = 32 }
   0xa   : > { %p196_p6 = scmp.lt.s32.totalorder (!%p160_p3), %s407_s19, 15 }
   0xe   : > { %s645_s13 = smov (!%p194_p5, %s485_s13), 1  ;;  %s647_s19 = smov (!%p196_p6, %s407_s19), 15  ;;  %v457_v0 = vld [vmem:[%s631_s1] ss:$0 sm:$0xff] }
   0xf   : > { %s409_s20 = sshll.u32 %s645_s13, 5  ;;  %s408_s21 = sshll.u32 %s647_s19, 1  ;;  %v560_v1 = vld [vmem:[%s632_s2] ss:$0 sm:$0xff] }
  0x10   : > { %s200_s22 = sadd.s32 %s409_s20, %s408_s21 }
  0x11   : > { %s410_s25 = sshll.u32 %s200_s22, 3 }
  0x12   : > { %s555_s28 = scalar_lea.vmem %s630_s0, %s410_s25  ;;  %s576_s6 = scalar_lea.vmem %s633_s3, %s410_s25 }
  0x13   : > { %v215_v2 = vld [vmem:[%s555_s28] sm:$0xff]  ;;  %v216_v3 = vld [vmem:[%s555_s28 + $0x8] sm:$0xff]  ;;  %v217_v4 = vld [vmem:[%s555_s28 + $0x10] sm:$0xff] }
  0x14   : > { %v235_v5 = vmul.f32 %v457_v0, %v215_v2  ;;  %v236_v6 = vmul.f32 %v457_v0, %v216_v3  ;;  %v237_v7 = vmul.f32 %v457_v0, %v217_v4  ;;  %v218_v8 = vld [vmem:[%s555_s28 + $0x18] sm:$0xff]  ;;  %v219_v9 = vld [vmem:[%s555_s28 + $0x20] sm:$0xff]  ;;  %v220_v10 = vld [vmem:[%s555_s28 + $0x28] sm:$0xff] }
  0x15   : > { %v238_v11 = vmul.f32 %v457_v0, %v218_v8  ;;  %v239_v12 = vmul.f32 %v457_v0, %v219_v9  ;;  %v240_v13 = vmul.f32 %v457_v0, %v220_v10  ;;  %v221_v14 = vld [vmem:[%s555_s28 + $0x30] sm:$0xff]  ;;  %v222_v15 = vld [vmem:[%s555_s28 + $0x38] sm:$0xff]  ;;  %v223_v24 = vld [vmem:[%s555_s28 + $0x40] sm:$0xff] }
  0x16   : > { %v255_v16 = vadd.f32 %v560_v1, %v235_v5  ;;  %v256_v17 = vadd.f32 %v560_v1, %v236_v6  ;;  %v257_v18 = vadd.f32 %v560_v1, %v237_v7  ;;  %v241_v19 = vmul.f32 %v457_v0, %v221_v14  ;;  %v224_v25 = vld [vmem:[%s555_s28 + $0x48] sm:$0xff]  ;;  %v225_v26 = vld [vmem:[%s555_s28 + $0x50] sm:$0xff]  ;;  %v226_v31 = vld [vmem:[%s555_s28 + $0x58] sm:$0xff] }
  0x17   : > { %v258_v20 = vadd.f32 %v560_v1, %v238_v11  ;;  %v259_v21 = vadd.f32 %v560_v1, %v239_v12  ;;  %v260_v22 = vadd.f32 %v560_v1, %v240_v13  ;;  %v242_v23 = vmul.f32 %v457_v0, %v222_v15  ;;  %v227_v32 = vld [vmem:[%s555_s28 + $0x60] sm:$0xff]  ;;  %v228_v33 = vld [vmem:[%s555_s28 + $0x68] sm:$0xff]  ;;  %v229_v37 = vld [vmem:[%s555_s28 + $0x70] sm:$0xff] }
  0x18   : > { %v271_v27 = vmax.f32 %v255_v16, 0.0  ;;  %v272_v28 = vmax.f32 %v256_v17, 0.0  ;;  %v273_v29 = vmax.f32 %v257_v18, 0.0  ;;  %v261_v30 = vadd.f32 %v560_v1, %v241_v19  ;;  %v230_v42 = vld [vmem:[%s555_s28 + $0x78] sm:$0xff] }
  0x19   : > { %v274_v34 = vmax.f32 %v258_v20, 0.0  ;;  %v275_v35 = vmax.f32 %v259_v21, 0.0  ;;  %v262_v36 = vadd.f32 %v560_v1, %v242_v23  ;;  %v276_v38 = vmax.f32 %v260_v22, 0.0 }
  0x1a   : > { %287 = vst [vmem:[%s576_s6] sm:$0xff] %v271_v27  ;;  %v243_v39 = vmul.f32 %v457_v0, %v223_v24  ;;  %v244_v40 = vmul.f32 %v457_v0, %v224_v25  ;;  %v245_v41 = vmul.f32 %v457_v0, %v225_v26  ;;  %v277_v43 = vmax.f32 %v261_v30, 0.0 }
  0x1b   : > { %288 = vst [vmem:[%s576_s6 + $0x8] sm:$0xff] %v272_v28  ;;  %v246_v44 = vmul.f32 %v457_v0, %v226_v31  ;;  %v247_v45 = vmul.f32 %v457_v0, %v227_v32  ;;  %v248_v46 = vmul.f32 %v457_v0, %v228_v33  ;;  %v249_v50 = vmul.f32 %v457_v0, %v229_v37 }
  0x1c   : > { %289 = vst [vmem:[%s576_s6 + $0x10] sm:$0xff] %v273_v29  ;;  %v263_v47 = vadd.f32 %v560_v1, %v243_v39  ;;  %v264_v48 = vadd.f32 %v560_v1, %v244_v40  ;;  %v265_v49 = vadd.f32 %v560_v1, %v245_v41  ;;  %v278_v51 = vmax.f32 %v262_v36, 0.0 }
  0x1d   : > { %290 = vst [vmem:[%s576_s6 + $0x18] sm:$0xff] %v274_v34  ;;  %v266_v52 = vadd.f32 %v560_v1, %v246_v44  ;;  %v250_v53 = vmul.f32 %v457_v0, %v230_v42  ;;  %v267_v55 = vadd.f32 %v560_v1, %v247_v45  ;;  %v268_v57 = vadd.f32 %v560_v1, %v248_v46 }
  0x1e   : > { %291 = vst [vmem:[%s576_s6 + $0x20] sm:$0xff] %v275_v35  ;;  %v279_v54 = vmax.f32 %v263_v47, 0.0  ;;  %v280_v56 = vmax.f32 %v264_v48, 0.0  ;;  %v281_v58 = vmax.f32 %v265_v49, 0.0  ;;  %v269_v59 = vadd.f32 %v560_v1, %v249_v50 }
  0x1f   : > { %292 = vst [vmem:[%s576_s6 + $0x28] sm:$0xff] %v276_v38  ;;  %v282_v60 = vmax.f32 %v266_v52, 0.0  ;;  %v270_v61 = vadd.f32 %v560_v1, %v250_v53  ;;  %v283_v62 = vmax.f32 %v267_v55, 0.0  ;;  %v284_v63 = vmax.f32 %v268_v57, 0.0 }
  0x20   : > { %293 = vst [vmem:[%s576_s6 + $0x30] sm:$0xff] %v277_v43  ;;  %v285_v0 = vmax.f32 %v269_v59, 0.0 }
  0x21   : > { %294 = vst [vmem:[%s576_s6 + $0x38] sm:$0xff] %v278_v51  ;;  %v286_v2 = vmax.f32 %v270_v61, 0.0 }
  0x22   : > { %295 = vst [vmem:[%s576_s6 + $0x40] sm:$0xff] %v279_v54 }
  0x23   : > { %296 = vst [vmem:[%s576_s6 + $0x48] sm:$0xff] %v280_v56 }
  0x24   : > { %297 = vst [vmem:[%s576_s6 + $0x50] sm:$0xff] %v281_v58 }
  0x25   : > { %298 = vst [vmem:[%s576_s6 + $0x58] sm:$0xff] %v282_v60 }
  0x26   : > { %299 = vst [vmem:[%s576_s6 + $0x60] sm:$0xff] %v283_v62 }
  0x27   : > { %300 = vst [vmem:[%s576_s6 + $0x68] sm:$0xff] %v284_v63 }
  0x28   : > { %301 = vst [vmem:[%s576_s6 + $0x70] sm:$0xff] %v285_v0 }
  0x29   : > { %302 = vst [vmem:[%s576_s6 + $0x78] sm:$0xff] %v286_v2 }
  0x2a PF: > { %s13_s16 = sadd.s32 1, %s497_s16   ;;  %s634_s12 = smov %s489_s14 }
  0x2b   : > { %p10_p7 = scmp.ge.s32.totalorder %s13_s16, 6   ;;  %s635_s13 = smov %s493_s15 }
  0x2c   : > { %s636_s14 = smov %s639_s17  ;;  %s637_s15 = smov %s643_s18 }
  0x2d   :  { %12 = sbr.rel (!%p10_p7) target bundleno = 3 (0x3), region = 62 }

// kernel: double_conv.4
= control target key start
LH: loop header
LB: loop body
LE: loop exit
PB: predicated region body
PF: predicated region fallthrough
CT: control target
= control target key end

     0   :  { %s1892_s12 = smov 0   ;;  %s1894_s13 = smov 0   ;;  %s2405_s0 = inlined_call_operand.vmem [shape: bf16[2,18,18,4], index: 0, kind: input, shape index: {}]   ;;  %s2406_s1 = inlined_call_operand.vmem [shape: bf16[36,128], index: 1, kind: input, shape index: {}]   ;;  %s2407_s2 = inlined_call_operand.vmem [shape: f32[2,16,16,128], index: 2, kind: output, shape index: {0}]   ;;  %s2408_s3 = inlined_call_operand.vmem [shape: f32[2,2,2,128], index: 3, kind: output, shape index: {1}]  }
   0x1   :  { %s1896_s14 = smov 0   ;;  %s1898_s15 = smov 0  }
   0x2   :  { %s1900_s16 = smov 0  }
   0x3 LB: > { %s23_s17 = sadd.s32 1, %s1854_s14  ;;  %s26_s18 = sadd.s32 1, %s1858_s15  ;;  %s1862_s16 = sphi %s1900_s16, %s14_s16   ;;  %s1858_s15 = sphi %s1898_s15, %s2412_s15   ;;  %s1854_s14 = sphi %s1896_s14, %s2411_s14   ;;  %s1850_s13 = sphi %s1894_s13, %s2410_s13   ;;  %s1846_s12 = sphi %s1892_s12, %s2409_s12  }
   0x4   : > { %p24_p0 = scmp.ge.s32.totalorder %s23_s17, 2  ;;  %p1534_p1 = scmp.ge.s32.totalorder %s1862_s16, 1 }
   0x5   : > { %p156_p2 = scmp.lt.s32.totalorder %s1862_s16, 5 }
   0x6   : > { %s2414_s17 = smov (%p24_p0, %s23_s17), 0  ;;  %s2416_s18 = smov (!%p24_p0, %s26_s18), %s1858_s15 }
   0x7   : > { %p157_p3 = pnand %p1534_p1, %p156_p2  ;;  %p28_p4 = scmp.ge.s32.totalorder %s2416_s18, 2 }
   0x8   : > { %p193_p5 = scmp.lt.s32.totalorder (!%p157_p3), %s1850_s13, 1  ;;  %s1631_s19 = smul.u32 (!%p157_p3), 96, %s1846_s12 }
   0x9   : > { %s2418_s18 = smov (%p28_p4, %s2416_s18), 0  ;;  %160 = sbr.rel (%p157_p3) target bundleno = 469 (0x1d5), region = 28 }
   0xa   : > { %s1864_s25 = smov (!%p157_p3), 24   ;;  %s1865_s26 = smov (!%p157_p3), 12  }
   0xb   : > { %s1866_s27 = smov (!%p157_p3), 8   ;;  %s1867_s28 = smov (!%p157_p3), 32  }
   0xc   : > { %s1868_s29 = smov (!%p157_p3), 4   ;;  %s1869_s30 = smov (!%p157_p3), 20  }
   0xd   : > { %s1870_s4 = smov (!%p157_p3), 16   ;;  %s1871_s5 = smov (!%p157_p3), 28  }
   0xe   : > { %s2420_s13 = smov (!%p193_p5, %s1850_s13), 1  ;;  %vm527_vm0 = vcmask 1046528   ;;  %vm390_vm1 = vsmask.f32 7424  ;;  %vm1253_vm2 = vcmask 1041408   ;;  %vm1080_vm3 = vcmask 31744  }
   0xf   : > { %s1738_s20 = smul.u32 216, %s2420_s13  ;;  %vm1097_vm4 = vcmask 64512   ;;  %vm1114_vm5 = vcmask 97280   ;;  %vm1131_vm6 = vcmask 130048   ;;  %vm1148_vm7 = vcmask 162816   ;;  %s1538_s21 = sshll.u32 %s2420_s13, 5 }
  0x10   : > { %vm1165_vm8 = vcmask 195584   ;;  %vm1182_vm9 = vcmask 228352   ;;  %vm1199_vm10 = vcmask 261120   ;;  %vm1236_vm11 = vcmask 293888   ;;  %p211_p7 = scmp.lt.s32.totalorder %s1846_s12, 1 }
  0x11   : > { %s197_s23 = scalar_lea.vmem %s2405_s0, %s1738_s20  ;;  %vm1380_vm12 = vcmask 1040384  }
  0x12   : > { %s1931_s24 = scalar_lea.vmem %s197_s23, %s1631_s19  ;;  %s1536_s19 = sshll.u32 %s1846_s12, 3 }
  0x13   : > { %v1547_v0 = vld [vmem:[%s1931_s24 + $0xc] sm:$0xff]   ;;  %v1693_v2 = vld [vmem:[%s1931_s24] sm:$0xf0]  ;;  %v238_v3 = vld [vmem:[%s1931_s24 + $0x8] sm:$0x1]  ;;  %p201_p6 = scmp.lt.s32.totalorder %s1536_s19, 15 }
  0x14   : > { %v1935_v1 = vld [vmem:[%s1931_s24 + $0xc] sm:$0xf0]  ;;  %v1694_v4 = vld [vmem:[%s1931_s24] sm:$0xe]  ;;  %v374_v5 = vunpack.c.l.b16 %v238_v3  ;;  %v1717_v6 = vld [vmem:[%s1931_s24 + $0x18] sm:$0xf0]  ;;  %608 = vrot.lane.b32.xlu1 %v1547_v0, %s1865_s26 }
  0x15   : > { %v1597_v7 = vld [vmem:[%s1931_s24 + $0x20] sm:$0x1]  ;;  %v1695_v8 = vor.u32 %v1694_v4, %v1693_v2  ;;  %v1718_v9 = vld [vmem:[%s1931_s24 + $0x18] sm:$0xe]  ;;  %v1563_v12 = vld [vmem:[%s1931_s24 + $0x14] sm:$0x1] }
  0x16   : > { %v888_v10 = vunpack.c.l.b16 %v1597_v7  ;;  %v1944_v11 = vld [vmem:[%s1931_s24] sm:$0xff]   ;;  %v382_v13 = vpack.c.b16 %v374_v5, %v374_v5  ;;  %v1719_v14 = vor.u32 %v1718_v9, %v1717_v6  ;;  %v1949_v16 = vld [vmem:[%s1931_s24 + $0x18] sm:$0xff]   ;;  %v632_v20 = vunpack.c.l.b16 %v1563_v12  ;;  %v1789_v38 = vld [vmem:[%s1931_s24 + $0xc] sm:$0xe]  ;;  %s2422_s19 = smov (!%p201_p6, %s1536_s19), 15  ;;  %s2424_s12 = smov (!%p211_p7, %s1846_s12), 1 }
  0x17   : > { %v392_v15 = vshrl.u32 %v1944_v11, 16  ;;  %v528_v17 = vrot.slane %v1695_v8, 1  ;;  %v394_v19 = vshll.u32 %v1944_v11, 16  ;;  %864 = vrot.lane.b32.xlu2 %v1949_v16, %s1864_s25  ;;  %v651_v21 = vshll.u32 %v1547_v0, 16  ;;  %v242_v28 = vld [vmem:[%s1931_s24 + $0x38] sm:$0x1] }
  0x18   : > { %v896_v18 = vpack.c.b16 %v888_v10, %v888_v10  ;;  %v529_v22 = vrot.slane %v382_v13, 1  ;;  %v399_v23 = vshll.u32 %v382_v13, 16  ;;  %v1040_v24 = vrot.slane %v1719_v14, 1  ;;  %v240_v34 = vld [vmem:[%s1931_s24 + $0x20] sm:$0x1]  ;;  %v1963_v40 = vld [vmem:[%s1931_s24 + $0x30] sm:$0xff]  }
  0x19   : > { %v396_v26 = vrot.slane %v394_v19, 1  ;;  %v640_v27 = vpack.c.b16 %v632_v20, %v632_v20  ;;  %v649_v32 = vshrl.u32 %v1547_v0, 16  ;;  %v653_v33 = vrot.slane %v651_v21, 1  ;;  %v1967_v43 = vld [vmem:[%s1931_s24 + $0x24] sm:$0xff]   ;;  %v1565_v55 = vld [vmem:[%s1931_s24 + $0x2c] sm:$0x1] }
  0x1a   : > { %v1041_v25 = vrot.slane %v896_v18, 1  ;;  %v530_v29 = vsel %vm527_vm0, %v528_v17, %v529_v22  ;;  %v401_v31 = vrot.slane %v399_v23, 1  ;;  %v907_v36 = vshll.u32 %v1949_v16, 16  ;;  %v1970_v44 = vld [vmem:[%s1931_s24 + $0x24] sm:$0xf0]  ;;  %v1555_v4 = vld [vmem:[%s1931_s24 + $0x3c] sm:$0xff]  }
  0x1b   : > { %552 = vrot.lane.b32.xlu0 %v530_v29, %s1866_s27  ;;  %v397_v30 = vor.u32 %v396_v26, %v392_v15  ;;  %v656_v35 = vshll.u32 %v640_v27, 16  ;;  %v378_v37 = vunpack.c.l.b16 %v242_v28  ;;  %v905_v41 = vshrl.u32 %v1949_v16, 16  ;;  %v1696_v0 = vld [vmem:[%s1931_s24 + $0x18] sm:$0xf0]  ;;  %v1991_v5 = vld [vmem:[%s1931_s24 + $0x3c] sm:$0xf0] }
  0x1c   : > { %v1042_v39 = vsel %vm527_vm0, %v1040_v24, %v1041_v25  ;;  %v376_v42 = vunpack.c.l.b16 %v240_v34  ;;  %v654_v46 = vor.u32 %v653_v33, %v649_v32  ;;  %v912_v47 = vshll.u32 %v896_v18, 16  ;;  %v1567_v14 = vld [vmem:[%s1931_s24 + $0x44] sm:$0x1]  ;;  %v1699_v23 = vld [vmem:[%s1931_s24 + $0x30] sm:$0xf0]  ;;  %s1537_s20 = sshll.u32 %s2422_s19, 1 }
  0x1d   : > { %v402_v45 = vsel %vm390_vm1, %v397_v30, %v401_v31  ;;  %1064 = vrot.lane.b32.xlu1 %v1042_v39, %s1867_s28  ;;  %v658_v48 = vrot.slane %v656_v35, 1  ;;  %v909_v49 = vrot.slane %v907_v36, 1  ;;  %v1974_v50 = vpack.c.b16 %v378_v37, %v378_v37  ;;  %v1700_v24 = vld [vmem:[%s1931_s24 + $0x30] sm:$0xe]  ;;  %v1792_v32 = vld [vmem:[%s1931_s24 + $0x24] sm:$0xe]  ;;  %s205_s22 = sadd.s32 %s1538_s21, %s1537_s20 }
  0x1e   : > { %v442_v51 = vshll.u32 %v1963_v40, 16  ;;  %v384_v52 = vpack.c.b16 %v376_v42, %v376_v42  ;;  %v1790_v53 = vor.u32 %v1789_v38, %v1935_v1  ;;  %v785_v54 = vrot.slane %v640_v27, 1  ;;  %v1697_v1 = vld [vmem:[%s1931_s24 + $0x18] sm:$0xe]  ;;  %v1599_v33 = vld [vmem:[%s1931_s24 + $0x38] sm:$0x1] }
  0x1f   : > { %v440_v56 = vshrl.u32 %v1963_v40, 16  ;;  %v1981_v59 = vor.u32 %v909_v49, %v905_v41  ;;  %v914_v60 = vrot.slane %v912_v47, 1  ;;  %v447_v62 = vshll.u32 %v1974_v50, 16  ;;  %v2017_v42 = vld [vmem:[%s1931_s24 + $0xc] sm:$0xff]   ;;  %s1539_s23 = sshll.u32 %s205_s22, 3 }
  0x20   : > { %v784_v57 = vrot.slane %v1790_v53, 1  ;;  %v423_v58 = vshll.u32 %v384_v52, 16  ;;  %v444_v61 = vrot.slane %v442_v51, 1  ;;  %v659_v63 = vsel %vm390_vm1, %v654_v46, %v658_v48  ;;  %v1795_v51 = vld [vmem:[%s1931_s24 + $0x3c] sm:$0xe] }
  0x21   : > { %v634_v3 = vunpack.c.l.b16 %v1565_v55  ;;  %v915_v7 = vsel %vm390_vm1, %v1981_v59, %v914_v60  ;;  %v449_v9 = vrot.slane %v447_v62, 1  ;;  %v1698_v10 = vor.u32 %v1697_v1, %v1696_v0  ;;  %v1601_v62 = vld [vmem:[%s1931_s24 + $0x50] sm:$0x1] }
  0x22   : > { %v786_v2 = vsel %vm527_vm0, %v784_v57, %v785_v54  ;;  %v425_v6 = vrot.slane %v423_v58, 1  ;;  %v1996_v8 = vor.u32 %v444_v61, %v440_v56  ;;  %v675_v13 = vshll.u32 %v1967_v43, 16 }
  0x23   : > { %487 = vrot.lane.b32.xlu0 %v402_v45, %s1868_s29  ;;  %808 = vrot.lane.b32.xlu2 %v786_v2, %s1869_s30  ;;  %v642_v12 = vpack.c.b16 %v634_v3, %v634_v3  ;;  %v534_v18 = vrot.slane %v1698_v10, 1  ;;  %v535_v19 = vrot.slane %v384_v52, 1  ;;  %v673_v20 = vshrl.u32 %v1967_v43, 16  ;;  %v2020_v45 = vld [vmem:[%s1931_s24 + $0xc] sm:$0xf0]  ;;  %v2040_v2 = vld [vmem:[%s1931_s24 + $0x48] sm:$0xff]  }
  0x24   : > { %v426_v15 = vsel %vm390_vm1, %v1981_v59, %v425_v6  ;;  %v450_v17 = vsel %vm390_vm1, %v1996_v8, %v449_v9  ;;  %v677_v21 = vrot.slane %v675_v13, 1  ;;  %v636_v25 = vunpack.c.l.b16 %v1567_v14  ;;  %v239_v52 = vld [vmem:[%s1931_s24 + $0x14] sm:$0x1] }
  0x25   : > { %744 = vrot.lane.b32.xlu1 %v659_v63, %s1870_s4  ;;  %v680_v22 = vshll.u32 %v642_v12, 16  ;;  %v536_v26 = vsel %vm527_vm0, %v534_v18, %v535_v19  ;;  %v1701_v27 = vor.u32 %v1700_v24, %v1699_v23  ;;  %v699_v31 = vshll.u32 %v1555_v4, 16  ;;  %v1720_v6 = vld [vmem:[%s1931_s24 + $0x30] sm:$0xf0]  ;;  %v1798_v18 = vld [vmem:[%s1931_s24 + $0xc] sm:$0xe] }
  0x26   : > { %v678_v28 = vor.u32 %v677_v21, %v673_v20  ;;  %v644_v30 = vpack.c.b16 %v636_v25, %v636_v25  ;;  %v541_v35 = vrot.slane %v1974_v50, 1  ;;  %v890_v36 = vunpack.c.l.b16 %v1599_v33  ;;  %v1723_v19 = vld [vmem:[%s1931_s24 + $0x48] sm:$0xf0]  ;;  %v1724_v20 = vld [vmem:[%s1931_s24 + $0x48] sm:$0xe] }
  0x27   : > { %v682_v29 = vrot.slane %v680_v22, 1  ;;  %v540_v34 = vrot.slane %v1701_v27, 1  ;;  %v697_v38 = vshrl.u32 %v1555_v4, 16  ;;  %v701_v39 = vrot.slane %v699_v31, 1  ;;  %v244_v21 = vld [vmem:[%s1931_s24 + $0x50] sm:$0x1] }
  0x28   : > { %v704_v41 = vshll.u32 %v644_v30, 16  ;;  %v1793_v47 = vor.u32 %v1792_v32, %v1970_v44  ;;  %v898_v50 = vpack.c.b16 %v890_v36, %v890_v36  ;;  %v791_v54 = vrot.slane %v642_v12, 1  ;;  %v1702_v36 = vld [vmem:[%s1931_s24 + $0x48] sm:$0xf0] }
  0x29   : > { %v683_v37 = vsel %vm390_vm1, %v678_v28, %v682_v29  ;;  %v542_v46 = vsel %vm527_vm0, %v540_v34, %v541_v35  ;;  %v702_v48 = vor.u32 %v701_v39, %v697_v38  ;;  %v375_v56 = vunpack.c.l.b16 %v239_v52  ;;  %v1564_v39 = vld [vmem:[%s1931_s24 + $0x20] sm:$0x1]  ;;  %v1800_v52 = vld [vmem:[%s1931_s24 + $0x54] sm:$0xf0] }
  0x2a   : > { %v706_v49 = vrot.slane %v704_v41, 1  ;;  %v790_v53 = vrot.slane %v1793_v47, 1  ;;  %v1796_v57 = vor.u32 %v1795_v51, %v1991_v5  ;;  %v406_v61 = vshll.u32 %v2017_v42, 16  ;;  %v1559_v51 = vld [vmem:[%s1931_s24 + $0x54] sm:$0xff]  }
  0x2b   : > { %1000 = vrot.lane.b32.xlu0 %v915_v7, %s1871_s5  ;;  %491 = vrot.lane.b32.xlu2 %v426_v15, %s1868_s29  ;;  %v383_v60 = vpack.c.b16 %v375_v56, %v375_v56  ;;  %v797_v0 = vrot.slane %v644_v30, 1  ;;  %v404_v1 = vshrl.u32 %v2017_v42, 16  ;;  %v1721_v7 = vld [vmem:[%s1931_s24 + $0x30] sm:$0xe]  ;;  %v892_v9 = vunpack.c.l.b16 %v1601_v62 }
  0x2c   : > { %v707_v55 = vsel %vm390_vm1, %v702_v48, %v706_v49  ;;  %v792_v44 = vsel %vm527_vm0, %v790_v53, %v791_v54  ;;  %v796_v63 = vrot.slane %v1796_v57, 1  ;;  %v955_v10 = vshll.u32 %v2040_v2, 16  ;;  %v1706_v57 = vld [vmem:[%s1931_s24 + $0x18] sm:$0xe] }
  0x2d   : > { %495 = vrot.lane.b32.xlu1 %v450_v17, %s1868_s29  ;;  %v411_v5 = vshll.u32 %v383_v60, 16  ;;  %v1722_v13 = vor.u32 %v1721_v7, %v1720_v6  ;;  %v900_v17 = vpack.c.b16 %v892_v9, %v892_v9  ;;  %v953_v22 = vshrl.u32 %v2040_v2, 16 }
  0x2e   : > { %v798_v12 = vsel %vm527_vm0, %v796_v63, %v797_v0  ;;  %v957_v23 = vrot.slane %v955_v10, 1  ;;  %v1725_v28 = vor.u32 %v1724_v20, %v1723_v19  ;;  %v380_v29 = vunpack.c.l.b16 %v244_v21 }
  0x2f   : > { %v413_v15 = vrot.slane %v411_v5, 1  ;;  %v960_v24 = vshll.u32 %v900_v17, 16  ;;  %v1046_v25 = vrot.slane %v1722_v13, 1  ;;  %v1799_v33 = vor.u32 %v1798_v18, %v2020_v45 }
  0x30   : > { %v2060_v30 = vor.u32 %v957_v23, %v953_v22  ;;  %v1052_v34 = vrot.slane %v1725_v28, 1  ;;  %v1053_v35 = vrot.slane %v900_v17, 1  ;;  %v388_v38 = vpack.c.b16 %v380_v29, %v380_v29  ;;  %v1804_v22 = vld [vmem:[%s1931_s24 + $0x24] sm:$0xe]  ;;  %v241_v28 = vld [vmem:[%s1931_s24 + $0x2c] sm:$0x1] }
  0x31   : > { %v962_v31 = vrot.slane %v960_v24, 1  ;;  %v531_v47 = vrot.slane %v1799_v33, 1  ;;  %v532_v48 = vrot.slane %v383_v60, 1  ;;  %v723_v5 = vshll.u32 %v1559_v51, 16  ;;  %v2098_v23 = vld [vmem:[%s1931_s24 + $0x24] sm:$0xff]  }
  0x32   : > { %v1054_v49 = vsel %vm527_vm0, %v1052_v34, %v1053_v35  ;;  %v1806_v24 = vld [vmem:[%s1931_s24 + $0x24] sm:$0xf0] }
  0x33   : > { %556 = vrot.lane.b32.xlu0 %v536_v26, %s1866_s27  ;;  %612 = vrot.lane.b32.xlu2 %v1967_v43, %s1865_s26  ;;  %v936_v43 = vshll.u32 %v898_v50, 16  ;;  %v1047_v26 = vrot.slane %v898_v50, 1  ;;  %v963_v41 = vsel %vm390_vm1, %v2060_v30, %v962_v31  ;;  %v633_v50 = vunpack.c.l.b16 %v1564_v39  ;;  %v1603_v33 = vld [vmem:[%s1931_s24 + $0x68] sm:$0x1] }
  0x34   : > { %v533_v54 = vsel %vm527_vm0, %v531_v47, %v532_v48  ;;  %v894_v39 = vunpack.c.l.b16 %v1603_v33  ;;  %v2110_v47 = vld [vmem:[%s1931_s24 + $0x60] sm:$0xff]   ;;  %v430_v48 = vshll.u32 %v2098_v23, 16 }
  0x35   : > { %748 = vrot.lane.b32.xlu1 %v683_v37, %s1870_s4  ;;  %v938_v58 = vrot.slane %v936_v43, 1  ;;  %v1048_v32 = vsel %vm527_vm0, %v1046_v25, %v1047_v26  ;;  %v1703_v37 = vld [vmem:[%s1931_s24 + $0x48] sm:$0xe]  ;;  %v547_v43 = vrot.slane %v388_v38, 1  ;;  %v641_v56 = vpack.c.b16 %v633_v50, %v633_v50 }
  0x36   : > { %v1704_v45 = vor.u32 %v1703_v37, %v1702_v36  ;;  %v377_v37 = vunpack.c.l.b16 %v241_v28 }
  0x37   : > { %v939_v3 = vsel %vm390_vm1, %v1996_v8, %v938_v58  ;;  %v1569_v58 = vld [vmem:[%s1931_s24 + $0x5c] sm:$0x1]  ;;  %v788_v9 = vrot.slane %v641_v56, 1 }
  0x38   : > { %v638_v0 = vunpack.c.l.b16 %v1569_v58  ;;  %v432_v58 = vrot.slane %v430_v48, 1 }
  0x3a   : > { %v646_v10 = vpack.c.b16 %v638_v0, %v638_v0  ;;  %v243_v0 = vld [vmem:[%s1931_s24 + $0x44] sm:$0x1] }
  0x3b   : > { %560 = vrot.lane.b32.xlu0 %v542_v46, %s1866_s27  ;;  %616 = vrot.lane.b32.xlu2 %v1555_v4, %s1865_s26  ;;  %v408_v4 = vrot.slane %v406_v61, 1  ;;  %v471_v46 = vshll.u32 %v388_v38, 16  ;;  %v668_v61 = vshll.u32 %v641_v56, 16  ;;  %v1807_v38 = vld [vmem:[%s1931_s24 + $0x24] sm:$0xe] }
  0x3c   : > { %v728_v17 = vshll.u32 %v646_v10, 16 }
  0x3d   : > { %752 = vrot.lane.b32.xlu1 %v707_v55, %s1870_s4  ;;  %v409_v14 = vor.u32 %v408_v4, %v404_v1  ;;  %v473_v53 = vrot.slane %v471_v46, 1  ;;  %v546_v55 = vrot.slane %v1704_v45, 1  ;;  %v1583_v1 = vld [vmem:[%s1931_s24 + $0x24] sm:$0xff]   ;;  %v1801_v4 = vld [vmem:[%s1931_s24 + $0x54] sm:$0xe]  ;;  %v670_v6 = vrot.slane %v668_v61, 1 }
  0x3e   : > { %v1802_v20 = vor.u32 %v1801_v4, %v1800_v52  ;;  %v919_v21 = vshll.u32 %v1583_v1, 16  ;;  %v730_v25 = vrot.slane %v728_v17, 1  ;;  %v917_v29 = vshrl.u32 %v1583_v1, 16  ;;  %v1220_v45 = vld [vmem:[%s2406_s1 + $0x10] sm:$0x3] }
  0x3f   : > { %v414_v27 = vsel %vm390_vm1, %v409_v14, %v413_v15  ;;  %v474_v60 = vsel %vm390_vm1, %v2060_v30, %v473_v53  ;;  %v548_v62 = vsel %vm527_vm0, %v546_v55, %v547_v43  ;;  %v671_v13 = vsel %vm390_vm1, %v1981_v59, %v670_v6  ;;  %v2118_v53 = vld [vmem:[%s1931_s24 + $0x3c] sm:$0xff]  }
  0x40   : > { %v721_v14 = vshrl.u32 %v1559_v51, 16  ;;  %v725_v15 = vrot.slane %v723_v5, 1  ;;  %v802_v26 = vrot.slane %v1802_v20, 1  ;;  %v921_v31 = vrot.slane %v919_v21, 1  ;;  %v1632_v21 = vld [vmem:[%s2406_s1] sm:$0xff] }
  0x41   : > { %v385_v52 = vpack.c.b16 %v377_v37, %v377_v37  ;;  %v979_v55 = vshll.u32 %v2110_v47, 16  ;;  %v2124_v43 = vpack.c.b16 %v894_v39, %v894_v39 }
  0x43   : > { %812 = vrot.lane.b32.xlu0 %v792_v44, %s1869_s30  ;;  %868 = vrot.lane.b32.xlu2 %v1963_v40, %s1864_s25  ;;  %v1705_v44 = vld [vmem:[%s1931_s24 + $0x18] sm:$0xf0]  ;;  %v984_v5 = vshll.u32 %v2124_v43, 16  ;;  %v1059_v28 = vrot.slane %v2124_v43, 1 }
  0x44   : > { %v1707_v63 = vor.u32 %v1706_v57, %v1705_v44  ;;  %v428_v57 = vshrl.u32 %v2098_v23, 16  ;;  %v2175_v43 = vld [vmem:[%s1931_s24 + $0x3c] sm:$0xff]  }
  0x45   : > { %1004 = vrot.lane.b32.xlu1 %v939_v3, %s1871_s5  ;;  %v1803_v3 = vld [vmem:[%s1931_s24 + $0x24] sm:$0xf0] }
  0x46   : > { %v787_v7 = vrot.slane %v1707_v63, 1  ;;  %v1805_v36 = vor.u32 %v1804_v22, %v1803_v3  ;;  %v1808_v63 = vor.u32 %v1807_v38, %v1806_v24  ;;  %v977_v3 = vshrl.u32 %v2110_v47, 16 }
  0x47   : > { %v433_v6 = vor.u32 %v432_v58, %v428_v57  ;;  %v454_v24 = vshll.u32 %v2118_v53, 16 }
  0x48   : > { %v789_v19 = vsel %vm527_vm0, %v787_v7, %v788_v9  ;;  %v1043_v50 = vrot.slane %v1805_v36, 1  ;;  %v1633_v9 = vld [vmem:[%s2406_s1 + $0x8] sm:$0xff] }
  0x4b   : > { %816 = vrot.lane.b32.xlu0 %v798_v12, %s1869_s30  ;;  %872 = vrot.lane.b32.xlu2 %v2040_v2, %s1864_s25  ;;  %v1598_v12 = vld [vmem:[%s1931_s24 + $0x2c] sm:$0x1] }
  0x4c   : > { %v889_v18 = vunpack.c.l.b16 %v1598_v12  ;;  %v1726_v12 = vld [vmem:[%s1931_s24 + $0x60] sm:$0xf0] }
  0x4d   : > { %489 = vrot.lane.b32.xlu1 %v414_v27, %s1868_s29  ;;  %v803_v27 = vrot.slane %v646_v10, 1  ;;  %v379_v10 = vunpack.c.l.b16 %v243_v0  ;;  %v2184_v0 = vld [vmem:[%s1931_s24 + $0x54] sm:$0xff]  }
  0x4e   : > { %v897_v59 = vpack.c.b16 %v889_v18, %v889_v18  ;;  %v986_v18 = vrot.slane %v984_v5, 1 }
  0x4f   : > { %v804_v35 = vsel %vm527_vm0, %v802_v26, %v803_v27  ;;  %v387_v22 = vpack.c.b16 %v379_v10, %v379_v10 }
  0x53   : > { %1068 = vrot.lane.b32.xlu0 %v1048_v32, %s1867_s28  ;;  %1008 = vrot.lane.b32.xlu2 %v963_v41, %s1871_s5  ;;  %v924_v32 = vshll.u32 %v897_v59, 16  ;;  %v922_v41 = vor.u32 %v921_v31, %v917_v29  ;;  %v452_v29 = vshrl.u32 %v2118_v53, 16  ;;  %v456_v31 = vrot.slane %v454_v24, 1 }
  0x55   : > { %1072 = vrot.lane.b32.xlu1 %v1054_v49, %s1867_s28  ;;  %v926_v46 = vrot.slane %v924_v32, 1  ;;  %v1230_v49 = vunpack.c.l.b16 %v1220_v45  ;;  %v459_v32 = vshll.u32 %v387_v22, 16  ;;  %v457_v38 = vor.u32 %v456_v31, %v452_v29 }
  0x56   : > { %v544_v45 = vrot.slane %v387_v22, 1  ;;  %v1602_v22 = vld [vmem:[%s1931_s24 + $0x5c] sm:$0x1] }
  0x57   : > { %v927_v56 = vsel %vm390_vm1, %v922_v41, %v926_v46  ;;  %v1233_v44 = vpack.c.b16 %v1230_v49, %v1230_v49  ;;  %v461_v39 = vrot.slane %v459_v32, 1 }
  0x59   : > { %v1255_v61 = vsel %vm1253_vm2, %v1233_v44, 0  ;;  %v462_v49 = vsel %vm390_vm1, %v457_v38, %v461_v39  ;;  %v245_v38 = vld [vmem:[%s1931_s24 + $0x5c] sm:$0x1] }
  0x5a   : > { %1262 = vmatpush.bf16.msra.mxu0 %v1255_v61  ;;  %1729 = vmatpush.bf16.msra.mxu1 %v1255_v61 }
  0x5b   : > { %554 = vrot.lane.b32.xlu0 %v533_v54, %s1866_s27  ;;  %499 = vrot.lane.b32.xlu2 %v474_v60, %s1868_s29  ;;  %v2121_v54 = vld [vmem:[%s1931_s24 + $0x3c] sm:$0xf0]  ;;  %v435_v60 = vshll.u32 %v385_v52, 16 }
  0x5c   : > { %1730 = vmatpush.bf16.msra.mxu2 %v1255_v61  ;;  %1731 = vmatpush.bf16.msra.mxu3 %v1255_v61 }
  0x5d   : > { %564 = vrot.lane.b32.xlu1 %v548_v62, %s1866_s27  ;;  %v437_v7 = vrot.slane %v435_v60, 1 }
  0x5e   : > { %1263 = vmatpush.bf16.msra.mxu0 %v1633_v9  ;;  %1732 = vmatpush.bf16.msra.mxu1 %v1633_v9 }
  0x60   : > { %1733 = vmatpush.bf16.msra.mxu2 %v1633_v9  ;;  %1734 = vmatpush.bf16.msra.mxu3 %v1633_v9 }
  0x62   : > { %1264 = vmatpush.bf16.msra.mxu0 %v1632_v21  ;;  %1735 = vmatpush.bf16.msra.mxu1 %v1632_v21 }
  0x63   : > { %610 = vrot.lane.b32.xlu0 %v1949_v16, %s1865_s26  ;;  %746 = vrot.lane.b32.xlu2 %v671_v13, %s1870_s4  ;;  %v726_v16 = vor.u32 %v725_v15, %v721_v14  ;;  %v1727_v13 = vld [vmem:[%s1931_s24 + $0x60] sm:$0xe]  ;;  %v537_v14 = vrot.slane %v1808_v63, 1  ;;  %v538_v15 = vrot.slane %v385_v52, 1  ;;  %v1708_v52 = vld [vmem:[%s1931_s24 + $0x30] sm:$0xf0] }
  0x64   : > { %v1728_v20 = vor.u32 %v1727_v13, %v1726_v12  ;;  %1736 = vmatpush.bf16.msra.mxu2 %v1632_v21  ;;  %1737 = vmatpush.bf16.msra.mxu3 %v1632_v21 }
  0x65   : > { %810 = vrot.lane.b32.xlu1 %v789_v19, %s1869_s30  ;;  %v731_v34 = vsel %vm390_vm1, %v726_v16, %v730_v25  ;;  %v438_v19 = vsel %vm390_vm1, %v433_v6, %v437_v7  ;;  %v1810_v16 = vld [vmem:[%s1931_s24 + $0x3c] sm:$0xe]  ;;  %v539_v25 = vsel %vm527_vm0, %v537_v14, %v538_v15  ;;  %v1711_v6 = vld [vmem:[%s1931_s24 + $0x48] sm:$0xf0]  ;;  %v1712_v7 = vld [vmem:[%s1931_s24 + $0x48] sm:$0xe] }
  0x66   : > { %v1058_v27 = vrot.slane %v1728_v20, 1  ;;  %v1811_v37 = vor.u32 %v1810_v16, %v2121_v54  ;;  %v1709_v54 = vld [vmem:[%s1931_s24 + $0x30] sm:$0xe]  ;;  %v1713_v15 = vor.u32 %v1712_v7, %v1711_v6 }
  0x67   : > { %v1710_v58 = vor.u32 %v1709_v54, %v1708_v52 }
  0x68   : > { %v1060_v36 = vsel %vm527_vm0, %v1058_v27, %v1059_v28  ;;  %v543_v48 = vrot.slane %v1811_v37, 1  ;;  %v799_v27 = vrot.slane %v1713_v15, 1  ;;  %v967_v37 = vshll.u32 %v2184_v0, 16 }
  0x6a   : > { %v545_v57 = vsel %vm527_vm0, %v543_v48, %v544_v45 }
  0x6b   : > { %620 = vrot.lane.b32.xlu0 %v1559_v51, %s1865_s26  ;;  %756 = vrot.lane.b32.xlu2 %v731_v34, %s1870_s4  ;;  %v1044_v51 = vrot.slane %v897_v59, 1  ;;  %v1566_v59 = vld [vmem:[%s1931_s24 + $0x38] sm:$0x1] }
  0x6c   : > { %v635_v34 = vunpack.c.l.b16 %v1566_v59  ;;  %v2212_v59 = vld [vmem:[%s1931_s24 + $0x54] sm:$0xff]  }
  0x6d   : > { %820 = vrot.lane.b32.xlu1 %v804_v35, %s1869_s30  ;;  %v1045_v62 = vsel %vm527_vm0, %v1043_v50, %v1044_v51  ;;  %v1568_v35 = vld [vmem:[%s1931_s24 + $0x50] sm:$0x1] }
  0x6e   : > { %v643_v41 = vpack.c.b16 %v635_v34, %v635_v34  ;;  %v637_v46 = vunpack.c.l.b16 %v1568_v35  ;;  %v893_v34 = vunpack.c.l.b16 %v1602_v22  ;;  %v1821_v22 = vld [vmem:[%s1931_s24 + $0x6c] sm:$0xf0] }
  0x70   : > { %v692_v50 = vshll.u32 %v643_v41, 16  ;;  %v645_v44 = vpack.c.b16 %v637_v46, %v637_v46  ;;  %v794_v5 = vrot.slane %v643_v41, 1 }
  0x71   : > { %v2132_v4 = vpop.permute.xlu2 %864 }
  0x72   : > { %v694_v60 = vrot.slane %v692_v50, 1  ;;  %v716_v63 = vshll.u32 %v645_v44, 16  ;;  %v800_v29 = vrot.slane %v645_v44, 1  ;;  %v901_v50 = vpack.c.b16 %v893_v34, %v893_v34 }
  0x73   : > { %866 = vrot.lane.b32.xlu0 %v1583_v1, %s1864_s25  ;;  %1002 = vrot.lane.b32.xlu2 %v927_v56, %s1871_s5  ;;  %v981_v1 = vrot.slane %v979_v55, 1  ;;  %v2178_v56 = vld [vmem:[%s1931_s24 + $0x3c] sm:$0xf0] }
  0x74   : > { %v695_v9 = vsel %vm390_vm1, %v1996_v8, %v694_v60  ;;  %v718_v14 = vrot.slane %v716_v63, 1  ;;  %v1813_v8 = vld [vmem:[%s1931_s24 + $0x3c] sm:$0xe]  ;;  %v801_v41 = vsel %vm527_vm0, %v799_v27, %v800_v29  ;;  %v965_v60 = vshrl.u32 %v2184_v0, 16 }
  0x75   : > { %1066 = vrot.lane.b32.xlu1 %v1045_v62, %s1867_s28  ;;  %v2142_v17 = vor.u32 %v981_v1, %v977_v3  ;;  %v1600_v62 = vld [vmem:[%s1931_s24 + $0x44] sm:$0x1]  ;;  %v2187_v3 = vld [vmem:[%s1931_s24 + $0x54] sm:$0xf0]  ;;  %v793_v1 = vrot.slane %v1710_v58, 1  ;;  %v1814_v46 = vor.u32 %v1813_v8, %v2178_v56  ;;  %v478_v58 = vshll.u32 %v2212_v59, 16 }
  0x76   : > { %v891_v12 = vunpack.c.l.b16 %v1600_v62  ;;  %v719_v16 = vsel %vm390_vm1, %v2060_v30, %v718_v14  ;;  %v972_v62 = vshll.u32 %v901_v50, 16 }
  0x77   : > { %v987_v26 = vsel %vm390_vm1, %v2142_v17, %v986_v18  ;;  %v795_v18 = vsel %vm527_vm0, %v793_v1, %v794_v5  ;;  %v1056_v1 = vrot.slane %v901_v50, 1  ;;  %v1819_v5 = vld [vmem:[%s1931_s24 + $0x54] sm:$0xe] }
  0x78   : > { %v2201_v20 = vpack.c.b16 %v891_v12, %v891_v12 }
  0x7a   : > { %v948_v30 = vshll.u32 %v2201_v20, 16 }
  0x7b   : > { %876 = vrot.lane.b32.xlu0 %v2110_v47, %s1864_s25  ;;  %493 = vrot.lane.b32.xlu2 %v438_v19, %s1868_s29  ;;  %v943_v19 = vshll.u32 %v2175_v43, 16 }
  0x7d   : > { %558 = vrot.lane.b32.xlu1 %v539_v25, %s1866_s27  ;;  %v2160_v33 = vpop.permute.xlu2 %808  ;;  %v1816_v25 = vld [vmem:[%s1931_s24 + $0x54] sm:$0xe]  ;;  %v945_v31 = vrot.slane %v943_v19, 1 }
  0x83   : > { %1012 = vrot.lane.b32.xlu0 %v987_v26, %s1871_s5  ;;  %1076 = vrot.lane.b32.xlu2 %v1060_v36, %s1867_s28  ;;  %v2215_v26 = vld [vmem:[%s1931_s24 + $0x54] sm:$0xf0] }
  0x84   : > { %v1820_v27 = vor.u32 %v1819_v5, %v2215_v26 }
  0x85   : > { %614 = vrot.lane.b32.xlu1 %v1963_v40, %s1865_s26  ;;  %v2170_v51 = vpop.permute.xlu2 %491 }
  0x86   : > { %v609_v55 = vpop.permute.xlu1 %608 }
  0x8b   : > { %497 = vrot.lane.b32.xlu0 %v462_v49, %s1868_s29  ;;  %562 = vrot.lane.b32.xlu2 %v545_v57, %s1866_s27  ;;  %v950_v49 = vrot.slane %v948_v30, 1  ;;  %v1050_v57 = vrot.slane %v2201_v20, 1 }
  0x8d   : > { %v553_v61 = vpop.permute.xlu0 %552  ;;  %618 = vrot.lane.b32.xlu1 %v2040_v2, %s1865_s26  ;;  %v2196_v10 = vpop.permute.xlu2 %612 }
  0x8f   : > { %v1065_v13 = vpop.permute.xlu1 %1064 }
  0x93   : > { %750 = vrot.lane.b32.xlu0 %v695_v9, %s1870_s4  ;;  %814 = vrot.lane.b32.xlu2 %v795_v18, %s1869_s30  ;;  %v1570_v9 = vld [vmem:[%s1931_s24 + $0x68] sm:$0x1]  ;;  %v974_v18 = vrot.slane %v972_v62, 1  ;;  %v1787_v62 = vld [vmem:[%s1931_s24 + $0x18] sm:$0xff]  }
  0x94   : > { %v639_v8 = vunpack.c.l.b16 %v1570_v9 }
  0x95   : > { %v488_v21 = vpop.permute.xlu0 %487  ;;  %870 = vrot.lane.b32.xlu1 %v2175_v43, %s1864_s25  ;;  %v2222_v32 = vpop.permute.xlu2 %616 }
  0x96   : > { %v1082_v24 = vsel %vm1080_vm3, %v1944_v11, %v488_v21  ;;  %v941_v11 = vshrl.u32 %v2175_v43, 16  ;;  %v381_v43 = vunpack.c.l.b16 %v245_v38  ;;  %v1595_v21 = vld [vmem:[%s1931_s24 + $0x6c] sm:$0xff]   ;;  %v647_v29 = vpack.c.b16 %v639_v8, %v639_v8  ;;  %v1714_v38 = vld [vmem:[%s1931_s24 + $0x60] sm:$0xf0] }
  0x97   : > { %v1099_v28 = vsel %vm1097_vm4, %v1082_v24, %v553_v61  ;;  %v745_v35 = vpop.permute.xlu1 %744  ;;  %v969_v61 = vrot.slane %v967_v37, 1  ;;  %v991_v26 = vshll.u32 %v1595_v21, 16 }
  0x98   : > { %v1116_v36 = vsel %vm1114_vm5, %v1099_v28, %v609_v55  ;;  %v946_v45 = vor.u32 %v945_v31, %v941_v11  ;;  %v1817_v55 = vor.u32 %v1816_v25, %v2187_v3  ;;  %v389_v6 = vpack.c.b16 %v381_v43, %v381_v43  ;;  %v1604_v31 = vld [vmem:[%s1931_s24 + $0x74] sm:$0x1] }
  0x99   : > { %v1133_v39 = vsel %vm1131_vm6, %v1116_v36, %v745_v35  ;;  %v970_v15 = vor.u32 %v969_v61, %v965_v60  ;;  %v740_v34 = vshll.u32 %v647_v29, 16  ;;  %v549_v35 = vrot.slane %v1820_v27, 1 }
  0x9a   : > { %v1150_v48 = vsel %vm1148_vm7, %v1133_v39, %v2160_v33  ;;  %v1049_v33 = vrot.slane %v1814_v46, 1  ;;  %v1055_v3 = vrot.slane %v1817_v55, 1  ;;  %v483_v14 = vshll.u32 %v389_v6, 16  ;;  %v1715_v39 = vld [vmem:[%s1931_s24 + $0x60] sm:$0xe] }
  0x9b   : > { %754 = vrot.lane.b32.xlu0 %v719_v16, %s1870_s4  ;;  %v1167_v52 = vsel %vm1165_vm8, %v1150_v48, %v2132_v4  ;;  %818 = vrot.lane.b32.xlu2 %v801_v41, %s1869_s30  ;;  %v951_v4 = vsel %vm390_vm1, %v946_v45, %v950_v49  ;;  %v975_v25 = vsel %vm390_vm1, %v970_v15, %v974_v18  ;;  %v550_v36 = vrot.slane %v389_v6, 1  ;;  %v1822_v49 = vld [vmem:[%s1931_s24 + $0x6c] sm:$0xe] }
  0x9c   : > { %v1051_v12 = vsel %vm527_vm0, %v1049_v33, %v1050_v57  ;;  %v1057_v20 = vsel %vm527_vm0, %v1055_v3, %v1056_v1  ;;  %v485_v16 = vrot.slane %v483_v14, 1  ;;  %v895_v41 = vunpack.c.l.b16 %v1604_v31 }
  0x9d   : > { %v1001_v54 = vpop.permute.xlu0 %1000  ;;  %874 = vrot.lane.b32.xlu1 %v2184_v0, %s1864_s25  ;;  %v2246_v63 = vpop.permute.xlu2 %868  ;;  %v480_v0 = vrot.slane %v478_v58, 1  ;;  %v742_v46 = vrot.slane %v740_v34, 1  ;;  %v551_v48 = vsel %vm527_vm0, %v549_v35, %v550_v36  ;;  %v1716_v45 = vor.u32 %v1715_v39, %v1714_v38 }
  0x9e   : > { %v1184_v44 = vsel %vm1182_vm9, %v1167_v52, %v1001_v54  ;;  %v903_v50 = vpack.c.b16 %v895_v41, %v895_v41  ;;  %v989_v43 = vshrl.u32 %v1595_v21, 16  ;;  %v806_v57 = vrot.slane %v647_v29, 1 }
  0x9f   : > { %v1201_v56 = vsel %vm1199_vm10, %v1184_v44, %v1065_v13  ;;  %v2249_v7 = vpop.permute.xlu1 %495  ;;  %v476_v13 = vshrl.u32 %v2212_v59, 16  ;;  %v743_v55 = vsel %vm390_vm1, %v2142_v17, %v742_v46  ;;  %v993_v44 = vrot.slane %v991_v26, 1 }
  0xa0   : > { %1621 = vmatmul.msk.bf16.vlgmr.msra.gmra.mxu0 %vm1236_vm11, %v1201_v56  ;;  %v996_v56 = vshll.u32 %v903_v50, 16  ;;  %v805_v33 = vrot.slane %v1716_v45, 1  ;;  %v1823_v61 = vor.u32 %v1822_v49, %v1821_v22  ;;  %v1086_v3 = vsel %vm1080_vm3, %v1787_v62, %v2170_v51 }
  0xa1   : > { %v481_v24 = vor.u32 %v480_v0, %v476_v13  ;;  %v1090_v6 = vsel %vm1080_vm3, %v1963_v40, %v2249_v7  ;;  %v1062_v13 = vrot.slane %v903_v50, 1 }
  0xa2   : > { %v807_v60 = vsel %vm527_vm0, %v805_v33, %v806_v57 }
  0xa3   : > { %1006 = vrot.lane.b32.xlu0 %v951_v4, %s1871_s5  ;;  %1070 = vrot.lane.b32.xlu2 %v1051_v12, %s1867_s28  ;;  %v486_v30 = vsel %vm390_vm1, %v481_v24, %v485_v16  ;;  %v998_v4 = vrot.slane %v996_v56, 1  ;;  %v1061_v12 = vrot.slane %v1823_v61, 1 }
  0xa5   : > { %v557_v19 = vpop.permute.xlu0 %556  ;;  %1074 = vrot.lane.b32.xlu1 %v1057_v20, %s1867_s28  ;;  %v2262_v28 = vpop.permute.xlu2 %872  ;;  %v1063_v18 = vsel %vm527_vm0, %v1061_v12, %v1062_v13 }
  0xa6   : > { %v1103_v9 = vsel %vm1097_vm4, %v1086_v3, %v557_v19 }
  0xa7   : > { %v749_v11 = vpop.permute.xlu1 %748  ;;  %v1120_v51 = vsel %vm1114_vm5, %v1103_v9, %v2196_v10 }
  0xa8   : > { %v1137_v15 = vsel %vm1131_vm6, %v1120_v51, %v749_v11 }
  0xab   : > { %1010 = vrot.lane.b32.xlu0 %v975_v25, %s1871_s5  ;;  %501 = vrot.lane.b32.xlu2 %v486_v30, %s1868_s29 }
  0xad   : > { %v561_v37 = vpop.permute.xlu0 %560  ;;  %622 = vrot.lane.b32.xlu1 %v2110_v47, %s1865_s26  ;;  %v1009_v54 = vpop.permute.xlu2 %1008  ;;  %v994_v47 = vor.u32 %v993_v44, %v989_v43  ;;  %s2351_s26 = scalar_lea.vmem %s2407_s2, %s1539_s23 }
  0xae   : > { %v1107_v14 = vsel %vm1097_vm4, %v1090_v6, %v561_v37 }
  0xaf   : > { %v753_v52 = vpop.permute.xlu1 %752  ;;  %v999_v5 = vsel %vm390_vm1, %v994_v47, %v998_v4  ;;  %v1124_v40 = vsel %vm1114_vm5, %v1107_v14, %v2222_v32 }
  0xb0   : > { %v1141_v19 = vsel %vm1131_vm6, %v1124_v40, %v753_v52 }
  0xb3   : > { %566 = vrot.lane.b32.xlu0 %v551_v48, %s1866_s27  ;;  %758 = vrot.lane.b32.xlu2 %v743_v55, %s1870_s4  ;;  %s1540_s27 = sshll.u32 %s2420_s13, 1 }
  0xb5   : > { %v813_v58 = vpop.permute.xlu0 %812  ;;  %878 = vrot.lane.b32.xlu1 %v1595_v21, %s1864_s25  ;;  %v500_v1 = vpop.permute.xlu2 %499 }
  0xb6   : > { %v1154_v20 = vsel %vm1148_vm7, %v1137_v15, %v813_v58 }
  0xb7   : > { %v1005_v17 = vpop.permute.xlu1 %1004  ;;  %v1171_v8 = vsel %vm1165_vm8, %v1154_v20, %v2246_v63 }
  0xb8   : > { %v1188_v22 = vsel %vm1182_vm9, %v1171_v8, %v1005_v17 }
  0xbb   : > { %822 = vrot.lane.b32.xlu0 %v807_v60, %s1869_s30  ;;  %1014 = vrot.lane.b32.xlu2 %v999_v5, %s1871_s5 }
  0xbd   : > { %v817_v0 = vpop.permute.xlu0 %816  ;;  %v747_v21 = vpop.permute.xlu2 %746 }
  0xbe   : > { %v1158_v10 = vsel %vm1148_vm7, %v1141_v19, %v817_v0 }
  0xbf   : > { %v490_v7 = vpop.permute.xlu1 %489  ;;  %v1175_v25 = vsel %vm1165_vm8, %v1158_v10, %v2262_v28 }
  0xc0   : > { %v1192_v32 = vsel %vm1182_vm9, %v1175_v25, %v1009_v54  ;;  %v1084_v37 = vsel %vm1080_vm3, %v2017_v42, %v490_v7  ;;  %v1094_v42 = vsel %vm1080_vm3, %v2040_v2, %v500_v1 }
  0xc3   : > { %1078 = vrot.lane.b32.xlu0 %v1063_v18, %s1867_s28  ;;  %s214_s28 = sadd.s32 %s1540_s27, %s2424_s12 }
  0xc4   : > { %s1541_s29 = sshll.u32 %s214_s28, 1 }
  0xc5   : > { %v1069_v24 = vpop.permute.xlu0 %1068  ;;  %v757_v11 = vpop.permute.xlu2 %756  ;;  %s216_s5 = scalar_lea.vmem %s2408_s3, %s1541_s29 }
  0xc6   : > { %v1205_v16 = vsel %vm1199_vm10, %v1188_v22, %v1069_v24 }
  0xc7   : > { %1623 = vmatmul.msk.bf16.vlgmr.msra.gmra.mxu1 %vm1236_vm11, %v1205_v16  ;;  %v1073_v27 = vpop.permute.xlu1 %1072 }
  0xc8   : > { %v1209_v29 = vsel %vm1199_vm10, %v1192_v32, %v1073_v27 }
  0xc9   : > { %1625 = vmatmul.msk.bf16.vlgmr.msra.gmra.mxu2 %vm1236_vm11, %v1209_v29 }
  0xcd   : > { %v555_v63 = vpop.permute.xlu0 %554  ;;  %v1003_v34 = vpop.permute.xlu2 %1002 }
  0xce   : > { %v1101_v28 = vsel %vm1097_vm4, %v1084_v37, %v555_v63 }
  0xcf   : > { %v565_v31 = vpop.permute.xlu1 %564 }
  0xd0   : > { %v1111_v43 = vsel %vm1097_vm4, %v1094_v42, %v565_v31 }
  0xd5   : > { %v611_v30 = vpop.permute.xlu0 %610  ;;  %v494_v41 = vpop.permute.xlu2 %493 }
  0xd6   : > { %v1118_v38 = vsel %vm1114_vm5, %v1101_v28, %v611_v30  ;;  %v1088_v9 = vsel %vm1080_vm3, %v2098_v23, %v494_v41 }
  0xd7   : > { %v811_v35 = vpop.permute.xlu1 %810  ;;  %v1135_v26 = vsel %vm1131_vm6, %v1118_v38, %v747_v21 }
  0xd8   : > { %v1152_v48 = vsel %vm1148_vm7, %v1135_v26, %v811_v35 }
  0xdd   : > { %v621_v36 = vpop.permute.xlu0 %620  ;;  %v1077_v54 = vpop.permute.xlu2 %1076 }
  0xde   : > { %v1128_v44 = vsel %vm1114_vm5, %v1111_v43, %v621_v36 }
  0xdf   : > { %v821_v39 = vpop.permute.xlu1 %820  ;;  %v1145_v33 = vsel %vm1131_vm6, %v1128_v44, %v757_v11 }
  0xe0   : > { %v1162_v57 = vsel %vm1148_vm7, %v1145_v33, %v821_v39 }
  0xe5   : > { %v867_v46 = vpop.permute.xlu0 %866  ;;  %v563_v2 = vpop.permute.xlu2 %562 }
  0xe6   : > { %v1169_v45 = vsel %vm1165_vm8, %v1152_v48, %v867_v46 }
  0xe7   : > { %v1186_v49 = vsel %vm1182_vm9, %v1169_v45, %v1003_v34  ;;  %v1067_v50 = vpop.permute.xlu1 %1066 }
  0xe8   : > { %v1203_v52 = vsel %vm1199_vm10, %v1186_v49, %v1067_v50 }
  0xe9   : > { %1622 = vmatmul.msk.bf16.gmra.mxu0 %vm1236_vm11, %v1203_v52 }
  0xed   : > { %v877_v55 = vpop.permute.xlu0 %876  ;;  %v815_v3 = vpop.permute.xlu2 %814 }
  0xee   : > { %v1179_v58 = vsel %vm1165_vm8, %v1162_v57, %v877_v55 }
  0xef   : > { %v559_v56 = vpop.permute.xlu1 %558 }
  0xf0   : > { %v1105_v13 = vsel %vm1097_vm4, %v1088_v9, %v559_v56 }
  0xf5   : > { %v1013_v47 = vpop.permute.xlu0 %1012  ;;  %v819_v6 = vpop.permute.xlu2 %818 }
  0xf6   : > { %v1196_v4 = vsel %vm1182_vm9, %v1179_v58, %v1013_v47 }
  0xf7   : > { %v1213_v60 = vsel %vm1199_vm10, %v1196_v4, %v1077_v54  ;;  %v615_v61 = vpop.permute.xlu1 %614 }
  0xf8   : > { %1627 = vmatmul.msk.bf16.vlgmr.msra.gmra.mxu3 %vm1236_vm11, %v1213_v60  ;;  %v1122_v0 = vsel %vm1114_vm5, %v1105_v13, %v615_v61 }
  0xfd   : > { %v498_v62 = vpop.permute.xlu0 %497  ;;  %v1071_v20 = vpop.permute.xlu2 %1070 }
  0xfe   : > { %v1092_v15 = vsel %vm1080_vm3, %v2118_v53, %v498_v62 }
  0xff   : > { %v619_v17 = vpop.permute.xlu1 %618  ;;  %v1109_v19 = vsel %vm1097_vm4, %v1092_v15, %v563_v2 }
 0x100   : > { %v1126_v10 = vsel %vm1114_vm5, %v1109_v19, %v619_v17 }
 0x105   : > { %v751_v1 = vpop.permute.xlu0 %750  ;;  %v502_v27 = vpop.permute.xlu2 %501 }
 0x106   : > { %v1139_v51 = vsel %vm1131_vm6, %v1122_v0, %v751_v1  ;;  %v1096_v11 = vsel %vm1080_vm3, %v2212_v59, %v502_v27 }
 0x107   : > { %v871_v5 = vpop.permute.xlu1 %870  ;;  %v1156_v18 = vsel %vm1148_vm7, %v1139_v51, %v815_v3 }
 0x108   : > { %v1173_v40 = vsel %vm1165_vm8, %v1156_v18, %v871_v5 }
 0x10d   : > { %v755_v12 = vpop.permute.xlu0 %754  ;;  %v759_v35 = vpop.permute.xlu2 %758 }
 0x10e   : > { %v1143_v53 = vsel %vm1131_vm6, %v1126_v10, %v755_v12 }
 0x10f   : > { %v875_v14 = vpop.permute.xlu1 %874  ;;  %v1160_v22 = vsel %vm1148_vm7, %v1143_v53, %v819_v6 }
 0x110   : > { %v1177_v24 = vsel %vm1165_vm8, %v1160_v22, %v875_v14 }
 0x115   : > { %v1007_v23 = vpop.permute.xlu0 %1006  ;;  %v1015_v41 = vpop.permute.xlu2 %1014 }
 0x116   : > { %v1190_v7 = vsel %vm1182_vm9, %v1173_v40, %v1007_v23 }
 0x117   : > { %v1207_v8 = vsel %vm1199_vm10, %v1190_v7, %v1071_v20  ;;  %v1075_v21 = vpop.permute.xlu1 %1074 }
 0x118   : > { %1624 = vmatmul.msk.bf16.gmra.mxu1 %vm1236_vm11, %v1207_v8 }
 0x11d   : > { %v1266_v16 = vpop.f32.mrf.mxu0  ;;  %v1011_v25 = vpop.permute.xlu0 %1010 }
 0x11e   : > { %1306 = vst [vmem:[%s2351_s26] sm:$0xff] %v1266_v16  ;;  %v1194_v32 = vsel %vm1182_vm9, %v1177_v24, %v1011_v25  ;;  %v1343_v44 = vmul.f32 %v1266_v16, %v1266_v16 }
 0x11f   : > { %v1211_v29 = vsel %vm1199_vm10, %v1194_v32, %v1075_v21  ;;  %v623_v63 = vpop.permute.xlu1 %622 }
 0x120   : > { %1626 = vmatmul.msk.bf16.gmra.mxu2 %vm1236_vm11, %v1211_v29 }
 0x125   : > { %v1268_v31 = vpop.f32.mrf.mxu0  ;;  %v567_v30 = vpop.permute.xlu0 %566 }
 0x126   : > { %1307 = vst [vmem:[%s2351_s26 + $0x8] sm:$0xff] %v1268_v31  ;;  %v1113_v34 = vsel %vm1097_vm4, %v1096_v11, %v567_v30  ;;  %v1322_v42 = vadd.f32 %v1268_v31, %v1266_v16  ;;  %v1344_v43 = vmul.f32 %v1268_v31, %v1268_v31 }
 0x127   : > { %v1130_v36 = vsel %vm1114_vm5, %v1113_v34, %v623_v63  ;;  %v879_v39 = vpop.permute.xlu1 %878 }
 0x128   : > { %v1147_v28 = vsel %vm1131_vm6, %v1130_v36, %v759_v35  ;;  %v1359_v33 = vadd.f32 %v1344_v43, %v1343_v44 }
 0x12d   : > { %v823_v37 = vpop.permute.xlu0 %822 }
 0x12e   : > { %v1164_v38 = vsel %vm1148_vm7, %v1147_v28, %v823_v37 }
 0x12f   : > { %v1181_v59 = vsel %vm1165_vm8, %v1164_v38, %v879_v39 }
 0x130   : > { %v1198_v26 = vsel %vm1182_vm9, %v1181_v59, %v1015_v41 }
 0x135   : > { %v1079_v46 = vpop.permute.xlu0 %1078 }
 0x136   : > { %v1215_v48 = vsel %vm1199_vm10, %v1198_v26, %v1079_v46 }
 0x137   : > { %1628 = vmatmul.msk.bf16.gmra.mxu3 %vm1236_vm11, %v1215_v48 }
 0x144   : > { %v1276_v45 = vpop.f32.mrf.mxu1 }
 0x145   : > { %1310 = vst [vmem:[%s2351_s26 + $0x20] sm:$0xff] %v1276_v45  ;;  %v1347_v2 = vmul.f32 %v1276_v45, %v1276_v45 }
 0x14c   : > { %v1278_v49 = vpop.f32.mrf.mxu1  ;;  %v1286_v50 = vpop.f32.mrf.mxu2 }
 0x14d   : > { %1311 = vst [vmem:[%s2351_s26 + $0x28] sm:$0xff] %v1278_v49  ;;  %v1348_v5 = vmul.f32 %v1278_v49, %v1278_v49  ;;  %v1351_v20 = vmul.f32 %v1286_v50, %v1286_v50 }
 0x14e   : > { %1314 = vst [vmem:[%s2351_s26 + $0x40] sm:$0xff] %v1286_v50 }
 0x154   : > { %v1288_v52 = vpop.f32.mrf.mxu2 }
 0x155   : > { %1315 = vst [vmem:[%s2351_s26 + $0x48] sm:$0xff] %v1288_v52  ;;  %v1352_v19 = vmul.f32 %v1288_v52, %v1288_v52 }
 0x166   : > { %v1271_v54 = vpop.f32.mrf.mxu0 }
 0x167   : > { %1308 = vst [vmem:[%s2351_s26 + $0x10] sm:$0xff] %v1271_v54  ;;  %v1323_v55 = vadd.f32 %v1322_v42, %v1271_v54  ;;  %v1345_v56 = vmul.f32 %v1271_v54, %v1271_v54 }
 0x169   : > { %v1360_v58 = vadd.f32 %v1359_v33, %v1345_v56 }
 0x16e   : > { %v1273_v57 = vpop.f32.mrf.mxu0 }
 0x16f   : > { %1309 = vst [vmem:[%s2351_s26 + $0x18] sm:$0xff] %v1273_v57  ;;  %v1324_v47 = vadd.f32 %v1323_v55, %v1273_v57  ;;  %v1346_v4 = vmul.f32 %v1273_v57, %v1273_v57 }
 0x171   : > { %v1325_v60 = vadd.f32 %v1324_v47, %v1276_v45  ;;  %v1361_v61 = vadd.f32 %v1360_v58, %v1346_v4 }
 0x173   : > { %v1362_v62 = vadd.f32 %v1361_v61, %v1347_v2  ;;  %v1326_v6 = vadd.f32 %v1325_v60, %v1278_v49 }
 0x175   : > { %v1363_v13 = vadd.f32 %v1362_v62, %v1348_v5 }
 0x17b   : > { %v1296_v3 = vpop.f32.mrf.mxu3 }
 0x17c   : > { %1318 = vst [vmem:[%s2351_s26 + $0x60] sm:$0xff] %v1296_v3  ;;  %v1355_v32 = vmul.f32 %v1296_v3, %v1296_v3 }
 0x183   : > { %v1298_v17 = vpop.f32.mrf.mxu3 }
 0x184   : > { %1319 = vst [vmem:[%s2351_s26 + $0x68] sm:$0xff] %v1298_v17  ;;  %v1356_v31 = vmul.f32 %v1298_v17, %v1298_v17 }
 0x195   : > { %v1281_v1 = vpop.f32.mrf.mxu1 }
 0x196   : > { %1312 = vst [vmem:[%s2351_s26 + $0x30] sm:$0xff] %v1281_v1  ;;  %v1349_v9 = vmul.f32 %v1281_v1, %v1281_v1  ;;  %v1327_v12 = vadd.f32 %v1326_v6, %v1281_v1 }
 0x198   : > { %v1364_v51 = vadd.f32 %v1363_v13, %v1349_v9 }
 0x19d   : > { %v1283_v0 = vpop.f32.mrf.mxu1 }
 0x19e   : > { %1313 = vst [vmem:[%s2351_s26 + $0x38] sm:$0xff] %v1283_v0  ;;  %v1328_v14 = vadd.f32 %v1327_v12, %v1283_v0  ;;  %v1350_v15 = vmul.f32 %v1283_v0, %v1283_v0 }
 0x1a0   : > { %v1365_v18 = vadd.f32 %v1364_v51, %v1350_v15  ;;  %v1329_v40 = vadd.f32 %v1328_v14, %v1286_v50 }
 0x1a2   : > { %v1366_v7 = vadd.f32 %v1365_v18, %v1351_v20  ;;  %v1330_v8 = vadd.f32 %v1329_v40, %v1288_v52 }
 0x1a3   : > { %v1291_v23 = vpop.f32.mrf.mxu2 }
 0x1a4   : > { %1316 = vst [vmem:[%s2351_s26 + $0x50] sm:$0xff] %v1291_v23  ;;  %v1353_v10 = vmul.f32 %v1291_v23, %v1291_v23  ;;  %v1367_v53 = vadd.f32 %v1366_v7, %v1352_v19  ;;  %v1331_v21 = vadd.f32 %v1330_v8, %v1291_v23 }
 0x1a6   : > { %v1368_v24 = vadd.f32 %v1367_v53, %v1353_v10 }
 0x1ab   : > { %v1293_v22 = vpop.f32.mrf.mxu2 }
 0x1ac   : > { %1317 = vst [vmem:[%s2351_s26 + $0x58] sm:$0xff] %v1293_v22  ;;  %v1332_v16 = vadd.f32 %v1331_v21, %v1293_v22  ;;  %v1354_v25 = vmul.f32 %v1293_v22, %v1293_v22 }
 0x1ae   : > { %v1333_v27 = vadd.f32 %v1332_v16, %v1296_v3  ;;  %v1369_v29 = vadd.f32 %v1368_v24, %v1354_v25 }
 0x1b0   : > { %v1370_v63 = vadd.f32 %v1369_v29, %v1355_v32  ;;  %v1334_v30 = vadd.f32 %v1333_v27, %v1298_v17 }
 0x1b2   : > { %v1371_v36 = vadd.f32 %v1370_v63, %v1356_v31 }
 0x1ba   : > { %v1301_v11 = vpop.f32.mrf.mxu3 }
 0x1bb   : > { %1320 = vst [vmem:[%s2351_s26 + $0x70] sm:$0xff] %v1301_v11  ;;  %v1357_v34 = vmul.f32 %v1301_v11, %v1301_v11  ;;  %v1335_v35 = vadd.f32 %v1334_v30, %v1301_v11 }
 0x1bd   : > { %v1372_v28 = vadd.f32 %v1371_v36, %v1357_v34 }
 0x1c2   : > { %v1303_v37 = vpop.f32.mrf.mxu3 }
 0x1c3   : > { %1321 = vst [vmem:[%s2351_s26 + $0x78] sm:$0xff] %v1303_v37  ;;  %v1336_v38 = vadd.f32 %v1335_v35, %v1303_v37  ;;  %v1358_v39 = vmul.f32 %v1303_v37, %v1303_v37 }
 0x1c5   : > { %v1337_v59 = vrot.slane %v1336_v38, 4  ;;  %v1373_v41 = vadd.f32 %v1372_v28, %v1358_v39 }
 0x1c7   : > { %v1338_v26 = vadd.f32 %v1337_v59, %v1336_v38  ;;  %v1374_v46 = vrot.slane %v1373_v41, 4 }
 0x1c9   : > { %v1339_v48 = vrot.slane %v1338_v26, 2  ;;  %v1375_v45 = vadd.f32 %v1374_v46, %v1373_v41 }
 0x1cb   : > { %v1340_v49 = vadd.f32 %v1339_v48, %v1338_v26  ;;  %v1376_v50 = vrot.slane %v1375_v45, 2 }
 0x1cd   : > { %v1341_v52 = vrot.slane %v1340_v49, 1  ;;  %v1377_v42 = vadd.f32 %v1376_v50, %v1375_v45 }
 0x1cf   : > { %v1378_v54 = vrot.slane %v1377_v42, 1  ;;  %v1342_v55 = vadd.f32 %v1341_v52, %v1340_v49 }
 0x1d1   : > { %v1379_v43 = vadd.f32 %v1378_v54, %v1377_v42 }
 0x1d3   : > { %v1381_v44 = vsel %vm1380_vm12, %v1342_v55, %v1379_v43 }
 0x1d4   : > { %1382 = vst [vmem:[%s216_s5] sm:$0x3] %v1381_v44 }
 0x1d5 PF: > { %s14_s16 = sadd.s32 1, %s1862_s16   ;;  %s2409_s12 = smov %s1854_s14 }
 0x1d6   : > { %p11_p8 = scmp.ge.s32.totalorder %s14_s16, 6   ;;  %s2410_s13 = smov %s1858_s15 }
 0x1d7   : > { %s2411_s14 = smov %s2414_s17  ;;  %s2412_s15 = smov %s2418_s18 }
 0x1d8   :  { %13 = sbr.rel (!%p11_p8) target bundleno = 3 (0x3), region = 73 }

// kernel: double_conv.6
= control target key start
LH: loop header
LB: loop body
LE: loop exit
PB: predicated region body
PF: predicated region fallthrough
CT: control target
= control target key end

     0   :  { %s2966_s12 = smov 0   ;;  %s2968_s13 = smov 0   ;;  %s3626_s0 = inlined_call_operand.vmem [shape: bf16[2,18,18,128], index: 0, kind: input, shape index: {}]   ;;  %s3627_s1 = inlined_call_operand.vmem [shape: bf16[1152,128], index: 1, kind: input, shape index: {}]   ;;  %s3628_s2 = inlined_call_operand.vmem [shape: f32[2,16,16,128], index: 2, kind: output, shape index: {0}]   ;;  %s3629_s3 = inlined_call_operand.vmem [shape: f32[2,2,2,128], index: 3, kind: output, shape index: {1}]  }
   0x1   :  { %s2970_s14 = smov 0   ;;  %s2972_s15 = smov 0  }
   0x2   :  { %s2974_s16 = smov 0  }
   0x3 LB: > { %s23_s17 = sadd.s32 1, %s2936_s14  ;;  %s26_s18 = sadd.s32 1, %s2940_s15  ;;  %s2944_s16 = sphi %s2974_s16, %s14_s16   ;;  %s2940_s15 = sphi %s2972_s15, %s3633_s15   ;;  %s2936_s14 = sphi %s2970_s14, %s3632_s14   ;;  %s2932_s13 = sphi %s2968_s13, %s3631_s13   ;;  %s2928_s12 = sphi %s2966_s12, %s3630_s12  }
   0x4   : > { %p24_p0 = scmp.ge.s32.totalorder %s23_s17, 2  ;;  %p2268_p1 = scmp.ge.s32.totalorder %s2944_s16, 1 }
   0x5   : > { %p156_p2 = scmp.lt.s32.totalorder %s2944_s16, 5 }
   0x6   : > { %s3635_s17 = smov (%p24_p0, %s23_s17), 0  ;;  %s3637_s18 = smov (!%p24_p0, %s26_s18), %s2940_s15 }
   0x7   : > { %p157_p3 = pnand %p2268_p1, %p156_p2  ;;  %p28_p4 = scmp.ge.s32.totalorder %s3637_s18, 2 }
   0x8   : > { %p193_p5 = scmp.lt.s32.totalorder (!%p157_p3), %s2932_s13, 1  ;;  %s2637_s7 = smul.u32 (!%p157_p3), 96, %s2928_s12 }
   0x9   : > { %s3639_s18 = smov (%p28_p4, %s3637_s18), 0  ;;  %160 = sbr.rel (%p157_p3) target bundleno = 482 (0x1e2), region = 28 }
   0xa   : > { %p211_p7 = scmp.lt.s32.totalorder (!%p157_p3), %s2928_s12, 1 }
   0xe   : > { %v2645_v0 = vld [vmem:[%s3627_s1 + $0x38] sm:$0xff]  ;;  %v2644_v1 = vld [vmem:[%s3627_s1 + $0x30] sm:$0xff]  ;;  %v2643_v2 = vld [vmem:[%s3627_s1 + $0x28] sm:$0xff]  ;;  %s3641_s13 = smov (!%p193_p5, %s2932_s13), 1  ;;  %vm397_vm0 = vsmask.f32 7424 }
   0xf   : > { %2805 = vmatpush.bf16.msra.mxu1 %v2645_v0  ;;  %2806 = vmatpush.bf16.msra.mxu2 %v2645_v0  ;;  %v2642_v3 = vld [vmem:[%s3627_s1 + $0x20] sm:$0xff]  ;;  %v2641_v4 = vld [vmem:[%s3627_s1 + $0x18] sm:$0xff]  ;;  %v2640_v5 = vld [vmem:[%s3627_s1 + $0x10] sm:$0xff]  ;;  %s2829_s4 = smul.u32 216, %s3641_s13  ;;  %vm526_vm1 = vcmask 1046528   ;;  %s2272_s9 = sshll.u32 %s3641_s13, 5 }
  0x10   : > { %2807 = vmatpush.bf16.msra.mxu3 %v2645_v0  ;;  %1599 = vmatpush.bf16.msra.mxu0 %v2645_v0  ;;  %v2639_v6 = vld [vmem:[%s3627_s1 + $0x8] sm:$0xff]  ;;  %v2638_v7 = vld [vmem:[%s3627_s1] sm:$0xff]  ;;  %v2661_v8 = vld [vmem:[%s3627_s1 + $0xb8] sm:$0xff]  ;;  %s2274_s23 = sshll.u32 %s3641_s13, 1  ;;  %vm2114_vm2 = vcmask 1040384  }
  0x11   : > { %s197_s10 = scalar_lea.vmem %s3626_s0, %s2829_s4  ;;  %v2653_v9 = vld [vmem:[%s3627_s1 + $0x78] sm:$0xff]  ;;  %v2660_v16 = vld [vmem:[%s3627_s1 + $0xb0] sm:$0xff]  ;;  %v2659_v20 = vld [vmem:[%s3627_s1 + $0xa8] sm:$0xff] }
  0x12   : > { %s3033_s20 = scalar_lea.vmem %s197_s10, %s2637_s7  ;;  %v2669_v12 = vld [vmem:[%s3627_s1 + $0xf8] sm:$0xff]  ;;  %v2652_v17 = vld [vmem:[%s3627_s1 + $0x70] sm:$0xff]  ;;  %v2651_v21 = vld [vmem:[%s3627_s1 + $0x68] sm:$0xff] }
  0x13   : > { %2808 = vmatpush.bf16.msra.mxu1 %v2644_v1  ;;  %2809 = vmatpush.bf16.msra.mxu2 %v2644_v1  ;;  %v3042_v10 = vld [vmem:[%s3033_s20 + $0x18] sm:$0xff]   ;;  %v3045_v11 = vld [vmem:[%s3033_s20 + $0x30] sm:$0xff]   ;;  %v3051_v13 = vld [vmem:[%s3033_s20 + $0x48] sm:$0xff]  }
  0x14   : > { %2810 = vmatpush.bf16.msra.mxu3 %v2644_v1  ;;  %1600 = vmatpush.bf16.msra.mxu0 %v2644_v1  ;;  %v3054_v14 = vld [vmem:[%s3033_s20] sm:$0xff]   ;;  %v2677_v15 = vld [vmem:[%s3627_s1 + $0x138] sm:$0xff]  ;;  %v2668_v18 = vld [vmem:[%s3627_s1 + $0xf0] sm:$0xff] }
  0x15   : > { %v2676_v19 = vld [vmem:[%s3627_s1 + $0x130] sm:$0xff]  ;;  %v2667_v22 = vld [vmem:[%s3627_s1 + $0xe8] sm:$0xff]  ;;  %v3091_v25 = vld [vmem:[%s3033_s20 + $0x3c] sm:$0xff]   ;;  %v401_v48 = vshll.u32 %v3054_v14, 16  ;;  %v399_v58 = vshrl.u32 %v3054_v14, 16 }
  0x16   : > { %v3085_v23 = vld [vmem:[%s3033_s20 + $0x24] sm:$0xff]   ;;  %v3094_v26 = vld [vmem:[%s3033_s20 + $0x3c] sm:$0xf0]  ;;  %v3100_v28 = vld [vmem:[%s3033_s20 + $0x54] sm:$0xff]  }
  0x17   : > { %2811 = vmatpush.bf16.msra.mxu1 %v2643_v2  ;;  %2812 = vmatpush.bf16.msra.mxu2 %v2643_v2  ;;  %v3088_v24 = vld [vmem:[%s3033_s20 + $0x24] sm:$0xf0]  ;;  %v3103_v29 = vld [vmem:[%s3033_s20 + $0x54] sm:$0xf0]  ;;  %v3106_v30 = vld [vmem:[%s3033_s20 + $0xc] sm:$0xff]   ;;  %v403_v59 = vrot.slane %v401_v48, 1 }
  0x18   : > { %2813 = vmatpush.bf16.msra.mxu3 %v2643_v2  ;;  %1601 = vmatpush.bf16.msra.mxu0 %v2643_v2  ;;  %v2675_v27 = vld [vmem:[%s3627_s1 + $0x128] sm:$0xff]  ;;  %v3109_v31 = vld [vmem:[%s3033_s20 + $0xc] sm:$0xf0]  ;;  %v2658_v32 = vld [vmem:[%s3627_s1 + $0xa0] sm:$0xff] }
  0x19   : > { %v2650_v33 = vld [vmem:[%s3627_s1 + $0x60] sm:$0xff]  ;;  %v3118_v34 = vld [vmem:[%s3033_s20 + $0xc] sm:$0xff]   ;;  %v237_v38 = vld [vmem:[%s3033_s20 + $0x8] sm:$0x1] }
  0x1a   : > { %v3121_v35 = vld [vmem:[%s3033_s20 + $0xc] sm:$0xf0]  ;;  %v2666_v36 = vld [vmem:[%s3627_s1 + $0xe0] sm:$0xff]  ;;  %v2657_v39 = vld [vmem:[%s3627_s1 + $0x98] sm:$0xff]  ;;  %v381_v42 = vunpack.c.l.b16 %v237_v38  ;;  %v634_v54 = vshll.u32 %v3118_v34, 16  ;;  %v632_v0 = vshrl.u32 %v3118_v34, 16 }
  0x1b   : > { %2814 = vmatpush.bf16.msra.mxu1 %v2642_v3  ;;  %2815 = vmatpush.bf16.msra.mxu2 %v2642_v3  ;;  %v2674_v37 = vld [vmem:[%s3627_s1 + $0x120] sm:$0xff]  ;;  %v2649_v40 = vld [vmem:[%s3627_s1 + $0x58] sm:$0xff]  ;;  %v2297_v41 = vld [vmem:[%s3033_s20 + $0x14] sm:$0x1] }
  0x1c   : > { %2816 = vmatpush.bf16.msra.mxu3 %v2642_v3  ;;  %1602 = vmatpush.bf16.msra.mxu0 %v2642_v3  ;;  %v2665_v43 = vld [vmem:[%s3627_s1 + $0xd8] sm:$0xff]  ;;  %v615_v45 = vunpack.c.l.b16 %v2297_v41  ;;  %v2656_v46 = vld [vmem:[%s3627_s1 + $0x90] sm:$0xff]  ;;  %v389_v50 = vpack.c.b16 %v381_v42, %v381_v42  ;;  %v2769_v52 = vld [vmem:[%s3033_s20] sm:$0xf0]  ;;  %v636_v1 = vrot.slane %v634_v54, 1 }
  0x1d   : > { %v2673_v44 = vld [vmem:[%s3627_s1 + $0x118] sm:$0xff]  ;;  %v2648_v47 = vld [vmem:[%s3627_s1 + $0x50] sm:$0xff]  ;;  %v2770_v53 = vld [vmem:[%s3033_s20] sm:$0xe] }
  0x1e   : > { %v2664_v49 = vld [vmem:[%s3627_s1 + $0xd0] sm:$0xff]  ;;  %v3163_v55 = vpack.c.b16 %v615_v45, %v615_v45  ;;  %v2655_v56 = vld [vmem:[%s3627_s1 + $0x88] sm:$0xff]  ;;  %v406_v60 = vshll.u32 %v389_v50, 16  ;;  %v2771_v61 = vor.u32 %v2770_v53, %v2769_v52  ;;  %v2654_v3 = vld [vmem:[%s3627_s1 + $0x80] sm:$0xff]  ;;  %v423_v53 = vshrl.u32 %v3042_v10, 16 }
  0x1f   : > { %2817 = vmatpush.bf16.msra.mxu1 %v2641_v4  ;;  %2818 = vmatpush.bf16.msra.mxu2 %v2641_v4  ;;  %v2672_v51 = vld [vmem:[%s3627_s1 + $0x110] sm:$0xff]  ;;  %v2647_v57 = vld [vmem:[%s3627_s1 + $0x48] sm:$0xff] }
  0x20   : > { %2819 = vmatpush.bf16.msra.mxu3 %v2641_v4  ;;  %1603 = vmatpush.bf16.msra.mxu0 %v2641_v4  ;;  %v2663_v62 = vld [vmem:[%s3627_s1 + $0xc8] sm:$0xff]  ;;  %v639_v2 = vshll.u32 %v3163_v55, 16  ;;  %v2646_v4 = vld [vmem:[%s3627_s1 + $0x40] sm:$0xff]  ;;  %v2708_v41 = vld [vmem:[%s3627_s1 + $0x230] sm:$0xff] }
  0x21   : > { %v2671_v63 = vld [vmem:[%s3627_s1 + $0x108] sm:$0xff] }
  0x22   : > { %v2707_v48 = vld [vmem:[%s3627_s1 + $0x228] sm:$0xff] }
  0x23   : > { %2820 = vmatpush.bf16.msra.mxu1 %v2640_v5  ;;  %2821 = vmatpush.bf16.msra.mxu2 %v2640_v5 }
  0x24   : > { %2822 = vmatpush.bf16.msra.mxu3 %v2640_v5  ;;  %1604 = vmatpush.bf16.msra.mxu0 %v2640_v5  ;;  %v2693_v5 = vld [vmem:[%s3627_s1 + $0x1b8] sm:$0xff] }
  0x27   : > { %2823 = vmatpush.bf16.msra.mxu1 %v2639_v6  ;;  %2824 = vmatpush.bf16.msra.mxu2 %v2639_v6 }
  0x28   : > { %2825 = vmatpush.bf16.msra.mxu3 %v2639_v6  ;;  %1605 = vmatpush.bf16.msra.mxu0 %v2639_v6  ;;  %v2685_v6 = vld [vmem:[%s3627_s1 + $0x178] sm:$0xff] }
  0x2b   : > { %2826 = vmatpush.bf16.msra.mxu1 %v2638_v7  ;;  %2827 = vmatpush.bf16.msra.mxu2 %v2638_v7 }
  0x2c   : > { %2828 = vmatpush.bf16.msra.mxu3 %v2638_v7  ;;  %1606 = vmatpush.bf16.msra.mxu0 %v2638_v7  ;;  %v404_v7 = vor.u32 %v403_v59, %v399_v58  ;;  %v3245_v58 = vld [vmem:[%s3033_s20 + $0x24] sm:$0xf0] }
  0x2e   : > { %1617 = vmatmul.bf16.vlgmr.msra.gmra.mxu1 %v3042_v10  ;;  %1627 = vmatmul.bf16.vlgmr.msra.gmra.mxu2 %v3045_v11 }
  0x2f   : > { %1697 = vmatpush.bf16.msrb.mxu2 %v2661_v8  ;;  %1648 = vmatpush.bf16.msrb.mxu1 %v2653_v9  ;;  %v2662_v8 = vld [vmem:[%s3627_s1 + $0xc0] sm:$0xff] }
  0x30   : > { %1637 = vmatmul.bf16.vlgmr.msra.gmra.mxu3 %v3051_v13  ;;  %1607 = vmatmul.bf16.vlgmr.msra.gmra.mxu0 %v3054_v14  ;;  %v2670_v9 = vld [vmem:[%s3627_s1 + $0x100] sm:$0xff]  ;;  %v527_v14 = vrot.slane %v2771_v61, 1 }
  0x31   : > { %1746 = vmatpush.bf16.msrb.mxu3 %v2669_v12  ;;  %1795 = vmatpush.bf16.msrb.mxu0 %v2677_v15  ;;  %v408_v12 = vrot.slane %v406_v60, 1  ;;  %v528_v15 = vrot.slane %v389_v50, 1 }
  0x33   : > { %1698 = vmatpush.bf16.msrb.mxu2 %v2660_v16  ;;  %1649 = vmatpush.bf16.msrb.mxu1 %v2652_v17  ;;  %v637_v16 = vor.u32 %v636_v1, %v632_v0  ;;  %v641_v17 = vrot.slane %v639_v2, 1  ;;  %v2299_v0 = vld [vmem:[%s3033_s20 + $0x2c] sm:$0x1] }
  0x35   : > { %1747 = vmatpush.bf16.msrb.mxu3 %v2668_v18  ;;  %1796 = vmatpush.bf16.msrb.mxu0 %v2676_v19  ;;  %v238_v18 = vld [vmem:[%s3033_s20 + $0x14] sm:$0x1]  ;;  %v2701_v19 = vld [vmem:[%s3627_s1 + $0x1f8] sm:$0xff] }
  0x37   : > { %1699 = vmatpush.bf16.msrb.mxu2 %v2659_v20  ;;  %1650 = vmatpush.bf16.msrb.mxu1 %v2651_v21  ;;  %v2709_v20 = vld [vmem:[%s3627_s1 + $0x238] sm:$0xff]  ;;  %v2298_v21 = vld [vmem:[%s3033_s20 + $0x20] sm:$0x1] }
  0x38   : > { %v616_v38 = vunpack.c.l.b16 %v2298_v21 }
  0x39   : > { %1748 = vmatpush.bf16.msrb.mxu3 %v2667_v22  ;;  %1797 = vmatpush.bf16.msrb.mxu0 %v2675_v27  ;;  %v409_v22 = vsel %vm397_vm0, %v404_v7, %v408_v12  ;;  %v529_v27 = vsel %vm526_vm1, %v527_v14, %v528_v15  ;;  %v2690_v7 = vld [vmem:[%s3627_s1 + $0x1a0] sm:$0xff]  ;;  %v2772_v12 = vld [vmem:[%s3033_s20 + $0x18] sm:$0xf0]  ;;  %v2773_v14 = vld [vmem:[%s3033_s20 + $0x18] sm:$0xe] }
  0x3a   : > { %v3225_v45 = vpack.c.b16 %v616_v38, %v616_v38  ;;  %v2300_v38 = vld [vmem:[%s3033_s20 + $0x38] sm:$0x1] }
  0x3b   : > { %1700 = vmatpush.bf16.msrb.mxu2 %v2658_v32  ;;  %1651 = vmatpush.bf16.msrb.mxu1 %v2650_v33  ;;  %v382_v32 = vunpack.c.l.b16 %v238_v18  ;;  %v642_v33 = vsel %vm397_vm0, %v637_v16, %v641_v17  ;;  %v2774_v18 = vor.u32 %v2773_v14, %v2772_v12  ;;  %v2688_v12 = vld [vmem:[%s3627_s1 + $0x190] sm:$0xff] }
  0x3c   : > { %v2696_v14 = vld [vmem:[%s3627_s1 + $0x1d0] sm:$0xff] }
  0x3d   : > { %1749 = vmatpush.bf16.msrb.mxu3 %v2666_v36  ;;  %1798 = vmatpush.bf16.msrb.mxu0 %v2674_v37  ;;  %v2871_v36 = vld [vmem:[%s3033_s20 + $0xc] sm:$0xe]  ;;  %v2692_v37 = vld [vmem:[%s3627_s1 + $0x1b0] sm:$0xff]  ;;  %v390_v42 = vpack.c.b16 %v382_v32, %v382_v32 }
  0x3e   : > { %1622 = vmatmul.bf16.gmra.mxu1 %v3085_v23  ;;  %1632 = vmatmul.bf16.gmra.mxu2 %v3091_v25  ;;  %v2872_v52 = vor.u32 %v2871_v36, %v3109_v31 }
  0x3f   : > { %1701 = vmatpush.bf16.msrb.mxu2 %v2657_v39  ;;  %1652 = vmatpush.bf16.msrb.mxu1 %v2649_v40  ;;  %v2684_v39 = vld [vmem:[%s3627_s1 + $0x170] sm:$0xff]  ;;  %v531_v61 = vrot.slane %v390_v42, 1 }
  0x40   : > { %1642 = vmatmul.bf16.gmra.mxu3 %v3100_v28  ;;  %1612 = vmatmul.bf16.gmra.mxu0 %v3106_v30  ;;  %v2700_v40 = vld [vmem:[%s3627_s1 + $0x1f0] sm:$0xff]  ;;  %v530_v60 = vrot.slane %v2872_v52, 1  ;;  %v2705_v52 = vld [vmem:[%s3627_s1 + $0x218] sm:$0xff] }
  0x41   : > { %1750 = vmatpush.bf16.msrb.mxu3 %v2665_v43  ;;  %1799 = vmatpush.bf16.msrb.mxu0 %v2673_v44  ;;  %v413_v43 = vshll.u32 %v3106_v30, 16  ;;  %v425_v44 = vshll.u32 %v3042_v10, 16 }
  0x42   : > { %v532_v2 = vsel %vm526_vm1, %v530_v60, %v531_v61  ;;  %v2289_v61 = vld [vmem:[%s3033_s20 + $0x3c] sm:$0xff]  }
  0x43   : > { %1702 = vmatpush.bf16.msrb.mxu2 %v2656_v46  ;;  %1653 = vmatpush.bf16.msrb.mxu1 %v2648_v47  ;;  %v2691_v46 = vld [vmem:[%s3627_s1 + $0x1a8] sm:$0xff]  ;;  %v415_v50 = vrot.slane %v413_v43, 1  ;;  %v427_v54 = vrot.slane %v425_v44, 1  ;;  %v2874_v43 = vld [vmem:[%s3033_s20 + $0x24] sm:$0xe]  ;;  %v618_v44 = vunpack.c.l.b16 %v2300_v38 }
  0x44   : > { %v2699_v47 = vld [vmem:[%s3627_s1 + $0x1e8] sm:$0xff] }
  0x45   : > { %1751 = vmatpush.bf16.msrb.mxu3 %v2664_v49  ;;  %1800 = vmatpush.bf16.msrb.mxu0 %v2672_v51  ;;  %v411_v49 = vshrl.u32 %v3106_v30, 16  ;;  %v418_v51 = vshll.u32 %v390_v42, 16 }
  0x47   : > { %1703 = vmatpush.bf16.msrb.mxu2 %v2655_v56  ;;  %1654 = vmatpush.bf16.msrb.mxu1 %v2647_v57  ;;  %v651_v56 = vshll.u32 %v3225_v45, 16  ;;  %v2285_v57 = vld [vmem:[%s3033_s20 + $0x24] sm:$0xff]   ;;  %v416_v59 = vor.u32 %v415_v50, %v411_v49  ;;  %v420_v30 = vrot.slane %v418_v51, 1  ;;  %v2681_v49 = vld [vmem:[%s3627_s1 + $0x158] sm:$0xff]  ;;  %v449_v50 = vshll.u32 %v3045_v11, 16 }
  0x48   : > { %v658_v16 = vshll.u32 %v2285_v57, 16  ;;  %v3287_v51 = vpack.c.b16 %v618_v44, %v618_v44 }
  0x49   : > { %1752 = vmatpush.bf16.msrb.mxu3 %v2663_v62  ;;  %1801 = vmatpush.bf16.msrb.mxu0 %v2671_v63  ;;  %v649_v62 = vor.u32 %v427_v54, %v423_v53  ;;  %v653_v31 = vrot.slane %v651_v56, 1  ;;  %v239_v63 = vld [vmem:[%s3033_s20 + $0x20] sm:$0x1]  ;;  %v421_v1 = vsel %vm397_vm0, %v416_v59, %v420_v30  ;;  %v435_v53 = vshrl.u32 %v3085_v23, 16 }
  0x4a   : > { %v447_v59 = vshrl.u32 %v3045_v11, 16  ;;  %v451_v30 = vrot.slane %v449_v50, 1  ;;  %v675_v60 = vshll.u32 %v3287_v51, 16  ;;  %v2687_v50 = vld [vmem:[%s3627_s1 + $0x188] sm:$0xff] }
  0x4b   : > { %1704 = vmatpush.bf16.msrb.mxu2 %v2654_v3  ;;  %1655 = vmatpush.bf16.msrb.mxu1 %v2646_v4  ;;  %v383_v3 = vunpack.c.l.b16 %v239_v63  ;;  %v654_v4 = vsel %vm397_vm0, %v649_v62, %v653_v31 }
  0x4d   : > { %1753 = vmatpush.bf16.msrb.mxu3 %v2662_v8  ;;  %1802 = vmatpush.bf16.msrb.mxu0 %v2670_v9  ;;  %v2698_v8 = vld [vmem:[%s3627_s1 + $0x1e0] sm:$0xff] }
  0x4e   : > { %1656 = vmatmul.bf16.vlgmr.msrb.gmra.mxu1 %v409_v22  ;;  %1705 = vmatmul.bf16.vlgmr.msrb.gmra.mxu2 %v529_v27  ;;  %v2682_v9 = vld [vmem:[%s3627_s1 + $0x160] sm:$0xff]  ;;  %v533_v27 = vrot.slane %v2774_v18, 1 }
  0x4f   : > { %1893 = vmatpush.bf16.msra.mxu2 %v2693_v5  ;;  %1844 = vmatpush.bf16.msra.mxu1 %v2685_v6  ;;  %v617_v5 = vunpack.c.l.b16 %v2299_v0  ;;  %v391_v6 = vpack.c.b16 %v383_v3, %v383_v3  ;;  %v677_v3 = vrot.slane %v675_v60, 1 }
  0x50   : > { %1754 = vmatmul.bf16.vlgmr.msrb.gmra.mxu3 %v3118_v34  ;;  %1803 = vmatmul.bf16.vlgmr.msrb.gmra.mxu0 %v642_v33  ;;  %v2683_v34 = vld [vmem:[%s3627_s1 + $0x168] sm:$0xff] }
  0x51   : > { %1942 = vmatpush.bf16.msra.mxu3 %v2701_v19  ;;  %1991 = vmatpush.bf16.msra.mxu0 %v2709_v20  ;;  %v3264_v15 = vpack.c.b16 %v617_v5, %v617_v5  ;;  %v430_v17 = vshll.u32 %v391_v6, 16  ;;  %v656_v19 = vshrl.u32 %v2285_v57, 16  ;;  %v660_v20 = vrot.slane %v658_v16, 1  ;;  %v2680_v16 = vld [vmem:[%s3627_s1 + $0x150] sm:$0xff] }
  0x52   : > { %v534_v32 = vrot.slane %v391_v6, 1 }
  0x53   : > { %1894 = vmatpush.bf16.msra.mxu2 %v2692_v37  ;;  %1845 = vmatpush.bf16.msra.mxu1 %v2684_v39  ;;  %v663_v21 = vshll.u32 %v3264_v15, 16  ;;  %v432_v22 = vrot.slane %v430_v17, 1  ;;  %v661_v33 = vor.u32 %v660_v20, %v656_v19  ;;  %v240_v37 = vld [vmem:[%s3033_s20 + $0x2c] sm:$0x1]  ;;  %v2776_v17 = vld [vmem:[%s3033_s20 + $0x30] sm:$0xe] }
  0x54   : > { %v682_v19 = vshll.u32 %v2289_v61, 16 }
  0x55   : > { %1943 = vmatpush.bf16.msra.mxu3 %v2700_v40  ;;  %1992 = vmatpush.bf16.msra.mxu0 %v2708_v41  ;;  %v665_v36 = vrot.slane %v663_v21, 1  ;;  %v433_v39 = vsel %vm397_vm0, %v649_v62, %v432_v22  ;;  %v535_v40 = vsel %vm526_vm1, %v533_v27, %v534_v32  ;;  %v384_v41 = vunpack.c.l.b16 %v240_v37  ;;  %v3298_v62 = vld [vmem:[%s3033_s20 + $0x3c] sm:$0xf0] }
  0x56   : > { %v680_v22 = vshrl.u32 %v2289_v61, 16  ;;  %v684_v27 = vrot.slane %v682_v19, 1  ;;  %v2778_v19 = vld [vmem:[%s3033_s20 + $0x48] sm:$0xf0] }
  0x57   : > { %1895 = vmatpush.bf16.msra.mxu2 %v2691_v46  ;;  %1846 = vmatpush.bf16.msra.mxu1 %v2683_v34  ;;  %v666_v42 = vsel %vm397_vm0, %v661_v33, %v665_v36  ;;  %v392_v46 = vpack.c.b16 %v384_v41, %v384_v41  ;;  %v437_v34 = vshll.u32 %v3085_v23, 16  ;;  %v241_v23 = vld [vmem:[%s3033_s20 + $0x38] sm:$0x1]  ;;  %v2302_v41 = vld [vmem:[%s3033_s20 + $0x50] sm:$0x1] }
  0x58   : > { %v385_v6 = vunpack.c.l.b16 %v241_v23  ;;  %v685_v38 = vor.u32 %v684_v27, %v680_v22 }
  0x59   : > { %1944 = vmatpush.bf16.msra.mxu3 %v2699_v47  ;;  %1993 = vmatpush.bf16.msra.mxu0 %v2707_v48  ;;  %v2689_v47 = vld [vmem:[%s3627_s1 + $0x198] sm:$0xff]  ;;  %v439_v54 = vrot.slane %v437_v34, 1  ;;  %v442_v56 = vshll.u32 %v392_v46, 16 }
  0x5a   : > { %v2697_v48 = vld [vmem:[%s3627_s1 + $0x1d8] sm:$0xff] }
  0x5b   : > { %1896 = vmatpush.bf16.msra.mxu2 %v2690_v7  ;;  %1847 = vmatpush.bf16.msra.mxu1 %v2682_v9  ;;  %v440_v31 = vor.u32 %v439_v54, %v435_v53  ;;  %v444_v63 = vrot.slane %v442_v56, 1  ;;  %v393_v9 = vpack.c.b16 %v385_v6, %v385_v6  ;;  %v2877_v34 = vld [vmem:[%s3033_s20 + $0x3c] sm:$0xe]  ;;  %v473_v53 = vshll.u32 %v3051_v13, 16  ;;  %v2679_v56 = vld [vmem:[%s3627_s1 + $0x148] sm:$0xff] }
  0x5c   : > { %v2878_v60 = vor.u32 %v2877_v34, %v3094_v26  ;;  %v2303_v6 = vld [vmem:[%s3033_s20 + $0x5c] sm:$0x1] }
  0x5d   : > { %1945 = vmatpush.bf16.msra.mxu3 %v2698_v8  ;;  %v454_v20 = vshll.u32 %v393_v9, 16  ;;  %v540_v37 = vrot.slane %v393_v9, 1 }
  0x5e   : > { %1661 = vmatmul.bf16.gmra.mxu1 %v421_v1  ;;  %1710 = vmatmul.bf16.gmra.mxu2 %v532_v2  ;;  %v537_v1 = vrot.slane %v392_v46, 1  ;;  %v673_v2 = vor.u32 %v451_v30, %v447_v59  ;;  %v542_v23 = vrot.slane %v2878_v60, 1 }
  0x5f   : > { %1897 = vmatpush.bf16.msra.mxu2 %v2689_v47  ;;  %1848 = vmatpush.bf16.msra.mxu1 %v2681_v49  ;;  %v456_v33 = vrot.slane %v454_v20, 1  ;;  %v620_v47 = vunpack.c.l.b16 %v2302_v41  ;;  %v461_v49 = vshll.u32 %v3091_v25, 16 }
  0x60   : > { %1759 = vmatmul.bf16.gmra.mxu3 %v3042_v10  ;;  %1808 = vmatmul.bf16.gmra.mxu0 %v654_v4  ;;  %v2706_v10 = vld [vmem:[%s3627_s1 + $0x220] sm:$0xff]  ;;  %v678_v7 = vsel %vm397_vm0, %v673_v2, %v677_v3 }
  0x61   : > { %1994 = vmatpush.bf16.msra.mxu0 %v2706_v10  ;;  %1946 = vmatpush.bf16.msra.mxu3 %v2697_v48  ;;  %v2301_v4 = vld [vmem:[%s3033_s20 + $0x44] sm:$0x1]  ;;  %v2775_v10 = vld [vmem:[%s3033_s20 + $0x30] sm:$0xf0]  ;;  %v3337_v54 = vpack.c.b16 %v620_v47, %v620_v47  ;;  %v463_v59 = vrot.slane %v461_v49, 1 }
  0x62   : > { %v619_v8 = vunpack.c.l.b16 %v2301_v4  ;;  %v2777_v21 = vor.u32 %v2776_v17, %v2775_v10  ;;  %v2686_v10 = vld [vmem:[%s3627_s1 + $0x180] sm:$0xff] }
  0x63   : > { %1898 = vmatpush.bf16.msra.mxu2 %v2688_v12  ;;  %1849 = vmatpush.bf16.msra.mxu1 %v2680_v16  ;;  %v2694_v17 = vld [vmem:[%s3627_s1 + $0x1c0] sm:$0xff] }
  0x64   : > { %v3317_v18 = vpack.c.b16 %v619_v8, %v619_v8  ;;  %v539_v36 = vrot.slane %v2777_v21, 1 }
  0x65   : > { %1995 = vmatpush.bf16.msra.mxu0 %v2705_v52  ;;  %1947 = vmatpush.bf16.msra.mxu3 %v2696_v14  ;;  %v2695_v52 = vld [vmem:[%s3627_s1 + $0x1c8] sm:$0xff]  ;;  %v621_v14 = vunpack.c.l.b16 %v2303_v6 }
  0x66   : > { %v687_v32 = vshll.u32 %v3317_v18, 16 }
  0x67   : > { %1899 = vmatpush.bf16.msra.mxu2 %v2687_v50  ;;  %1850 = vmatpush.bf16.msra.mxu1 %v2679_v56  ;;  %v3367_v20 = vpack.c.b16 %v621_v14, %v621_v14  ;;  %v3387_v56 = vld [vmem:[%s3033_s20 + $0x60] sm:$0xff]  }
  0x68   : > { %v2331_v14 = vld [vmem:[%s3033_s20 + $0x20] sm:$0x1] }
  0x69   : > { %1948 = vmatpush.bf16.msra.mxu3 %v2695_v52  ;;  %v2880_v52 = vld [vmem:[%s3033_s20 + $0x54] sm:$0xe] }
  0x6b   : > { %1900 = vmatpush.bf16.msra.mxu2 %v2686_v10 }
  0x6d   : > { %1949 = vmatpush.bf16.msra.mxu3 %v2694_v17 }
  0x6e   : > { %1666 = vmatmul.bf16.gmra.mxu1 %v433_v39  ;;  %1715 = vmatmul.bf16.gmra.mxu2 %v535_v40  ;;  %v689_v39 = vrot.slane %v687_v32, 1  ;;  %v242_v40 = vld [vmem:[%s3033_s20 + $0x44] sm:$0x1] }
  0x6f   : > { %v386_v44 = vunpack.c.l.b16 %v242_v40 }
  0x70   : > { %1764 = vmatmul.bf16.gmra.mxu3 %v2285_v57  ;;  %1813 = vmatmul.bf16.gmra.mxu0 %v666_v42  ;;  %v2875_v57 = vor.u32 %v2874_v43, %v3088_v24  ;;  %v445_v24 = vsel %vm397_vm0, %v440_v31, %v444_v63  ;;  %v457_v42 = vsel %vm397_vm0, %v673_v2, %v456_v33  ;;  %v475_v31 = vrot.slane %v473_v53, 1  ;;  %v3351_v2 = vld [vmem:[%s3033_s20 + $0x54] sm:$0xf0] }
  0x71   : > { %v541_v43 = vsel %vm526_vm1, %v539_v36, %v540_v37  ;;  %v690_v46 = vsel %vm397_vm0, %v685_v38, %v689_v39  ;;  %v394_v48 = vpack.c.b16 %v386_v44, %v386_v44  ;;  %v699_v63 = vshll.u32 %v3337_v54, 16  ;;  %v2702_v37 = vld [vmem:[%s3627_s1 + $0x200] sm:$0xff]  ;;  %v2304_v44 = vld [vmem:[%s3033_s20 + $0x68] sm:$0x1] }
  0x72   : > { %v536_v0 = vrot.slane %v2875_v57, 1  ;;  %v459_v57 = vshrl.u32 %v3091_v25, 16  ;;  %v711_v36 = vshll.u32 %v3367_v20, 16  ;;  %v622_v53 = vunpack.c.l.b16 %v2304_v44 }
  0x73   : > { %v466_v30 = vshll.u32 %v394_v48, 16  ;;  %v543_v4 = vrot.slane %v394_v48, 1 }
  0x74   : > { %v538_v5 = vsel %vm526_vm1, %v536_v0, %v537_v1  ;;  %v2703_v0 = vld [vmem:[%s3627_s1 + $0x208] sm:$0xff]  ;;  %v2293_v1 = vld [vmem:[%s3033_s20 + $0x54] sm:$0xff]   ;;  %v464_v25 = vor.u32 %v463_v59, %v459_v57  ;;  %v485_v59 = vshll.u32 %v3100_v28, 16  ;;  %v3391_v60 = vpack.c.b16 %v622_v53, %v622_v53 }
  0x75   : > { %v468_v3 = vrot.slane %v466_v30, 1  ;;  %v544_v8 = vsel %vm526_vm1, %v542_v23, %v543_v4  ;;  %v706_v21 = vshll.u32 %v2293_v1, 16  ;;  %v704_v32 = vshrl.u32 %v2293_v1, 16 }
  0x76   : > { %v718_v30 = vshll.u32 %v3387_v56, 16  ;;  %v716_v4 = vshrl.u32 %v3387_v56, 16 }
  0x77   : > { %v708_v33 = vrot.slane %v706_v21, 1 }
  0x79   : > { %v709_v41 = vor.u32 %v708_v33, %v704_v32 }
  0x7e   : > { %1671 = vmatmul.bf16.gmra.mxu1 %v445_v24  ;;  %1720 = vmatmul.bf16.gmra.mxu2 %v538_v5  ;;  %v701_v24 = vrot.slane %v699_v63, 1  ;;  %v243_v5 = vld [vmem:[%s3033_s20 + $0x50] sm:$0x1] }
  0x7f   : > { %v387_v9 = vunpack.c.l.b16 %v243_v5 }
  0x80   : > { %1769 = vmatmul.bf16.gmra.mxu3 %v3045_v11  ;;  %1818 = vmatmul.bf16.gmra.mxu0 %v678_v7  ;;  %v2704_v11 = vld [vmem:[%s3627_s1 + $0x210] sm:$0xff]  ;;  %v469_v7 = vsel %vm397_vm0, %v464_v25, %v468_v3  ;;  %v487_v25 = vrot.slane %v485_v59, 1 }
  0x81   : > { %1996 = vmatpush.bf16.msra.mxu0 %v2704_v11  ;;  %v395_v16 = vpack.c.b16 %v387_v9, %v387_v9  ;;  %v2779_v11 = vld [vmem:[%s3033_s20 + $0x48] sm:$0xe] }
  0x82   : > { %v2780_v27 = vor.u32 %v2779_v11, %v2778_v19  ;;  %v2883_v19 = vld [vmem:[%s3033_s20 + $0xc] sm:$0xe] }
  0x83   : > { %v478_v22 = vshll.u32 %v395_v16, 16  ;;  %v546_v40 = vrot.slane %v395_v16, 1 }
  0x84   : > { %v545_v39 = vrot.slane %v2780_v27, 1 }
  0x85   : > { %1997 = vmatpush.bf16.msra.mxu0 %v2703_v0  ;;  %v480_v38 = vrot.slane %v478_v22, 1  ;;  %v483_v0 = vshrl.u32 %v3100_v28, 16  ;;  %v2765_v22 = vld [vmem:[%s3033_s20 + $0x18] sm:$0xff]  }
  0x86   : > { %v547_v47 = vsel %vm526_vm1, %v545_v39, %v546_v40  ;;  %v866_v27 = vshll.u32 %v2765_v22, 16  ;;  %v2884_v39 = vor.u32 %v2883_v19, %v3121_v35 }
  0x87   : > { %v488_v5 = vor.u32 %v487_v25, %v483_v0  ;;  %v2332_v0 = vld [vmem:[%s3033_s20 + $0x2c] sm:$0x1] }
  0x89   : > { %1998 = vmatpush.bf16.msra.mxu0 %v2702_v37  ;;  %v2794_v37 = vld [vmem:[%s3033_s20 + $0x18] sm:$0xe] }
  0x8e   : > { %1676 = vmatmul.bf16.gmra.mxu1 %v457_v42  ;;  %1725 = vmatmul.bf16.gmra.mxu2 %v541_v43  ;;  %v713_v42 = vrot.slane %v711_v36, 1  ;;  %v244_v43 = vld [vmem:[%s3033_s20 + $0x5c] sm:$0x1] }
  0x8f   : > { %v388_v48 = vunpack.c.l.b16 %v244_v43  ;;  %v2793_v36 = vld [vmem:[%s3033_s20 + $0x18] sm:$0xf0]  ;;  %v868_v43 = vrot.slane %v866_v27, 1 }
  0x90   : > { %1774 = vmatmul.bf16.gmra.mxu3 %v2289_v61  ;;  %1823 = vmatmul.bf16.gmra.mxu0 %v690_v46  ;;  %v471_v61 = vshrl.u32 %v3051_v13, 16  ;;  %v714_v50 = vsel %vm397_vm0, %v709_v41, %v713_v42  ;;  %v864_v42 = vshrl.u32 %v2765_v22, 16 }
  0x91   : > { %v396_v57 = vpack.c.b16 %v388_v48, %v388_v48  ;;  %v2885_v48 = vld [vmem:[%s3033_s20 + $0x24] sm:$0xf0] }
  0x92   : > { %v697_v26 = vor.u32 %v475_v31, %v471_v61  ;;  %v869_v53 = vor.u32 %v868_v43, %v864_v42 }
  0x93   : > { %v490_v3 = vshll.u32 %v396_v57, 16 }
  0x94   : > { %v702_v12 = vsel %vm397_vm0, %v697_v26, %v701_v24  ;;  %v481_v34 = vsel %vm397_vm0, %v697_v26, %v480_v38  ;;  %v720_v26 = vrot.slane %v718_v30, 1  ;;  %v723_v24 = vshll.u32 %v3391_v60, 16 }
  0x95   : > { %v492_v6 = vrot.slane %v490_v3, 1 }
  0x96   : > { %v3405_v9 = vor.u32 %v720_v26, %v716_v4  ;;  %v725_v28 = vrot.slane %v723_v24, 1  ;;  %v848_v4 = vunpack.c.l.b16 %v2332_v0 }
  0x97   : > { %v493_v10 = vsel %vm397_vm0, %v488_v5, %v492_v6  ;;  %v2886_v6 = vld [vmem:[%s3033_s20 + $0x24] sm:$0xe] }
  0x98   : > { %v726_v21 = vsel %vm397_vm0, %v3405_v9, %v725_v28  ;;  %v2781_v28 = vld [vmem:[%s3033_s20 + $0x18] sm:$0xf0] }
  0x9e   : > { %1681 = vmatmul.bf16.gmra.mxu1 %v469_v7  ;;  %1730 = vmatmul.bf16.gmra.mxu2 %v544_v8  ;;  %v549_v8 = vrot.slane %v396_v57, 1 }
  0xa0   : > { %1779 = vmatmul.bf16.gmra.mxu3 %v3051_v13  ;;  %1828 = vmatmul.bf16.gmra.mxu0 %v702_v12  ;;  %v2678_v13 = vld [vmem:[%s3627_s1 + $0x140] sm:$0xff] }
  0xa1   : > { %1851 = vmatpush.bf16.msra.mxu1 %v2678_v13  ;;  %v847_v13 = vunpack.c.l.b16 %v2331_v14  ;;  %v2782_v14 = vld [vmem:[%s3033_s20 + $0x18] sm:$0xe] }
  0xa3   : > { %v855_v32 = vpack.c.b16 %v847_v13, %v847_v13  ;;  %v2783_v13 = vor.u32 %v2782_v14, %v2781_v28  ;;  %v2796_v14 = vld [vmem:[%s3033_s20 + $0x30] sm:$0xf0] }
  0xa5   : > { %v871_v44 = vshll.u32 %v855_v32, 16  ;;  %v992_v30 = vrot.slane %v855_v32, 1  ;;  %v762_v43 = vrot.slane %v2783_v13, 1 }
  0xa7   : > { %v873_v57 = vrot.slane %v871_v44, 1  ;;  %v763_v44 = vrot.slane %v3225_v45, 1 }
  0xab   : > { %v3378_v46 = vpop.f32.mrf.mxu1 }
  0xad   : > { %v3382_v49 = vpop.f32.mrf.mxu0 }
  0xae   : > { %1686 = vmatmul.bf16.gmra.mxu1 %v481_v34  ;;  %1735 = vmatmul.bf16.gmra.mxu2 %v547_v47  ;;  %v2795_v34 = vor.u32 %v2794_v37, %v2793_v36  ;;  %v2317_v47 = vld [vmem:[%s3033_s20 + $0x24] sm:$0xff]  }
  0xb0   : > { %1784 = vmatmul.bf16.gmra.mxu3 %v2293_v1  ;;  %1833 = vmatmul.bf16.gmra.mxu0 %v714_v50  ;;  %v2881_v1 = vor.u32 %v2880_v52, %v3103_v29  ;;  %v759_v50 = vrot.slane %v2884_v39, 1  ;;  %v760_v52 = vrot.slane %v3163_v55, 1  ;;  %v991_v59 = vrot.slane %v2795_v34, 1 }
  0xb1   : > { %v3393_v61 = vpop.f32.mrf.mxu2  ;;  %v874_v55 = vsel %vm397_vm0, %v869_v53, %v873_v57 }
  0xb2   : > { %v548_v7 = vrot.slane %v2881_v1, 1  ;;  %v761_v1 = vsel %vm526_vm1, %v759_v50, %v760_v52  ;;  %v993_v5 = vsel %vm526_vm1, %v991_v59, %v992_v30  ;;  %v2333_v59 = vld [vmem:[%s3033_s20 + $0x38] sm:$0x1] }
  0xb3   : > { %v3395_v31 = vpop.f32.mrf.mxu3  ;;  %v3397_v63 = vpop.f32.mrf.mxu1 }
  0xb4   : > { %v550_v17 = vsel %vm526_vm1, %v548_v7, %v549_v8  ;;  %v856_v7 = vpack.c.b16 %v848_v4, %v848_v4  ;;  %v878_v8 = vshll.u32 %v2317_v47, 16 }
  0xb5   : > { %v3401_v23 = vpop.f32.mrf.mxu0 }
  0xb6   : > { %v880_v27 = vrot.slane %v878_v8, 1  ;;  %v883_v32 = vshll.u32 %v856_v7, 16  ;;  %v995_v53 = vrot.slane %v856_v7, 1 }
  0xb8   : > { %v885_v50 = vrot.slane %v883_v32, 1 }
  0xb9   : > { %v3407_v12 = vpop.f32.mrf.mxu2 }
  0xbb   : > { %v3410_v29 = vpop.f32.mrf.mxu3  ;;  %v3412_v16 = vpop.f32.mrf.mxu1 }
  0xbd   : > { %v3417_v11 = vpop.f32.mrf.mxu0 }
  0xbe   : > { %1691 = vmatmul.bf16.gmra.mxu1 %v493_v10  ;;  %1740 = vmatmul.bf16.gmra.mxu2 %v550_v17 }
  0xc0   : > { %1789 = vmatmul.bf16.gmra.mxu3 %v3387_v56  ;;  %1838 = vmatmul.bf16.gmra.mxu0 %v726_v21 }
  0xc1   : > { %v3423_v33 = vpop.f32.mrf.mxu2 }
  0xc3   : > { %v3427_v38 = vpop.f32.mrf.mxu3  ;;  %v3430_v40 = vpop.f32.mrf.mxu1 }
  0xc5   : > { %v3432_v41 = vpop.f32.mrf.mxu0 }
  0xc9   : > { %v3438_v35 = vpop.f32.mrf.mxu2 }
  0xcb   : > { %v3440_v25 = vpop.f32.mrf.mxu3  ;;  %v1657_v3 = vpop.f32.mrf.mxu1 }
  0xcc   : > { %v1658_v26 = vadd.f32 %v1657_v3, %v3382_v49  ;;  %v876_v49 = vshrl.u32 %v2317_v47, 16 }
  0xcd   : > { %v1804_v24 = vpop.f32.mrf.mxu0 }
  0xce   : > { %1852 = vmatmul.bf16.vlgmr.msra.gmra.mxu1 %v761_v1  ;;  %1901 = vmatmul.bf16.vlgmr.msra.gmra.mxu2 %v2765_v22  ;;  %v2887_v22 = vor.u32 %v2886_v6, %v2885_v48  ;;  %v881_v34 = vor.u32 %v880_v27, %v876_v49 }
  0xd0   : > { %1950 = vmatmul.bf16.vlgmr.msra.gmra.mxu3 %v874_v55  ;;  %1999 = vmatmul.bf16.vlgmr.msra.gmra.mxu0 %v993_v5  ;;  %v994_v52 = vrot.slane %v2887_v22, 1  ;;  %v886_v48 = vsel %vm397_vm0, %v881_v34, %v885_v50  ;;  %v2766_v55 = vld [vmem:[%s3033_s20 + $0x30] sm:$0xff]   ;;  %v849_v5 = vunpack.c.l.b16 %v2333_v59  ;;  %v2891_v22 = vld [vmem:[%s3033_s20 + $0x3c] sm:$0xf0]  ;;  %v766_v34 = vrot.slane %v3264_v15, 1 }
  0xd1   : > { %v1706_v10 = vpop.f32.mrf.mxu2  ;;  %v890_v7 = vshll.u32 %v2766_v55, 16  ;;  %v888_v13 = vshrl.u32 %v2766_v55, 16 }
  0xd2   : > { %v1707_v17 = vadd.f32 %v1706_v10, %v1658_v26  ;;  %v996_v26 = vsel %vm526_vm1, %v994_v52, %v995_v53  ;;  %v857_v8 = vpack.c.b16 %v849_v5, %v849_v5  ;;  %v2797_v10 = vld [vmem:[%s3033_s20 + $0x30] sm:$0xe] }
  0xd3   : > { %v1755_v19 = vpop.f32.mrf.mxu3  ;;  %v1659_v21 = vpop.f32.mrf.mxu1  ;;  %v892_v49 = vrot.slane %v890_v7, 1 }
  0xd4   : > { %v1756_v36 = vadd.f32 %v1755_v19, %v1707_v17  ;;  %v1660_v37 = vadd.f32 %v1659_v21, %v3401_v23  ;;  %v764_v23 = vsel %vm526_vm1, %v762_v43, %v763_v44  ;;  %v998_v53 = vrot.slane %v857_v8, 1 }
  0xd5   : > { %v1806_v39 = vpop.f32.mrf.mxu0  ;;  %v893_v50 = vor.u32 %v892_v49, %v888_v13 }
  0xd6   : > { %v3450_v42 = vadd.f32 %v1804_v24, %v1756_v36  ;;  %v2889_v24 = vld [vmem:[%s3033_s20 + $0x24] sm:$0xe]  ;;  %v895_v36 = vshll.u32 %v857_v8, 16  ;;  %v2784_v8 = vld [vmem:[%s3033_s20 + $0x30] sm:$0xf0] }
  0xd7   : > { %v2890_v21 = vor.u32 %v2889_v24, %v3245_v58 }
  0xd8   : > { %v897_v58 = vrot.slane %v895_v36, 1 }
  0xd9   : > { %v1708_v57 = vpop.f32.mrf.mxu2  ;;  %v765_v44 = vrot.slane %v2890_v21, 1 }
  0xda   : > { %v1709_v30 = vadd.f32 %v1708_v57, %v1660_v37  ;;  %v2798_v37 = vor.u32 %v2797_v10, %v2796_v14  ;;  %v2334_v57 = vld [vmem:[%s3033_s20 + $0x44] sm:$0x1]  ;;  %v898_v15 = vsel %vm397_vm0, %v893_v50, %v897_v58 }
  0xdb   : > { %v1757_v0 = vpop.f32.mrf.mxu3  ;;  %v1662_v3 = vpop.f32.mrf.mxu1 }
  0xdc   : > { %v1758_v1 = vadd.f32 %v1757_v0, %v1709_v30  ;;  %v1663_v45 = vadd.f32 %v1662_v3, %v3417_v11  ;;  %v997_v52 = vrot.slane %v2798_v37, 1  ;;  %v767_v3 = vsel %vm526_vm1, %v765_v44, %v766_v34 }
  0xdd   : > { %v1809_v4 = vpop.f32.mrf.mxu0  ;;  %v769_v37 = vrot.slane %v3287_v51, 1 }
  0xde   : > { %1857 = vmatmul.bf16.gmra.mxu1 %v764_v23  ;;  %1906 = vmatmul.bf16.gmra.mxu2 %v2317_v47  ;;  %v3460_v6 = vadd.f32 %v1806_v39, %v1758_v1  ;;  %v3467_v39 = vld [vmem:[%s3033_s20 + $0x3c] sm:$0xff]   ;;  %v850_v23 = vunpack.c.l.b16 %v2334_v57 }
  0xdf   : > { %v902_v5 = vshll.u32 %v3467_v39, 16 }
  0xe0   : > { %1955 = vmatmul.bf16.gmra.mxu3 %v886_v48  ;;  %2004 = vmatmul.bf16.gmra.mxu0 %v996_v26  ;;  %v2892_v26 = vld [vmem:[%s3033_s20 + $0x3c] sm:$0xe]  ;;  %v858_v7 = vpack.c.b16 %v850_v23, %v850_v23 }
  0xe1   : > { %v1711_v28 = vpop.f32.mrf.mxu2  ;;  %v904_v21 = vrot.slane %v902_v5, 1  ;;  %v2895_v23 = vld [vmem:[%s3033_s20 + $0x3c] sm:$0xe]  ;;  %v2799_v5 = vld [vmem:[%s3033_s20 + $0x48] sm:$0xf0] }
  0xe2   : > { %v1712_v11 = vadd.f32 %v1711_v28, %v1663_v45  ;;  %v2785_v28 = vld [vmem:[%s3033_s20 + $0x30] sm:$0xe]  ;;  %v907_v13 = vshll.u32 %v858_v7, 16  ;;  %v1001_v58 = vrot.slane %v858_v7, 1 }
  0xe3   : > { %v1760_v17 = vpop.f32.mrf.mxu3  ;;  %v1664_v19 = vpop.f32.mrf.mxu1 }
  0xe4   : > { %v1761_v47 = vadd.f32 %v1760_v17, %v1712_v11  ;;  %v1665_v27 = vadd.f32 %v1664_v19, %v3432_v41  ;;  %v2786_v17 = vor.u32 %v2785_v28, %v2784_v8  ;;  %v900_v19 = vshrl.u32 %v3467_v39, 16 }
  0xe5   : > { %v1811_v32 = vpop.f32.mrf.mxu0  ;;  %v909_v34 = vrot.slane %v907_v13, 1  ;;  %v2325_v13 = vld [vmem:[%s3033_s20 + $0x54] sm:$0xff]  }
  0xe6   : > { %v3470_v43 = vadd.f32 %v1809_v4, %v1761_v47  ;;  %v999_v4 = vsel %vm526_vm1, %v997_v52, %v998_v53  ;;  %v768_v36 = vrot.slane %v2786_v17, 1  ;;  %v905_v44 = vor.u32 %v904_v21, %v900_v19  ;;  %v2335_v53 = vld [vmem:[%s3033_s20 + $0x50] sm:$0x1] }
  0xe9   : > { %v1713_v59 = vpop.f32.mrf.mxu2 }
  0xea   : > { %v1714_v30 = vadd.f32 %v1713_v59, %v1665_v27  ;;  %v2893_v27 = vor.u32 %v2892_v26, %v2891_v22  ;;  %v910_v22 = vsel %vm397_vm0, %v905_v44, %v909_v34 }
  0xeb   : > { %v1762_v41 = vpop.f32.mrf.mxu3  ;;  %v1667_v0 = vpop.f32.mrf.mxu1 }
  0xec   : > { %v1763_v48 = vadd.f32 %v1762_v41, %v1714_v30  ;;  %v1668_v1 = vadd.f32 %v1667_v0, %v3378_v46  ;;  %v1000_v50 = vrot.slane %v2893_v27, 1  ;;  %v772_v27 = vrot.slane %v3317_v18, 1 }
  0xed   : > { %v1814_v45 = vpop.f32.mrf.mxu0 }
  0xee   : > { %1862 = vmatmul.bf16.gmra.mxu1 %v767_v3  ;;  %1911 = vmatmul.bf16.gmra.mxu2 %v2766_v55  ;;  %v3479_v24 = vadd.f32 %v1811_v32, %v1763_v48  ;;  %v1002_v3 = vsel %vm526_vm1, %v1000_v50, %v1001_v58  ;;  %v2767_v48 = vld [vmem:[%s3033_s20 + $0x48] sm:$0xff]   ;;  %v2336_v50 = vld [vmem:[%s3033_s20 + $0x5c] sm:$0x1] }
  0xf0   : > { %1960 = vmatmul.bf16.gmra.mxu3 %v898_v15  ;;  %2009 = vmatmul.bf16.gmra.mxu0 %v999_v4  ;;  %v914_v15 = vshll.u32 %v2767_v48, 16 }
  0xf1   : > { %v1716_v14 = vpop.f32.mrf.mxu2 }
  0xf2   : > { %v1717_v10 = vadd.f32 %v1716_v14, %v1668_v1  ;;  %v851_v1 = vunpack.c.l.b16 %v2335_v53  ;;  %v2896_v14 = vor.u32 %v2895_v23, %v3298_v62  ;;  %v2788_v23 = vld [vmem:[%s3033_s20 + $0x48] sm:$0xe] }
  0xf3   : > { %v1765_v46 = vpop.f32.mrf.mxu3  ;;  %v1669_v11 = vpop.f32.mrf.mxu1 }
  0xf4   : > { %v1766_v55 = vadd.f32 %v1765_v46, %v1717_v10  ;;  %v1670_v49 = vadd.f32 %v1669_v11, %v3397_v63  ;;  %v770_v63 = vsel %vm526_vm1, %v768_v36, %v769_v37  ;;  %v859_v4 = vpack.c.b16 %v851_v1, %v851_v1 }
  0xf5   : > { %v1816_v47 = vpop.f32.mrf.mxu0  ;;  %v912_v10 = vshrl.u32 %v2767_v48, 16  ;;  %v916_v46 = vrot.slane %v914_v15, 1 }
  0xf6   : > { %v3486_v32 = vadd.f32 %v1814_v45, %v1766_v55  ;;  %v919_v19 = vshll.u32 %v859_v4, 16  ;;  %v2897_v55 = vld [vmem:[%s3033_s20 + $0x54] sm:$0xf0]  ;;  %v1004_v44 = vrot.slane %v859_v4, 1 }
  0xf7   : > { %v917_v36 = vor.u32 %v916_v46, %v912_v10 }
  0xf8   : > { %v921_v37 = vrot.slane %v919_v19, 1 }
  0xf9   : > { %v1718_v52 = vpop.f32.mrf.mxu2 }
  0xfa   : > { %v1719_v57 = vadd.f32 %v1718_v52, %v1670_v49 }
  0xfb   : > { %v1767_v59 = vpop.f32.mrf.mxu3  ;;  %v1672_v30 = vpop.f32.mrf.mxu1 }
  0xfc   : > { %v1768_v41 = vadd.f32 %v1767_v59, %v1719_v57  ;;  %v1673_v51 = vadd.f32 %v1672_v30, %v3412_v16  ;;  %v2800_v16 = vld [vmem:[%s3033_s20 + $0x48] sm:$0xe]  ;;  %v922_v30 = vsel %vm397_vm0, %v917_v36, %v921_v37  ;;  %v2337_v36 = vld [vmem:[%s3033_s20 + $0x68] sm:$0x1] }
  0xfd   : > { %v1819_v0 = vpop.f32.mrf.mxu0  ;;  %v2801_v21 = vor.u32 %v2800_v16, %v2799_v5 }
  0xfe   : > { %1867 = vmatmul.bf16.gmra.mxu1 %v770_v63  ;;  %1916 = vmatmul.bf16.gmra.mxu2 %v3467_v39  ;;  %v3497_v45 = vadd.f32 %v1816_v47, %v1768_v41  ;;  %v771_v47 = vrot.slane %v2896_v14, 1  ;;  %v852_v63 = vunpack.c.l.b16 %v2336_v50 }
  0xff   : > { %v1003_v62 = vrot.slane %v2801_v21, 1 }
 0x100   : > { %1965 = vmatmul.bf16.gmra.mxu3 %v910_v22  ;;  %2014 = vmatmul.bf16.gmra.mxu0 %v1002_v3  ;;  %v773_v53 = vsel %vm526_vm1, %v771_v47, %v772_v27  ;;  %v2898_v22 = vld [vmem:[%s3033_s20 + $0x54] sm:$0xe]  ;;  %v2787_v3 = vld [vmem:[%s3033_s20 + $0x48] sm:$0xf0]  ;;  %v860_v1 = vpack.c.b16 %v852_v63, %v852_v63 }
 0x101   : > { %v1721_v26 = vpop.f32.mrf.mxu2  ;;  %v1005_v18 = vsel %vm526_vm1, %v1003_v62, %v1004_v44  ;;  %v2789_v16 = vor.u32 %v2788_v23, %v2787_v3  ;;  %v2899_v10 = vor.u32 %v2898_v22, %v2897_v55 }
 0x102   : > { %v1722_v7 = vadd.f32 %v1721_v26, %v1673_v51  ;;  %v926_v51 = vshll.u32 %v2325_v13, 16  ;;  %v931_v14 = vshll.u32 %v860_v1, 16  ;;  %v1007_v47 = vrot.slane %v860_v1, 1 }
 0x103   : > { %v1770_v8 = vpop.f32.mrf.mxu3  ;;  %v1674_v28 = vpop.f32.mrf.mxu1  ;;  %v1006_v21 = vrot.slane %v2899_v10, 1 }
 0x104   : > { %v1771_v39 = vadd.f32 %v1770_v8, %v1722_v7  ;;  %v1675_v11 = vadd.f32 %v1674_v28, %v3430_v40  ;;  %v924_v7 = vshrl.u32 %v2325_v13, 16  ;;  %v928_v8 = vrot.slane %v926_v51, 1 }
 0x105   : > { %v1821_v17 = vpop.f32.mrf.mxu0  ;;  %v933_v19 = vrot.slane %v931_v14, 1  ;;  %v2338_v14 = vld [vmem:[%s3033_s20 + $0x74] sm:$0x1] }
 0x106   : > { %v3505_v49 = vadd.f32 %v1819_v0, %v1771_v39  ;;  %v774_v39 = vrot.slane %v2789_v16, 1 }
 0x109   : > { %v1723_v34 = vpop.f32.mrf.mxu2 }
 0x10a   : > { %v1724_v58 = vadd.f32 %v1723_v34, %v1675_v11  ;;  %v929_v11 = vor.u32 %v928_v8, %v924_v7 }
 0x10b   : > { %v1772_v52 = vpop.f32.mrf.mxu3  ;;  %v1677_v40 = vpop.f32.mrf.mxu1 }
 0x10c   : > { %v1773_v57 = vadd.f32 %v1772_v52, %v1724_v58  ;;  %v1678_v0 = vadd.f32 %v1677_v40, %v3393_v61  ;;  %v775_v61 = vrot.slane %v3337_v54, 1  ;;  %v934_v54 = vsel %vm397_vm0, %v929_v11, %v933_v19  ;;  %v2901_v52 = vld [vmem:[%s3033_s20 + $0x54] sm:$0xe] }
 0x10d   : > { %v1824_v59 = vpop.f32.mrf.mxu0  ;;  %v1008_v58 = vsel %vm526_vm1, %v1006_v21, %v1007_v47  ;;  %v2904_v21 = vld [vmem:[%s3033_s20 + $0x6c] sm:$0xe] }
 0x10e   : > { %1872 = vmatmul.bf16.gmra.mxu1 %v773_v53  ;;  %1921 = vmatmul.bf16.gmra.mxu2 %v2767_v48  ;;  %v3513_v41 = vadd.f32 %v1821_v17, %v1773_v57  ;;  %v776_v55 = vsel %vm526_vm1, %v774_v39, %v775_v61 }
 0x110   : > { %1970 = vmatmul.bf16.gmra.mxu3 %v922_v30  ;;  %2019 = vmatmul.bf16.gmra.mxu0 %v1005_v18  ;;  %v2802_v30 = vld [vmem:[%s3033_s20 + $0x60] sm:$0xf0]  ;;  %v2803_v18 = vld [vmem:[%s3033_s20 + $0x60] sm:$0xe] }
 0x111   : > { %v1726_v15 = vpop.f32.mrf.mxu2  ;;  %v2804_v1 = vor.u32 %v2803_v18, %v2802_v30  ;;  %v781_v18 = vrot.slane %v3391_v60, 1 }
 0x112   : > { %v1727_v4 = vadd.f32 %v1726_v15, %v1678_v0  ;;  %v2902_v0 = vor.u32 %v2901_v52, %v3351_v2  ;;  %v2329_v15 = vld [vmem:[%s3033_s20 + $0x6c] sm:$0xff]  }
 0x113   : > { %v1775_v26 = vpop.f32.mrf.mxu3  ;;  %v1679_v5 = vpop.f32.mrf.mxu1  ;;  %v1009_v8 = vrot.slane %v2804_v1, 1 }
 0x114   : > { %v1776_v28 = vadd.f32 %v1775_v26, %v1727_v4  ;;  %v1680_v17 = vadd.f32 %v1679_v5, %v3407_v12  ;;  %v853_v12 = vunpack.c.l.b16 %v2337_v36  ;;  %v2903_v4 = vld [vmem:[%s3033_s20 + $0x6c] sm:$0xf0]  ;;  %v777_v5 = vrot.slane %v2902_v0, 1 }
 0x115   : > { %v1826_v48 = vpop.f32.mrf.mxu0 }
 0x116   : > { %v3518_v46 = vadd.f32 %v1824_v59, %v1776_v28  ;;  %v861_v57 = vpack.c.b16 %v853_v12, %v853_v12 }
 0x118   : > { %v943_v23 = vshll.u32 %v861_v57, 16  ;;  %v1010_v28 = vrot.slane %v861_v57, 1  ;;  %v2905_v57 = vor.u32 %v2904_v21, %v2903_v4 }
 0x119   : > { %v1728_v27 = vpop.f32.mrf.mxu2 }
 0x11a   : > { %v1729_v37 = vadd.f32 %v1728_v27, %v1680_v17  ;;  %v945_v7 = vrot.slane %v943_v23, 1  ;;  %v1011_v19 = vsel %vm526_vm1, %v1009_v8, %v1010_v28  ;;  %v950_v27 = vshll.u32 %v2329_v15, 16 }
 0x11b   : > { %v1777_v62 = vpop.f32.mrf.mxu3  ;;  %v1682_v44 = vpop.f32.mrf.mxu1 }
 0x11c   : > { %v1778_v34 = vadd.f32 %v1777_v62, %v1729_v37  ;;  %v1683_v53 = vadd.f32 %v1682_v44, %v3423_v33  ;;  %v778_v33 = vrot.slane %v3367_v20, 1  ;;  %v946_v20 = vsel %vm397_vm0, %v3405_v9, %v945_v7  ;;  %v2790_v37 = vld [vmem:[%s3033_s20 + $0x60] sm:$0xf0]  ;;  %v2791_v62 = vld [vmem:[%s3033_s20 + $0x60] sm:$0xe]  ;;  %s2270_s20 = sshll.u32 %s2928_s12, 3 }
 0x11d   : > { %v1829_v50 = vpop.f32.mrf.mxu0  ;;  %v952_v52 = vrot.slane %v950_v27, 1  ;;  %p201_p6 = scmp.lt.s32.totalorder %s2270_s20, 15  ;;  %s3645_s12 = smov (!%p211_p7, %s2928_s12), 1 }
 0x11e   : > { %1877 = vmatmul.bf16.gmra.mxu1 %v776_v55  ;;  %1926 = vmatmul.bf16.gmra.mxu2 %v2325_v13  ;;  %v3527_v40 = vadd.f32 %v1826_v48, %v1778_v34  ;;  %v779_v61 = vsel %vm526_vm1, %v777_v5, %v778_v33  ;;  %s214_s24 = sadd.s32 %s2274_s23, %s3645_s12 }
 0x11f   : > { %s3643_s20 = smov (!%p201_p6, %s2270_s20), 15  ;;  %s2275_s25 = sshll.u32 %s214_s24, 1 }
 0x120   : > { %1975 = vmatmul.bf16.gmra.mxu3 %v934_v54  ;;  %2024 = vmatmul.bf16.gmra.mxu0 %v1008_v58  ;;  %v2792_v54 = vor.u32 %v2791_v62, %v2790_v37  ;;  %v948_v58 = vshrl.u32 %v2329_v15, 16  ;;  %s2271_s8 = sshll.u32 %s3643_s20, 1  ;;  %s216_s28 = scalar_lea.vmem %s3629_s3, %s2275_s25 }
 0x121   : > { %v1731_v59 = vpop.f32.mrf.mxu2  ;;  %s205_s10 = sadd.s32 %s2272_s9, %s2271_s8 }
 0x122   : > { %v1732_v63 = vadd.f32 %v1731_v59, %v1683_v53  ;;  %v780_v30 = vrot.slane %v2792_v54, 1  ;;  %s2273_s11 = sshll.u32 %s205_s10, 3 }
 0x123   : > { %v1780_v22 = vpop.f32.mrf.mxu3  ;;  %v1684_v51 = vpop.f32.mrf.mxu1  ;;  %s3572_s22 = scalar_lea.vmem %s3628_s2, %s2273_s11 }
 0x124   : > { %v1781_v3 = vadd.f32 %v1780_v22, %v1732_v63  ;;  %v1685_v16 = vadd.f32 %v1684_v51, %v3438_v35  ;;  %v854_v35 = vunpack.c.l.b16 %v2338_v14  ;;  %v1012_v51 = vrot.slane %v2905_v57, 1 }
 0x125   : > { %v1831_v13 = vpop.f32.mrf.mxu0  ;;  %v782_v5 = vsel %vm526_vm1, %v780_v30, %v781_v18 }
 0x126   : > { %v3535_v26 = vadd.f32 %v1829_v50, %v1781_v3  ;;  %v862_v44 = vpack.c.b16 %v854_v35, %v854_v35 }
 0x128   : > { %v1013_v0 = vrot.slane %v862_v44, 1 }
 0x129   : > { %v1733_v48 = vpop.f32.mrf.mxu2 }
 0x12a   : > { %v1734_v2 = vadd.f32 %v1733_v48, %v1685_v16  ;;  %v1014_v7 = vsel %vm526_vm1, %v1012_v51, %v1013_v0 }
 0x12b   : > { %v1782_v10 = vpop.f32.mrf.mxu3  ;;  %v1687_v39 = vpop.f32.mrf.mxu1 }
 0x12c   : > { %v1783_v11 = vadd.f32 %v1782_v10, %v1734_v2  ;;  %v1688_v36 = vadd.f32 %v1687_v39, %v3395_v31  ;;  %v953_v31 = vor.u32 %v952_v52, %v948_v58 }
 0x12d   : > { %v1834_v17 = vpop.f32.mrf.mxu0 }
 0x12e   : > { %1882 = vmatmul.bf16.gmra.mxu1 %v779_v61  ;;  %1931 = vmatmul.bf16.gmra.mxu2 %v3387_v56  ;;  %v3546_v47 = vadd.f32 %v1831_v13, %v1783_v11  ;;  %v955_v56 = vshll.u32 %v862_v44, 16 }
 0x130   : > { %1980 = vmatmul.bf16.gmra.mxu3 %v946_v20  ;;  %2029 = vmatmul.bf16.gmra.mxu0 %v1011_v19  ;;  %v957_v22 = vrot.slane %v955_v56, 1 }
 0x131   : > { %v1736_v55 = vpop.f32.mrf.mxu2 }
 0x132   : > { %v1737_v34 = vadd.f32 %v1736_v55, %v1688_v36  ;;  %v958_v16 = vsel %vm397_vm0, %v953_v31, %v957_v22 }
 0x133   : > { %v1785_v9 = vpop.f32.mrf.mxu3  ;;  %v1689_v50 = vpop.f32.mrf.mxu1 }
 0x134   : > { %v1786_v12 = vadd.f32 %v1785_v9, %v1737_v34  ;;  %v1690_v63 = vadd.f32 %v1689_v50, %v3410_v29 }
 0x135   : > { %v1836_v53 = vpop.f32.mrf.mxu0 }
 0x136   : > { %v3551_v59 = vadd.f32 %v1834_v17, %v1786_v12 }
 0x139   : > { %v1738_v3 = vpop.f32.mrf.mxu2 }
 0x13a   : > { %v1739_v13 = vadd.f32 %v1738_v3, %v1690_v63 }
 0x13b   : > { %v1787_v23 = vpop.f32.mrf.mxu3  ;;  %v1692_v1 = vpop.f32.mrf.mxu1 }
 0x13c   : > { %v1788_v33 = vadd.f32 %v1787_v23, %v1739_v13  ;;  %v1693_v29 = vadd.f32 %v1692_v1, %v3427_v38 }
 0x13d   : > { %v1839_v4 = vpop.f32.mrf.mxu0 }
 0x13e   : > { %1887 = vmatmul.bf16.gmra.mxu1 %v782_v5  ;;  %1936 = vmatmul.bf16.gmra.mxu2 %v2329_v15  ;;  %v3558_v60 = vadd.f32 %v1836_v53, %v1788_v33 }
 0x140   : > { %1985 = vmatmul.bf16.gmra.mxu3 %v958_v16  ;;  %2034 = vmatmul.bf16.gmra.mxu0 %v1014_v7 }
 0x141   : > { %v1741_v8 = vpop.f32.mrf.mxu2 }
 0x142   : > { %v1742_v28 = vadd.f32 %v1741_v8, %v1693_v29 }
 0x143   : > { %v1790_v48 = vpop.f32.mrf.mxu3  ;;  %v1694_v14 = vpop.f32.mrf.mxu1 }
 0x144   : > { %v1791_v2 = vadd.f32 %v1790_v48, %v1742_v28  ;;  %v1695_v61 = vadd.f32 %v1694_v14, %v3440_v25 }
 0x145   : > { %v1841_v10 = vpop.f32.mrf.mxu0 }
 0x146   : > { %v3562_v39 = vadd.f32 %v1839_v4, %v1791_v2 }
 0x149   : > { %v1743_v15 = vpop.f32.mrf.mxu2 }
 0x14a   : > { %v1744_v11 = vadd.f32 %v1743_v15, %v1695_v61 }
 0x14b   : > { %v1792_v17 = vpop.f32.mrf.mxu3  ;;  %v1853_v20 = vpop.f32.mrf.mxu1 }
 0x14c   : > { %v1793_v19 = vadd.f32 %v1792_v17, %v1744_v11  ;;  %v1854_v21 = vadd.f32 %v1853_v20, %v3450_v42 }
 0x14d   : > { %v2000_v38 = vpop.f32.mrf.mxu0 }
 0x14e   : > { %v3566_v35 = vadd.f32 %v1841_v10, %v1793_v19 }
 0x151   : > { %v1902_v27 = vpop.f32.mrf.mxu2 }
 0x152   : > { %v1903_v36 = vadd.f32 %v1902_v27, %v1854_v21 }
 0x153   : > { %v1951_v37 = vpop.f32.mrf.mxu3  ;;  %v1855_v62 = vpop.f32.mrf.mxu1 }
 0x154   : > { %v1952_v25 = vadd.f32 %v1951_v37, %v1903_v36  ;;  %v1856_v34 = vadd.f32 %v1855_v62, %v3460_v6 }
 0x155   : > { %v2002_v44 = vpop.f32.mrf.mxu0 }
 0x156   : > { %v2001_v55 = vadd.f32 %v2000_v38, %v1952_v25 }
 0x158   : > { %2040 = vst [vmem:[%s3572_s22] sm:$0xff] %v2001_v55  ;;  %v2077_v53 = vmul.f32 %v2001_v55, %v2001_v55 }
 0x159   : > { %v1904_v9 = vpop.f32.mrf.mxu2 }
 0x15a   : > { %v1905_v42 = vadd.f32 %v1904_v9, %v1856_v34 }
 0x15b   : > { %v1953_v50 = vpop.f32.mrf.mxu3  ;;  %v1858_v54 = vpop.f32.mrf.mxu1 }
 0x15c   : > { %v1954_v58 = vadd.f32 %v1953_v50, %v1905_v42  ;;  %v1859_v30 = vadd.f32 %v1858_v54, %v3470_v43 }
 0x15d   : > { %v2005_v52 = vpop.f32.mrf.mxu0 }
 0x15e   : > { %v2003_v12 = vadd.f32 %v2002_v44, %v1954_v58 }
 0x160   : > { %2041 = vst [vmem:[%s3572_s22 + $0x8] sm:$0xff] %v2003_v12  ;;  %v2056_v56 = vadd.f32 %v2003_v12, %v2001_v55  ;;  %v2078_v57 = vmul.f32 %v2003_v12, %v2003_v12 }
 0x161   : > { %v1907_v18 = vpop.f32.mrf.mxu2 }
 0x162   : > { %v2093_v31 = vadd.f32 %v2078_v57, %v2077_v53  ;;  %v1908_v63 = vadd.f32 %v1907_v18, %v1859_v30 }
 0x163   : > { %v1956_v22 = vpop.f32.mrf.mxu3  ;;  %v1860_v51 = vpop.f32.mrf.mxu1 }
 0x164   : > { %v1957_v6 = vadd.f32 %v1956_v22, %v1908_v63  ;;  %v1861_v1 = vadd.f32 %v1860_v51, %v3479_v24 }
 0x165   : > { %v2007_v0 = vpop.f32.mrf.mxu0 }
 0x166   : > { %v2006_v3 = vadd.f32 %v2005_v52, %v1957_v6 }
 0x168   : > { %2042 = vst [vmem:[%s3572_s22 + $0x10] sm:$0xff] %v2006_v3  ;;  %v2057_v13 = vadd.f32 %v2056_v56, %v2006_v3  ;;  %v2079_v23 = vmul.f32 %v2006_v3, %v2006_v3 }
 0x169   : > { %v1909_v5 = vpop.f32.mrf.mxu2 }
 0x16a   : > { %v2094_v33 = vadd.f32 %v2093_v31, %v2079_v23  ;;  %v1910_v4 = vadd.f32 %v1909_v5, %v1861_v1 }
 0x16b   : > { %v1958_v16 = vpop.f32.mrf.mxu3  ;;  %v1863_v7 = vpop.f32.mrf.mxu1 }
 0x16c   : > { %v1959_v43 = vadd.f32 %v1958_v16, %v1910_v4  ;;  %v1864_v14 = vadd.f32 %v1863_v7, %v3486_v32 }
 0x16d   : > { %v2010_v29 = vpop.f32.mrf.mxu0 }
 0x16e   : > { %v2008_v8 = vadd.f32 %v2007_v0, %v1959_v43 }
 0x170   : > { %2043 = vst [vmem:[%s3572_s22 + $0x18] sm:$0xff] %v2008_v8  ;;  %v2058_v28 = vadd.f32 %v2057_v13, %v2008_v8  ;;  %v2080_v48 = vmul.f32 %v2008_v8, %v2008_v8 }
 0x171   : > { %v1912_v2 = vpop.f32.mrf.mxu2 }
 0x172   : > { %v2095_v10 = vadd.f32 %v2094_v33, %v2080_v48  ;;  %v1913_v61 = vadd.f32 %v1912_v2, %v1864_v14 }
 0x173   : > { %v1961_v15 = vpop.f32.mrf.mxu3  ;;  %v1865_v11 = vpop.f32.mrf.mxu1 }
 0x174   : > { %v1962_v24 = vadd.f32 %v1961_v15, %v1913_v61  ;;  %v1866_v21 = vadd.f32 %v1865_v11, %v3497_v45 }
 0x175   : > { %v2012_v17 = vpop.f32.mrf.mxu0 }
 0x176   : > { %v2011_v20 = vadd.f32 %v2010_v29, %v1962_v24 }
 0x178   : > { %2044 = vst [vmem:[%s3572_s22 + $0x20] sm:$0xff] %v2011_v20  ;;  %v2059_v19 = vadd.f32 %v2058_v28, %v2011_v20  ;;  %v2081_v38 = vmul.f32 %v2011_v20, %v2011_v20 }
 0x179   : > { %v1914_v27 = vpop.f32.mrf.mxu2 }
 0x17a   : > { %v2096_v36 = vadd.f32 %v2095_v10, %v2081_v38  ;;  %v1915_v37 = vadd.f32 %v1914_v27, %v1866_v21 }
 0x17b   : > { %v1963_v62 = vpop.f32.mrf.mxu3  ;;  %v1868_v25 = vpop.f32.mrf.mxu1 }
 0x17c   : > { %v1964_v32 = vadd.f32 %v1963_v62, %v1915_v37  ;;  %v1869_v42 = vadd.f32 %v1868_v25, %v3505_v49 }
 0x17d   : > { %v2015_v44 = vpop.f32.mrf.mxu0 }
 0x17e   : > { %v2013_v55 = vadd.f32 %v2012_v17, %v1964_v32 }
 0x180   : > { %2045 = vst [vmem:[%s3572_s22 + $0x28] sm:$0xff] %v2013_v55  ;;  %v2060_v34 = vadd.f32 %v2059_v19, %v2013_v55  ;;  %v2082_v9 = vmul.f32 %v2013_v55, %v2013_v55 }
 0x181   : > { %v1917_v50 = vpop.f32.mrf.mxu2 }
 0x182   : > { %v2097_v54 = vadd.f32 %v2096_v36, %v2082_v9  ;;  %v1918_v58 = vadd.f32 %v1917_v50, %v1869_v42 }
 0x183   : > { %v1966_v52 = vpop.f32.mrf.mxu3  ;;  %v1870_v12 = vpop.f32.mrf.mxu1 }
 0x184   : > { %v1967_v45 = vadd.f32 %v1966_v52, %v1918_v58  ;;  %v1871_v18 = vadd.f32 %v1870_v12, %v3513_v41 }
 0x185   : > { %v2017_v53 = vpop.f32.mrf.mxu0 }
 0x186   : > { %v2016_v56 = vadd.f32 %v2015_v44, %v1967_v45 }
 0x188   : > { %2046 = vst [vmem:[%s3572_s22 + $0x30] sm:$0xff] %v2016_v56  ;;  %v2061_v57 = vadd.f32 %v2060_v34, %v2016_v56  ;;  %v2083_v30 = vmul.f32 %v2016_v56, %v2016_v56 }
 0x189   : > { %v1919_v31 = vpop.f32.mrf.mxu2 }
 0x18a   : > { %v2098_v63 = vadd.f32 %v2097_v54, %v2083_v30  ;;  %v1920_v22 = vadd.f32 %v1919_v31, %v1871_v18 }
 0x18b   : > { %v1968_v51 = vpop.f32.mrf.mxu3  ;;  %v1873_v6 = vpop.f32.mrf.mxu1 }
 0x18c   : > { %v1969_v49 = vadd.f32 %v1968_v51, %v1920_v22  ;;  %v1874_v1 = vadd.f32 %v1873_v6, %v3518_v46 }
 0x18d   : > { %v2020_v0 = vpop.f32.mrf.mxu0 }
 0x18e   : > { %v2018_v3 = vadd.f32 %v2017_v53, %v1969_v49 }
 0x190   : > { %2047 = vst [vmem:[%s3572_s22 + $0x38] sm:$0xff] %v2018_v3  ;;  %v2062_v13 = vadd.f32 %v2061_v57, %v2018_v3  ;;  %v2084_v23 = vmul.f32 %v2018_v3, %v2018_v3 }
 0x191   : > { %v1922_v5 = vpop.f32.mrf.mxu2 }
 0x192   : > { %v2099_v33 = vadd.f32 %v2098_v63, %v2084_v23  ;;  %v1923_v4 = vadd.f32 %v1922_v5, %v1874_v1 }
 0x193   : > { %v1971_v16 = vpop.f32.mrf.mxu3  ;;  %v1875_v7 = vpop.f32.mrf.mxu1 }
 0x194   : > { %v1972_v41 = vadd.f32 %v1971_v16, %v1923_v4  ;;  %v1876_v48 = vadd.f32 %v1875_v7, %v3527_v40 }
 0x195   : > { %v2022_v43 = vpop.f32.mrf.mxu0 }
 0x196   : > { %v2021_v29 = vadd.f32 %v2020_v0, %v1972_v41 }
 0x198   : > { %2048 = vst [vmem:[%s3572_s22 + $0x40] sm:$0xff] %v2021_v29  ;;  %v2063_v8 = vadd.f32 %v2062_v13, %v2021_v29  ;;  %v2085_v28 = vmul.f32 %v2021_v29, %v2021_v29 }
 0x199   : > { %v1924_v14 = vpop.f32.mrf.mxu2 }
 0x19a   : > { %v2100_v2 = vadd.f32 %v2099_v33, %v2085_v28  ;;  %v1925_v10 = vadd.f32 %v1924_v14, %v1876_v48 }
 0x19b   : > { %v1973_v61 = vpop.f32.mrf.mxu3  ;;  %v1878_v15 = vpop.f32.mrf.mxu1 }
 0x19c   : > { %v1974_v46 = vadd.f32 %v1973_v61, %v1925_v10  ;;  %v1879_v19 = vadd.f32 %v1878_v15, %v3535_v26 }
 0x19d   : > { %v2025_v11 = vpop.f32.mrf.mxu0 }
 0x19e   : > { %v2023_v24 = vadd.f32 %v2022_v43, %v1974_v46 }
 0x1a0   : > { %2049 = vst [vmem:[%s3572_s22 + $0x48] sm:$0xff] %v2023_v24  ;;  %v2064_v17 = vadd.f32 %v2063_v8, %v2023_v24  ;;  %v2086_v20 = vmul.f32 %v2023_v24, %v2023_v24 }
 0x1a1   : > { %v1927_v38 = vpop.f32.mrf.mxu2 }
 0x1a2   : > { %v2101_v21 = vadd.f32 %v2100_v2, %v2086_v20  ;;  %v1928_v27 = vadd.f32 %v1927_v38, %v1879_v19 }
 0x1a3   : > { %v1976_v36 = vpop.f32.mrf.mxu3  ;;  %v1880_v37 = vpop.f32.mrf.mxu1 }
 0x1a4   : > { %v1977_v40 = vadd.f32 %v1976_v36, %v1928_v27  ;;  %v1881_v55 = vadd.f32 %v1880_v37, %v3546_v47 }
 0x1a5   : > { %v2027_v62 = vpop.f32.mrf.mxu0 }
 0x1a6   : > { %v2026_v25 = vadd.f32 %v2025_v11, %v1977_v40 }
 0x1a8   : > { %2050 = vst [vmem:[%s3572_s22 + $0x50] sm:$0xff] %v2026_v25  ;;  %v2065_v32 = vadd.f32 %v2064_v17, %v2026_v25  ;;  %v2087_v44 = vmul.f32 %v2026_v25, %v2026_v25 }
 0x1a9   : > { %v1929_v34 = vpop.f32.mrf.mxu2 }
 0x1aa   : > { %v2102_v9 = vadd.f32 %v2101_v21, %v2087_v44  ;;  %v1930_v42 = vadd.f32 %v1929_v34, %v1881_v55 }
 0x1ab   : > { %v1978_v50 = vpop.f32.mrf.mxu3  ;;  %v1883_v26 = vpop.f32.mrf.mxu1 }
 0x1ac   : > { %v1979_v54 = vadd.f32 %v1978_v50, %v1930_v42  ;;  %v1884_v53 = vadd.f32 %v1883_v26, %v3551_v59 }
 0x1ad   : > { %v2030_v52 = vpop.f32.mrf.mxu0 }
 0x1ae   : > { %v2028_v58 = vadd.f32 %v2027_v62, %v1979_v54 }
 0x1b0   : > { %2051 = vst [vmem:[%s3572_s22 + $0x58] sm:$0xff] %v2028_v58  ;;  %v2066_v12 = vadd.f32 %v2065_v32, %v2028_v58  ;;  %v2088_v45 = vmul.f32 %v2028_v58, %v2028_v58 }
 0x1b1   : > { %v1932_v56 = vpop.f32.mrf.mxu2 }
 0x1b2   : > { %v2103_v57 = vadd.f32 %v2102_v9, %v2088_v45  ;;  %v1933_v30 = vadd.f32 %v1932_v56, %v1884_v53 }
 0x1b3   : > { %v1981_v18 = vpop.f32.mrf.mxu3  ;;  %v1885_v47 = vpop.f32.mrf.mxu1 }
 0x1b4   : > { %v1982_v31 = vadd.f32 %v1981_v18, %v1933_v30  ;;  %v1886_v6 = vadd.f32 %v1885_v47, %v3558_v60 }
 0x1b5   : > { %v2032_v49 = vpop.f32.mrf.mxu0 }
 0x1b6   : > { %v2031_v63 = vadd.f32 %v2030_v52, %v1982_v31 }
 0x1b8   : > { %2052 = vst [vmem:[%s3572_s22 + $0x60] sm:$0xff] %v2031_v63  ;;  %v2067_v22 = vadd.f32 %v2066_v12, %v2031_v63  ;;  %v2089_v51 = vmul.f32 %v2031_v63, %v2031_v63 }
 0x1b9   : > { %v1934_v0 = vpop.f32.mrf.mxu2 }
 0x1ba   : > { %v2104_v3 = vadd.f32 %v2103_v57, %v2089_v51  ;;  %v1935_v13 = vadd.f32 %v1934_v0, %v1886_v6 }
 0x1bb   : > { %v1983_v23 = vpop.f32.mrf.mxu3  ;;  %v1888_v59 = vpop.f32.mrf.mxu1 }
 0x1bc   : > { %v1984_v1 = vadd.f32 %v1983_v23, %v1935_v13  ;;  %v1889_v16 = vadd.f32 %v1888_v59, %v3562_v39 }
 0x1bd   : > { %v2035_v60 = vpop.f32.mrf.mxu0 }
 0x1be   : > { %v2033_v5 = vadd.f32 %v2032_v49, %v1984_v1 }
 0x1c0   : > { %2053 = vst [vmem:[%s3572_s22 + $0x68] sm:$0xff] %v2033_v5  ;;  %v2068_v33 = vadd.f32 %v2067_v22, %v2033_v5  ;;  %v2090_v4 = vmul.f32 %v2033_v5, %v2033_v5 }
 0x1c1   : > { %v1937_v7 = vpop.f32.mrf.mxu2 }
 0x1c2   : > { %v2105_v41 = vadd.f32 %v2104_v3, %v2090_v4  ;;  %v1938_v43 = vadd.f32 %v1937_v7, %v1889_v16 }
 0x1c3   : > { %v1986_v29 = vpop.f32.mrf.mxu3  ;;  %v1890_v28 = vpop.f32.mrf.mxu1 }
 0x1c4   : > { %v1987_v8 = vadd.f32 %v1986_v29, %v1938_v43  ;;  %v1891_v10 = vadd.f32 %v1890_v28, %v3566_v35 }
 0x1c5   : > { %v2037_v24 = vpop.f32.mrf.mxu0 }
 0x1c6   : > { %v2036_v48 = vadd.f32 %v2035_v60, %v1987_v8 }
 0x1c8   : > { %2054 = vst [vmem:[%s3572_s22 + $0x70] sm:$0xff] %v2036_v48  ;;  %v2069_v14 = vadd.f32 %v2068_v33, %v2036_v48  ;;  %v2091_v2 = vmul.f32 %v2036_v48, %v2036_v48 }
 0x1c9   : > { %v1939_v61 = vpop.f32.mrf.mxu2 }
 0x1ca   : > { %v2106_v15 = vadd.f32 %v2105_v41, %v2091_v2  ;;  %v1940_v39 = vadd.f32 %v1939_v61, %v1891_v10 }
 0x1cb   : > { %v1988_v46 = vpop.f32.mrf.mxu3 }
 0x1cc   : > { %v1989_v11 = vadd.f32 %v1988_v46, %v1940_v39 }
 0x1ce   : > { %v2038_v17 = vadd.f32 %v2037_v24, %v1989_v11 }
 0x1d0   : > { %2055 = vst [vmem:[%s3572_s22 + $0x78] sm:$0xff] %v2038_v17  ;;  %v2070_v20 = vadd.f32 %v2069_v14, %v2038_v17  ;;  %v2092_v19 = vmul.f32 %v2038_v17, %v2038_v17 }
 0x1d2   : > { %v2071_v38 = vrot.slane %v2070_v20, 4  ;;  %v2107_v21 = vadd.f32 %v2106_v15, %v2092_v19 }
 0x1d4   : > { %v2072_v27 = vadd.f32 %v2071_v38, %v2070_v20  ;;  %v2108_v36 = vrot.slane %v2107_v21, 4 }
 0x1d6   : > { %v2073_v37 = vrot.slane %v2072_v27, 2  ;;  %v2109_v35 = vadd.f32 %v2108_v36, %v2107_v21 }
 0x1d8   : > { %v2074_v40 = vadd.f32 %v2073_v37, %v2072_v27  ;;  %v2110_v62 = vrot.slane %v2109_v35, 2 }
 0x1da   : > { %v2075_v25 = vrot.slane %v2074_v40, 1  ;;  %v2111_v32 = vadd.f32 %v2110_v62, %v2109_v35 }
 0x1dc   : > { %v2112_v44 = vrot.slane %v2111_v32, 1  ;;  %v2076_v55 = vadd.f32 %v2075_v25, %v2074_v40 }
 0x1de   : > { %v2113_v34 = vadd.f32 %v2112_v44, %v2111_v32 }
 0x1e0   : > { %v2115_v9 = vsel %vm2114_vm2, %v2076_v55, %v2113_v34 }
 0x1e1   : > { %2116 = vst [vmem:[%s216_s28] sm:$0x3] %v2115_v9 }
 0x1e2 PF: > { %s14_s16 = sadd.s32 1, %s2944_s16   ;;  %s3630_s12 = smov %s2936_s14 }
 0x1e3   : > { %p11_p8 = scmp.ge.s32.totalorder %s14_s16, 6   ;;  %s3631_s13 = smov %s2940_s15 }
 0x1e4   : > { %s3632_s14 = smov %s3635_s17  ;;  %s3633_s15 = smov %s3639_s18 }
 0x1e5   :  { %13 = sbr.rel (!%p11_p8) target bundleno = 3 (0x3), region = 73 }

</bundles_post_ra>
